<compile_context>
chip_gen: v5e
topology: v5e:2x2
jax: 0.10.0
libtpu: 0.0.40
codegen_flags: <defaults>
</compile_context>

<pallas_src>
import jax
import jax.numpy as jnp
import numpy as np
from jax.experimental import pallas as pl
from jax.experimental.pallas import tpu as pltpu

KH = KW = 7          # CNNIQAnet conv kernel size
N_KERNELS = 50       # conv output channels
FC_HIDDEN = 800      # FC hidden width (logical)
NUM_OUT = 3          # BenchMarkIQA splits the last dim into 3 heads
C_PAD = 64           # conv channels padded 50 -> 64 so 2*C_PAD = 128 lanes
FC_PAD = 1024        # 800 -> 1024: full 256-wide MXU passes (use 896 on v5e)
OUT_PAD = 128        # 3 -> 128: lane-dense output store
FUSE_MAX_N = 8       # fuse the MLP head into the conv kernel for tiny batches
TP_MAX = 2048        # stage-1 P tile (sweep 2048-4096)


def _round_up(x, m):
    return (x + m - 1) // m * m


# ------------------------------ kernel-side math ----------------------------- #
def _mlp(feat, w1, b1, w2, b2, w3, b3):
    """3-layer MLP head: bf16 MXU operands, f32 accumulation (padding exact)."""
    h1 = jnp.maximum(
        jnp.dot(feat, w1, preferred_element_type=jnp.float32) + b1, 0.0)
    h2 = jnp.maximum(
        jnp.dot(h1.astype(w2.dtype), w2,
                preferred_element_type=jnp.float32) + b2, 0.0)
    return jnp.dot(h2.astype(w3.dtype), w3,
                   preferred_element_type=jnp.float32) + b3


def _masked_minmax(conv, p, tp, p_total, mx_prev, mn_prev):
    """Max/min over valid rows of the (ragged) last P tile."""
    row = jax.lax.broadcasted_iota(jnp.int32, conv.shape, 0)
    valid = (p * tp + row) < p_total
    mx = jnp.maximum(mx_prev, jnp.max(jnp.where(valid, conv, -jnp.inf),
                                      axis=0, keepdims=True))
    mn = jnp.minimum(mn_prev, jnp.min(jnp.where(valid, conv, jnp.inf),
                                      axis=0, keepdims=True))
    return mx, mn


# ------------------------------ Pallas kernels ------------------------------ #
def make_conv_pool_kernel(p_total):
    """Stage 1: conv-as-matmul over a P tile + running max/min pooling."""
    def kernel(patches_ref, wconv_ref, bconv_ref, feat_ref, mx_ref, mn_ref):
        p = pl.program_id(1)
        last = pl.num_programs(1) - 1
        tp = patches_ref.shape[1]

        @pl.when(p == 0)
        def _init():
            mx_ref[...] = jnp.full(mx_ref.shape, -jnp.inf, jnp.float32)
            mn_ref[...] = jnp.full(mn_ref.shape, jnp.inf, jnp.float32)

        # One bf16 MXU matmul per grid step, f32 accumulation.
        conv = jnp.dot(patches_ref[0], wconv_ref[...],
                       preferred_element_type=jnp.float32)        # (tp, C_PAD)

        @pl.when(p < last)
        def _accum():  # full tiles: no mask work
            mx_ref[...] = jnp.maximum(mx_ref[...],
                                      jnp.max(conv, axis=0, keepdims=True))
            mn_ref[...] = jnp.minimum(mn_ref[...],
                                      jnp.min(conv, axis=0, keepdims=True))

        @pl.when(p == last)
        def _finalize():   # ragged tile: mask padded rows, add deferred bias
            mx, mn = _masked_minmax(conv, p, tp, p_total, mx_ref[...], mn_ref[...])
            b = bconv_ref[...]                                    # (1, C_PAD) f32
            feat = jnp.concatenate([mx + b, mn + b], axis=-1)     # (1, 2*C_PAD)
            feat_ref[...] = feat.astype(feat_ref.dtype).reshape(1, 1, 2 * C_PAD)

    return kernel


def make_fused_kernel(p_total):
    """Stage 1 + MLP head fused (small batch): one launch, no feat HBM hop."""
    def kernel(patches_ref, wconv_ref, bconv_ref,
               w1_ref, b1_ref, w2_ref, b2_ref, w3_ref, b3_ref,
               out_ref, mx_ref, mn_ref):
        p = pl.program_id(1)
        last = pl.num_programs(1) - 1
        tp = patches_ref.shape[1]

        @pl.when(p == 0)
        def _init():
            mx_ref[...] = jnp.full(mx_ref.shape, -jnp.inf, jnp.float32)
            mn_ref[...] = jnp.full(mn_ref.shape, jnp.inf, jnp.float32)

        conv = jnp.dot(patches_ref[0], wconv_ref[...],
                       preferred_element_type=jnp.float32)        # (tp, C_PAD)

        @pl.when(p < last)
        def _accum():
            mx_ref[...] = jnp.maximum(mx_ref[...],
                                      jnp.max(conv, axis=0, keepdims=True))
            mn_ref[...] = jnp.minimum(mn_ref[...],
                                      jnp.min(conv, axis=0, keepdims=True))

        @pl.when(p == last)
        def _finalize():
            mx, mn = _masked_minmax(conv, p, tp, p_total, mx_ref[...], mn_ref[...])
            b = bconv_ref[...]
            feat = jnp.concatenate([mx + b, mn + b],
                                   axis=-1).astype(jnp.bfloat16)  # (1, 128)
            out = _mlp(feat, w1_ref[...], b1_ref[...], w2_ref[...], b2_ref[...],
                       w3_ref[...], b3_ref[...])                  # (1, OUT_PAD) f32
            out_ref[...] = out.reshape(1, 1, OUT_PAD).astype(out_ref.dtype)

    return kernel


def mlp_kernel(feat_ref, w1_ref, b1_ref, w2_ref, b2_ref, w3_ref, b3_ref, out_ref):
    """Stage 2 (large batch): 3-layer MLP head over a batch tile."""
    out = _mlp(feat_ref[...], w1_ref[...], b1_ref[...], w2_ref[...], b2_ref[...],
               w3_ref[...], b3_ref[...])
    out_ref[...] = out.astype(out_ref.dtype)


# ------------------------------- host-side glue ------------------------------ #
def im2col(img, kh, kw, k_pad=None):
    """img (N,C,H,W) -> patches (N, Ho*Wo, k_pad) bf16, K zero-padded in-producer.

    Column order matches PyTorch Conv2d weight flattening (C, kh, kw).
    """
    N, C, H, W = img.shape
    Ho, Wo = H - kh + 1, W - kw + 1
    cols = []
    for di in range(kh):
        for dj in range(kw):
            cols.append(img[:, :, di:di + Ho, dj:dj + Wo])        # (N, C, Ho, Wo)
    patches = jnp.stack(cols, axis=2)                             # (N, C, kh*kw, Ho, Wo)
    K = C * kh * kw
    patches = patches.reshape(N, K, Ho * Wo)
    patches = jnp.transpose(patches, (0, 2, 1)).astype(jnp.bfloat16)   # (N, P, K)
    if k_pad is not None and k_pad != K:
        patches = jnp.pad(patches, ((0, 0), (0, 0), (0, k_pad - K)))
    return patches


def pad_params_for_kernel(params, k_pad):
    """Zero-pad to MXU/lane-friendly shapes; cast matmul operands to bf16.

    All padding is exact: padded weight rows/cols and biases are zero, and
    ReLU(0)=0, so padded hidden/out lanes stay exactly zero.
    """
    f32, bf16 = jnp.float32, jnp.bfloat16
    K = params['wconv'].shape[0]

    wconv = jnp.zeros((k_pad, C_PAD), f32).at[:K, :N_KERNELS].set(params['wconv'])
    bconv = jnp.zeros((1, C_PAD), f32).at[:, :N_KERNELS].set(params['bconv'])

    w1 = jnp.zeros((2 * C_PAD, FC_PAD), f32)
    w1 = w1.at[:N_KERNELS, :FC_HIDDEN].set(params['w1'][:N_KERNELS])
    w1 = w1.at[C_PAD:C_PAD + N_KERNELS, :FC_HIDDEN].set(params['w1'][N_KERNELS:])
    b1 = jnp.zeros((1, FC_PAD), f32).at[:, :FC_HIDDEN].set(params['b1'])
    w2 = jnp.zeros((FC_PAD, FC_PAD), f32).at[:FC_HIDDEN, :FC_HIDDEN].set(params['w2'])
    b2 = jnp.zeros((1, FC_PAD), f32).at[:, :FC_HIDDEN].set(params['b2'])
    w3 = jnp.zeros((FC_PAD, OUT_PAD), f32).at[:FC_HIDDEN, :NUM_OUT].set(params['w3'])
    b3 = jnp.zeros((1, OUT_PAD), f32).at[:, :NUM_OUT].set(params['b3'])

    return dict(
        wconv=wconv.astype(bf16),
        bconv=bconv,                       # f32: added once, post-pooling
        w1=w1.astype(bf16), b1=b1,
        w2=w2.astype(bf16), b2=b2,
        w3=w3.astype(bf16), b3=b3,
    )


def benchmark_iqa_forward(img, params):
    N, C, H, W = img.shape
    K = C * KH * KW
    k_pad = _round_up(K, 8)
    patches = im2col(img, KH, KW, k_pad)                          # (N, P, k_pad) bf16
    P = patches.shape[1]

    tp = min(TP_MAX, _round_up(P, 128))
    n_ptiles = pl.cdiv(P, tp)                                     # no P-axis padding
    kp = pad_params_for_kernel(params, k_pad)

    const_ip = lambda i, p: (0, 0)
    patches_spec = pl.BlockSpec((1, tp, k_pad), lambda i, p: (i, p, 0))
    wconv_spec = pl.BlockSpec((k_pad, C_PAD), const_ip)
    bconv_spec = pl.BlockSpec((1, C_PAD), const_ip)

    if N <= FUSE_MAX_N:
        # ---- fused single kernel: conv + pooling + MLP head per sample ---- #
        out = pl.pallas_call(
            make_fused_kernel(P),
            out_shape=jax.ShapeDtypeStruct((N, 1, OUT_PAD), jnp.float32),
            grid_spec=pltpu.PrefetchScalarGridSpec(
                num_scalar_prefetch=0,
                grid=(N, n_ptiles),
                in_specs=[
                    patches_spec, wconv_spec, bconv_spec,
                    pl.BlockSpec((2 * C_PAD, FC_PAD), const_ip),
                    pl.BlockSpec((1, FC_PAD), const_ip),
                    pl.BlockSpec((FC_PAD, FC_PAD), const_ip),
                    pl.BlockSpec((1, FC_PAD), const_ip),
                    pl.BlockSpec((FC_PAD, OUT_PAD), const_ip),
                    pl.BlockSpec((1, OUT_PAD), const_ip),
                ],
                out_specs=pl.BlockSpec((1, 1, OUT_PAD), lambda i, p: (i, 0, 0)),
                scratch_shapes=[pltpu.VMEM((1, C_PAD), jnp.float32),
                                pltpu.VMEM((1, C_PAD), jnp.float32)]),
            compiler_params=pltpu.CompilerParams(
                dimension_semantics=("parallel", "arbitrary")),
        )(patches, kp['wconv'], kp['bconv'], kp['w1'], kp['b1'],
          kp['w2'], kp['b2'], kp['w3'], kp['b3'])
        out = out.reshape(N, OUT_PAD)
    else:
        # ---- stage 1: conv + global max/min pooling -> feat (N, 128) ----- #
        feat = pl.pallas_call(
            make_conv_pool_kernel(P),
            out_shape=jax.ShapeDtypeStruct((N, 1, 2 * C_PAD), jnp.bfloat16),
            grid_spec=pltpu.PrefetchScalarGridSpec(
                num_scalar_prefetch=0,
                grid=(N, n_ptiles),
                in_specs=[patches_spec, wconv_spec, bconv_spec],
                out_specs=pl.BlockSpec((1, 1, 2 * C_PAD), lambda i, p: (i, 0, 0)),
                scratch_shapes=[pltpu.VMEM((1, C_PAD), jnp.float32),
                                pltpu.VMEM((1, C_PAD), jnp.float32)]),
            compiler_params=pltpu.CompilerParams(
                dimension_semantics=("parallel", "arbitrary")),
        )(patches, kp['wconv'], kp['bconv'])
        feat = feat.reshape(N, 2 * C_PAD)

        # ---- stage 2: batched MLP head (full MXU M occupancy) ------------- #
        nm = min(256, _round_up(N, 8))
        const_i = lambda i: (0, 0)
        out = pl.pallas_call(
            mlp_kernel,
            out_shape=jax.ShapeDtypeStruct((N, OUT_PAD), jnp.float32),
            grid_spec=pltpu.PrefetchScalarGridSpec(
                num_scalar_prefetch=0,
                grid=(pl.cdiv(N, nm),),
                in_specs=[
                    pl.BlockSpec((nm, 2 * C_PAD), lambda i: (i, 0)),
                    pl.BlockSpec((2 * C_PAD, FC_PAD), const_i),
                    pl.BlockSpec((1, FC_PAD), const_i),
                    pl.BlockSpec((FC_PAD, FC_PAD), const_i),
                    pl.BlockSpec((1, FC_PAD), const_i),
                    pl.BlockSpec((FC_PAD, OUT_PAD), const_i),
                    pl.BlockSpec((1, OUT_PAD), const_i),
                ],
                out_specs=pl.BlockSpec((nm, OUT_PAD), lambda i: (i, 0))),
            compiler_params=pltpu.CompilerParams(
                dimension_semantics=("parallel",)),
        )(feat, kp['w1'], kp['b1'], kp['w2'], kp['b2'], kp['w3'], kp['b3'])

    out = out[:, :NUM_OUT]
    # BenchMarkIQA.forward: return (out[...,0], out[...,1], out[...,2])
    return out[..., 0], out[..., 1], out[..., 2]


# --------------------------- deterministic params --------------------------- #
def init_params(key, in_ch):
    K = in_ch * KH * KW
    ks = jax.random.split(key, 4)

    def w(k, shape, fan_in):
        return (jax.random.normal(k, shape, jnp.float32)
                / jnp.sqrt(jnp.float32(fan_in)))

    return dict(
        wconv=w(ks[0], (K, N_KERNELS), K),
        bconv=jnp.full((1, N_KERNELS), 0.01, jnp.float32),
        w1=w(ks[1], (2 * N_KERNELS, FC_HIDDEN), 2 * N_KERNELS),
        b1=jnp.full((1, FC_HIDDEN), 0.01, jnp.float32),
        w2=w(ks[2], (FC_HIDDEN, FC_HIDDEN), FC_HIDDEN),
        b2=jnp.full((1, FC_HIDDEN), 0.01, jnp.float32),
        w3=w(ks[3], (FC_HIDDEN, NUM_OUT), FC_HIDDEN),
        b3=jnp.zeros((1, NUM_OUT), jnp.float32),
    )


# ------------------------------ pure-JAX reference -------------------------- #
def reference_forward(img, params):
    # Mirrors the kernel's numerics: bf16 matmul operands, f32 accumulation.
    bf16 = jnp.bfloat16
    patches = im2col(img, KH, KW)                                  # (N, P, K) bf16
    conv = jnp.einsum('npk,kc->npc', patches, params['wconv'].astype(bf16),
                      preferred_element_type=jnp.float32)
    mx = jnp.max(conv, axis=1) + params['bconv']
    mn = jnp.min(conv, axis=1) + params['bconv']
    feat = jnp.concatenate([mx, mn], axis=-1).astype(bf16)
    h1 = jnp.maximum(jnp.dot(feat, params['w1'].astype(bf16),
                             preferred_element_type=jnp.float32) + params['b1'], 0.0)
    h2 = jnp.maximum(jnp.dot(h1.astype(bf16), params['w2'].astype(bf16),
                             preferred_element_type=jnp.float32) + params['b2'], 0.0)
    out = jnp.dot(h2.astype(bf16), params['w3'].astype(bf16),
                  preferred_element_type=jnp.float32) + params['b3']
    return out[..., 0], out[..., 1], out[..., 2]


if __name__ == "__main__":
    key = jax.random.PRNGKey(0)
    kimg, kparam, kimg2 = jax.random.split(key, 3)
    params = init_params(kparam, in_ch=1)
    fwd = jax.jit(benchmark_iqa_forward)

    # Test 1: tiny batch -> fused single-kernel path.
    # CNNIQAnet operates on grayscale patches: N=2, C=1, H=W=16 -> 10x10 conv out.
    img = jax.random.normal(kimg, (2, 1, 16, 16), jnp.float32)
    o0, o1, o2 = fwd(img, params)
    jax.block_until_ready((o0, o1, o2))
    r0, r1, r2 = reference_forward(img, params)
    for a, b in zip((o0, o1, o2), (r0, r1, r2)):
        np.testing.assert_allclose(np.asarray(a), np.asarray(b),
                                   rtol=1e-2, atol=1e-2)

    # Test 2: larger batch + multi-P-tile with ragged last tile -> two-stage path.
    img2 = jax.random.normal(kimg2, (12, 1, 52, 52), jnp.float32)   # P = 46*46 = 2116
    q0, q1, q2 = fwd(img2, params)
    jax.block_until_ready((q0, q1, q2))
    s0, s1, s2 = reference_forward(img2, params)
    for a, b in zip((q0, q1, q2), (s0, s1, s2)):
        np.testing.assert_allclose(np.asarray(a), np.asarray(b),
                                   rtol=1e-2, atol=1e-2)

    print("KERNEL_OK")
</pallas_src>

<mosaic_0001>
module attributes {stable_mosaic.version = 11 : i64} {
  func.func @kernel(%arg0: i32, %arg1: i32, %arg2: memref<1x128x56xbf16, #tpu.memory_space<vmem>>, %arg3: memref<56x64xbf16, #tpu.memory_space<vmem>>, %arg4: memref<1x64xf32, #tpu.memory_space<vmem>>, %arg5: memref<128x1024xbf16, #tpu.memory_space<vmem>>, %arg6: memref<1x1024xf32, #tpu.memory_space<vmem>>, %arg7: memref<1024x1024xbf16, #tpu.memory_space<vmem>>, %arg8: memref<1x1024xf32, #tpu.memory_space<vmem>>, %arg9: memref<1024x128xbf16, #tpu.memory_space<vmem>>, %arg10: memref<1x128xf32, #tpu.memory_space<vmem>>, %arg11: memref<1x1x128xf32, #tpu.memory_space<vmem>>, %arg12: memref<1x64xf32, #tpu.memory_space<vmem>>, %arg13: memref<1x64xf32, #tpu.memory_space<vmem>>) attributes {dimension_semantics = [#tpu.dimension_semantics<parallel>, #tpu.dimension_semantics<arbitrary>], iteration_bounds = array<i64: 2, 1>, scalar_prefetch = 0 : i64, scratch_operands = 2 : i64, tpu.core_type = #tpu.core_type<tc>, window_params = [{transform_indices = @transform_0, window_bounds = array<i64: 1, 128, 56>}, {pipeline_mode = #tpu.pipeline_mode<synchronous>, transform_indices = @transform_1, window_bounds = array<i64: 56, 64>}, {pipeline_mode = #tpu.pipeline_mode<synchronous>, transform_indices = @transform_2, window_bounds = array<i64: 1, 64>}, {pipeline_mode = #tpu.pipeline_mode<synchronous>, transform_indices = @transform_3, window_bounds = array<i64: 128, 1024>}, {pipeline_mode = #tpu.pipeline_mode<synchronous>, transform_indices = @transform_4, window_bounds = array<i64: 1, 1024>}, {pipeline_mode = #tpu.pipeline_mode<synchronous>, transform_indices = @transform_5, window_bounds = array<i64: 1024, 1024>}, {pipeline_mode = #tpu.pipeline_mode<synchronous>, transform_indices = @transform_6, window_bounds = array<i64: 1, 1024>}, {pipeline_mode = #tpu.pipeline_mode<synchronous>, transform_indices = @transform_7, window_bounds = array<i64: 1024, 128>}, {pipeline_mode = #tpu.pipeline_mode<synchronous>, transform_indices = @transform_8, window_bounds = array<i64: 1, 128>}, {transform_indices = @transform_9, window_bounds = array<i64: 1, 1, 128>}]} {
    %c0_i32 = arith.constant 0 : i32
    %0 = arith.cmpi eq, %arg1, %c0_i32 : i32
    %1 = arith.extui %0 : i1 to i32
    %c0_i32_0 = arith.constant 0 : i32
    %2 = arith.cmpi ne, %1, %c0_i32_0 : i32
    scf.if %2 {
      %cst_9 = arith.constant 0xFF800000 : f32
      %13 = vector.broadcast %cst_9 : f32 to vector<1x64xf32>
      %c0_10 = arith.constant 0 : index
      %c0_11 = arith.constant 0 : index
      %14 = vector.load %arg12[%c0_10, %c0_11] : memref<1x64xf32, #tpu.memory_space<vmem>>, vector<1x64xf32>
      tpu.vector_store %arg12[%c0_10, %c0_11], %13 {strides = array<i32>} : memref<1x64xf32, #tpu.memory_space<vmem>>, vector<1x64xf32>,
      %cst_12 = arith.constant 0x7F800000 : f32
      %15 = vector.broadcast %cst_12 : f32 to vector<1x64xf32>
      %c0_13 = arith.constant 0 : index
      %c0_14 = arith.constant 0 : index
      %16 = vector.load %arg13[%c0_13, %c0_14] : memref<1x64xf32, #tpu.memory_space<vmem>>, vector<1x64xf32>
      tpu.vector_store %arg13[%c0_13, %c0_14], %15 {strides = array<i32>} : memref<1x64xf32, #tpu.memory_space<vmem>>, vector<1x64xf32>,
    } else {
    }
    %c0 = arith.constant 0 : index
    %c0_1 = arith.constant 0 : index
    %c0_2 = arith.constant 0 : index
    %3 = vector.load %arg2[%c0, %c0_1, %c0_2] : memref<1x128x56xbf16, #tpu.memory_space<vmem>>, vector<1x128x56xbf16>
    %4 = vector.shape_cast %3 : vector<1x128x56xbf16> to vector<128x56xbf16>
    %c0_3 = arith.constant 0 : index
    %c0_4 = arith.constant 0 : index
    %5 = vector.load %arg3[%c0_3, %c0_4] : memref<56x64xbf16, #tpu.memory_space<vmem>>, vector<56x64xbf16>
    %cst = arith.constant dense<0.000000e+00> : vector<128x64xf32>
    %6 = tpu.matmul %4, %5, %cst {dimension_numbers = #tpu.dot_dimension_numbers<[1], [0], [0], [1], [0, 0, 1, 1], [], []>} : vector<128x56xbf16>, vector<56x64xbf16>, vector<128x64xf32> -> vector<128x64xf32>
    %c0_i32_5 = arith.constant 0 : i32
    %7 = arith.cmpi slt, %arg1, %c0_i32_5 : i32
    %8 = arith.extui %7 : i1 to i32
    %c0_i32_6 = arith.constant 0 : i32
    %9 = arith.cmpi ne, %8, %c0_i32_6 : i32
    scf.if %9 {
      %c0_9 = arith.constant 0 : index
      %c0_10 = arith.constant 0 : index
      %13 = vector.load %arg12[%c0_9, %c0_10] : memref<1x64xf32, #tpu.memory_space<vmem>>, vector<1x64xf32>
      %cst_11 = arith.constant dense<0xFF800000> : vector<64xf32>
      %14 = vector.multi_reduction <maximumf>, %6, %cst_11 [0] : vector<128x64xf32> to vector<64xf32>
      %15 = vector.shape_cast %14 : vector<64xf32> to vector<1x64xf32>
      %16 = arith.maximumf %13, %15 : vector<1x64xf32>
      %c0_12 = arith.constant 0 : index
      %c0_13 = arith.constant 0 : index
      %17 = vector.load %arg12[%c0_12, %c0_13] : memref<1x64xf32, #tpu.memory_space<vmem>>, vector<1x64xf32>
      tpu.vector_store %arg12[%c0_12, %c0_13], %16 {strides = array<i32>} : memref<1x64xf32, #tpu.memory_space<vmem>>, vector<1x64xf32>,
      %c0_14 = arith.constant 0 : index
      %c0_15 = arith.constant 0 : index
      %18 = vector.load %arg13[%c0_14, %c0_15] : memref<1x64xf32, #tpu.memory_space<vmem>>, vector<1x64xf32>
      %cst_16 = arith.constant dense<0x7F800000> : vector<64xf32>
      %19 = vector.multi_reduction <minimumf>, %6, %cst_16 [0] : vector<128x64xf32> to vector<64xf32>
      %20 = vector.shape_cast %19 : vector<64xf32> to vector<1x64xf32>
      %21 = arith.minimumf %18, %20 : vector<1x64xf32>
      %c0_17 = arith.constant 0 : index
      %c0_18 = arith.constant 0 : index
      %22 = vector.load %arg13[%c0_17, %c0_18] : memref<1x64xf32, #tpu.memory_space<vmem>>, vector<1x64xf32>
      tpu.vector_store %arg13[%c0_17, %c0_18], %21 {strides = array<i32>} : memref<1x64xf32, #tpu.memory_space<vmem>>, vector<1x64xf32>,
    } else {
    }
    %c0_i32_7 = arith.constant 0 : i32
    %10 = arith.cmpi eq, %arg1, %c0_i32_7 : i32
    %11 = arith.extui %10 : i1 to i32
    %c0_i32_8 = arith.constant 0 : i32
    %12 = arith.cmpi ne, %11, %c0_i32_8 : i32
    scf.if %12 {
      %c0_9 = arith.constant 0 : index
      %c0_10 = arith.constant 0 : index
      %13 = vector.load %arg12[%c0_9, %c0_10] : memref<1x64xf32, #tpu.memory_space<vmem>>, vector<1x64xf32>
      %c0_11 = arith.constant 0 : index
      %c0_12 = arith.constant 0 : index
      %14 = vector.load %arg13[%c0_11, %c0_12] : memref<1x64xf32, #tpu.memory_space<vmem>>, vector<1x64xf32>
      %15 = tpu.iota {dimensions = array<i32: 0>} : vector<128x64xi32>
      %c128_i32 = arith.constant 128 : i32
      %16 = arith.muli %arg1, %c128_i32 : i32
      %17 = vector.broadcast %16 : i32 to vector<128x64xi32>
      %18 = arith.addi %17, %15 : vector<128x64xi32>
      %c100_i32 = arith.constant 100 : i32
      %19 = vector.broadcast %c100_i32 : i32 to vector<128x64xi32>
      %20 = arith.cmpi slt, %18, %19 : vector<128x64xi32>
      %cst_13 = arith.constant 0xFF800000 : f32
      %21 = vector.broadcast %cst_13 : f32 to vector<128x64xf32>
      %22 = arith.select %20, %6, %21 : vector<128x64xi1>, vector<128x64xf32>
      %cst_14 = arith.constant dense<0xFF800000> : vector<64xf32>
      %23 = vector.multi_reduction <maximumf>, %22, %cst_14 [0] : vector<128x64xf32> to vector<64xf32>
      %24 = vector.shape_cast %23 : vector<64xf32> to vector<1x64xf32>
      %25 = arith.maximumf %13, %24 : vector<1x64xf32>
      %cst_15 = arith.constant 0x7F800000 : f32
      %26 = vector.broadcast %cst_15 : f32 to vector<128x64xf32>
      %27 = arith.select %20, %6, %26 : vector<128x64xi1>, vector<128x64xf32>
      %cst_16 = arith.constant dense<0x7F800000> : vector<64xf32>
      %28 = vector.multi_reduction <minimumf>, %27, %cst_16 [0] : vector<128x64xf32> to vector<64xf32>
      %29 = vector.shape_cast %28 : vector<64xf32> to vector<1x64xf32>
      %30 = arith.minimumf %14, %29 : vector<1x64xf32>
      %c0_17 = arith.constant 0 : index
      %c0_18 = arith.constant 0 : index
      %31 = vector.load %arg4[%c0_17, %c0_18] : memref<1x64xf32, #tpu.memory_space<vmem>>, vector<1x64xf32>
      %32 = arith.addf %25, %31 : vector<1x64xf32>
      %33 = arith.addf %30, %31 : vector<1x64xf32>
      %34 = tpu.concatenate %32, %33 in 1 : vector<1x64xf32>, vector<1x64xf32> -> vector<1x128xf32>
      %35 = arith.truncf %34 : vector<1x128xf32> to vector<1x128xbf16>
      %c0_19 = arith.constant 0 : index
      %c0_20 = arith.constant 0 : index
      %36 = vector.load %arg5[%c0_19, %c0_20] : memref<128x1024xbf16, #tpu.memory_space<vmem>>, vector<128x1024xbf16>
      %c0_21 = arith.constant 0 : index
      %c0_22 = arith.constant 0 : index
      %37 = vector.load %arg6[%c0_21, %c0_22] : memref<1x1024xf32, #tpu.memory_space<vmem>>, vector<1x1024xf32>
      %c0_23 = arith.constant 0 : index
      %c0_24 = arith.constant 0 : index
      %38 = vector.load %arg7[%c0_23, %c0_24] : memref<1024x1024xbf16, #tpu.memory_space<vmem>>, vector<1024x1024xbf16>
      %c0_25 = arith.constant 0 : index
      %c0_26 = arith.constant 0 : index
      %39 = vector.load %arg8[%c0_25, %c0_26] : memref<1x1024xf32, #tpu.memory_space<vmem>>, vector<1x1024xf32>
      %c0_27 = arith.constant 0 : index
      %c0_28 = arith.constant 0 : index
      %40 = vector.load %arg9[%c0_27, %c0_28] : memref<1024x128xbf16, #tpu.memory_space<vmem>>, vector<1024x128xbf16>
      %c0_29 = arith.constant 0 : index
      %c0_30 = arith.constant 0 : index
      %41 = vector.load %arg10[%c0_29, %c0_30] : memref<1x128xf32, #tpu.memory_space<vmem>>, vector<1x128xf32>
      %cst_31 = arith.constant dense<0.000000e+00> : vector<1x1024xf32>
      %42 = tpu.matmul %35, %36, %cst_31 {dimension_numbers = #tpu.dot_dimension_numbers<[1], [0], [0], [1], [0, 0, 1, 1], [], []>} : vector<1x128xbf16>, vector<128x1024xbf16>, vector<1x1024xf32> -> vector<1x1024xf32>
      %43 = arith.addf %42, %37 : vector<1x1024xf32>
      %cst_32 = arith.constant 0.000000e+00 : f32
      %44 = vector.broadcast %cst_32 : f32 to vector<1x1024xf32>
      %45 = arith.maximumf %43, %44 : vector<1x1024xf32>
      %46 = arith.truncf %45 : vector<1x1024xf32> to vector<1x1024xbf16>
      %cst_33 = arith.constant dense<0.000000e+00> : vector<1x1024xf32>
      %47 = tpu.matmul %46, %38, %cst_33 {dimension_numbers = #tpu.dot_dimension_numbers<[1], [0], [0], [1], [0, 0, 1, 1], [], []>} : vector<1x1024xbf16>, vector<1024x1024xbf16>, vector<1x1024xf32> -> vector<1x1024xf32>
      %48 = arith.addf %47, %39 : vector<1x1024xf32>
      %cst_34 = arith.constant 0.000000e+00 : f32
      %49 = vector.broadcast %cst_34 : f32 to vector<1x1024xf32>
      %50 = arith.maximumf %48, %49 : vector<1x1024xf32>
      %51 = arith.truncf %50 : vector<1x1024xf32> to vector<1x1024xbf16>
      %cst_35 = arith.constant dense<0.000000e+00> : vector<1x128xf32>
      %52 = tpu.matmul %51, %40, %cst_35 {dimension_numbers = #tpu.dot_dimension_numbers<[1], [0], [0], [1], [0, 0, 1, 1], [], []>} : vector<1x1024xbf16>, vector<1024x128xbf16>, vector<1x128xf32> -> vector<1x128xf32>
      %53 = arith.addf %52, %41 : vector<1x128xf32>
      %54 = vector.shape_cast %53 : vector<1x128xf32> to vector<1x1x128xf32>
      %c0_36 = arith.constant 0 : index
      %c0_37 = arith.constant 0 : index
      %c0_38 = arith.constant 0 : index
      %55 = vector.load %arg11[%c0_36, %c0_37, %c0_38] : memref<1x1x128xf32, #tpu.memory_space<vmem>>, vector<1x1x128xf32>
      tpu.vector_store %arg11[%c0_36, %c0_37, %c0_38], %54 {strides = array<i32>} : memref<1x1x128xf32, #tpu.memory_space<vmem>>, vector<1x1x128xf32>,
    } else {
    }
    return
  }
  func.func @transform_0(%arg0: i32, %arg1: i32) -> (i32, i32, i32) {
    %c0_i32 = arith.constant 0 : i32
    %c0_i32_0 = arith.constant 0 : i32
    return %arg0, %arg1, %c0_i32 : i32, i32, i32
  }
  func.func @transform_1(%arg0: i32, %arg1: i32) -> (i32, i32) {
    %c0_i32 = arith.constant 0 : i32
    %c0_i32_0 = arith.constant 0 : i32
    %c0_i32_1 = arith.constant 0 : i32
    return %c0_i32, %c0_i32_0 : i32, i32
  }
  func.func @transform_2(%arg0: i32, %arg1: i32) -> (i32, i32) {
    %c0_i32 = arith.constant 0 : i32
    %c0_i32_0 = arith.constant 0 : i32
    %c0_i32_1 = arith.constant 0 : i32
    return %c0_i32, %c0_i32_0 : i32, i32
  }
  func.func @transform_3(%arg0: i32, %arg1: i32) -> (i32, i32) {
    %c0_i32 = arith.constant 0 : i32
    %c0_i32_0 = arith.constant 0 : i32
    %c0_i32_1 = arith.constant 0 : i32
    return %c0_i32, %c0_i32_0 : i32, i32
  }
  func.func @transform_4(%arg0: i32, %arg1: i32) -> (i32, i32) {
    %c0_i32 = arith.constant 0 : i32
    %c0_i32_0 = arith.constant 0 : i32
    %c0_i32_1 = arith.constant 0 : i32
    return %c0_i32, %c0_i32_0 : i32, i32
  }
  func.func @transform_5(%arg0: i32, %arg1: i32) -> (i32, i32) {
    %c0_i32 = arith.constant 0 : i32
    %c0_i32_0 = arith.constant 0 : i32
    %c0_i32_1 = arith.constant 0 : i32
    return %c0_i32, %c0_i32_0 : i32, i32
  }
  func.func @transform_6(%arg0: i32, %arg1: i32) -> (i32, i32) {
    %c0_i32 = arith.constant 0 : i32
    %c0_i32_0 = arith.constant 0 : i32
    %c0_i32_1 = arith.constant 0 : i32
    return %c0_i32, %c0_i32_0 : i32, i32
  }
  func.func @transform_7(%arg0: i32, %arg1: i32) -> (i32, i32) {
    %c0_i32 = arith.constant 0 : i32
    %c0_i32_0 = arith.constant 0 : i32
    %c0_i32_1 = arith.constant 0 : i32
    return %c0_i32, %c0_i32_0 : i32, i32
  }
  func.func @transform_8(%arg0: i32, %arg1: i32) -> (i32, i32) {
    %c0_i32 = arith.constant 0 : i32
    %c0_i32_0 = arith.constant 0 : i32
    %c0_i32_1 = arith.constant 0 : i32
    return %c0_i32, %c0_i32_0 : i32, i32
  }
  func.func @transform_9(%arg0: i32, %arg1: i32) -> (i32, i32, i32) {
    %c0_i32 = arith.constant 0 : i32
    %c0_i32_0 = arith.constant 0 : i32
    %c0_i32_1 = arith.constant 0 : i32
    return %arg0, %c0_i32, %c0_i32_0 : i32, i32, i32
  }
}

</mosaic_0001>

<bundles_post_ra>
// kernel: benchmark_iqa_forward.1
= control target key start
LH: loop header
LB: loop body
LE: loop exit
PB: predicated region body
PF: predicated region fallthrough
CT: control target
= control target key end

     0   :  { %s9315_s30 = smov 0   ;;  %s9317_s10 = smov 0   ;;  %s13281_s0 = inlined_call_operand.vmem [shape: bf16[2,100,56], index: 0, kind: input, shape index: {}]   ;;  %s13282_s1 = inlined_call_operand.vmem [shape: bf16[56,64], index: 1, kind: input, shape index: {}]   ;;  %s13283_s2 = inlined_call_operand.vmem [shape: f32[1,64], index: 2, kind: input, shape index: {}]   ;;  %s13284_s3 = inlined_call_operand.vmem [shape: bf16[128,1024], index: 3, kind: input, shape index: {}]   ;;  %s13285_s4 = inlined_call_operand.vmem [shape: f32[1,1024], index: 4, kind: input, shape index: {}]   ;;  %s13286_s5 = inlined_call_operand.vmem [shape: bf16[1024,1024], index: 5, kind: input, shape index: {}]   ;;  %s13287_s6 = inlined_call_operand.vmem [shape: f32[1,1024], index: 6, kind: input, shape index: {}]   ;;  %s13288_s7 = inlined_call_operand.vmem [shape: bf16[1024,128], index: 7, kind: input, shape index: {}]   ;;  %s13289_s8 = inlined_call_operand.vmem [shape: f32[1,128], index: 8, kind: input, shape index: {}]   ;;  %s13290_s9 = inlined_call_operand.vmem [shape: f32[2,1,128], index: 9, kind: output, shape index: {}]  }
   0x1   :  { %s9319_s11 = smov 0  }
   0x2 LB: > { %s31_s12 = sadd.s32 1, %s9256_s10  ;;  %p5941_p0 = scmp.ge.s32.totalorder %s9260_s11, 1  ;;  %s9260_s11 = sphi %s9319_s11, %s19_s11   ;;  %s9256_s10 = sphi %s9317_s10, %s13292_s10   ;;  %s9252_s30 = sphi %s9315_s30, %s13291_s30  }
   0x3   : > { %p33_p1 = scmp.ge.s32.totalorder %s31_s12, 2  ;;  %p310_p2 = scmp.lt.s32.totalorder %s9260_s11, 3 }
   0x5   : > { %s13294_s12 = smov (%p33_p1, %s31_s12), 0  ;;  %p311_p3 = pnand %p5941_p0, %p310_p2 }
   0x6   : > { %p353_p4 = scmp.lt.s32.totalorder (!%p311_p3), %s9252_s30, 1  ;;  %s9264_s27 = smov (!%p311_p3), 64  }
   0x7   : > { %314 = sbr.rel (%p311_p3) target bundleno = 1391 (0x56f), region = 56 }
   0xc   : > { %v397_v0 = vld [vmem:[%s13282_s1 + $0x18] sm:$0xf]  ;;  %vm484_vm0 = vcmask 1043456   ;;  %v8567_v4 = vld [vmem:[%s13282_s1 + $0x10] sm:$0xff]  ;;  %s13296_s30 = smov (!%p353_p4, %s9252_s30), 1  ;;  %v8566_v5 = vld [vmem:[%s13282_s1 + $0x8] sm:$0xff]  ;;  %v628_v37 = vlaneseq }
   0xd   : > { %v451_v1 = vunpack.c.l.b16 %v397_v0  ;;  %s9208_s19 = smul.u32 52, %s13296_s30  ;;  %v8565_v6 = vld [vmem:[%s13282_s1] sm:$0xff]  ;;  %vm459_vm1 = vcmask 457728   ;;  %vm695_vm2 = vcmask 523264   ;;  %vm372_vm3 = vcmask 516096   ;;  %s366_s20 = scalar_lea.vmem %s13290_s9, %s13296_s30 }
   0xe   : > { %v9262_v32 = vmov -inf   ;;  %v9263_v33 = vmov inf   ;;  %v629_v38 = vshrl.u32 %v628_v37, 7  ;;  %v6221_v55 = vld [vmem:[%s13284_s3 + $0x1c0] sm:$0xf] }
   0xf   : > { %v455_v2 = vpack.c.b16 %v451_v1, %v451_v1  ;;  %s9351_s24 = scalar_lea.vmem %s13281_s0, %s9208_s19  ;;  %373 = vst.msk [vmem:[#allocation2] sm:$0x1] %vm372_vm3, %v9262_v32  ;;  %v8628_v56 = vld [vmem:[%s13284_s3 + $0x1dc] sm:$0xf0]  ;;  %v8624_v57 = vld [vmem:[%s13284_s3 + $0x1c4] sm:$0xf] }
  0x10   : > { %v8557_v7 = vld [vmem:[%s9351_s24] sm:$0xff]  ;;  %v8558_v8 = vld [vmem:[%s9351_s24 + $0x8] sm:$0xff]  ;;  %v8559_v9 = vld [vmem:[%s9351_s24 + $0x10] sm:$0xff]  ;;  %374 = vst.msk [vmem:[#allocation3] sm:$0x1] %vm372_vm3, %v9263_v33  ;;  %v641_v54 = vadd.s32 96, %v629_v38  ;;  %v6222_v61 = vor.u32 %v8628_v56, %v6221_v55 }
  0x11   : > { %v486_v3 = vsel %vm484_vm0, %v455_v2, 0  ;;  %v8560_v10 = vld [vmem:[%s9351_s24 + $0x18] sm:$0xff]  ;;  %v8561_v11 = vld [vmem:[%s9351_s24 + $0x20] sm:$0xff]  ;;  %v8562_v12 = vld [vmem:[%s9351_s24 + $0x28] sm:$0xff] }
  0x12   : > { %492 = vmatpush.bf16.msra.mxu0 %v486_v3  ;;  %v8563_v13 = vld [vmem:[%s9351_s24 + $0x30] sm:$0xff]  ;;  %v6223_v62 = vld [vmem:[%s13284_s3 + $0x1e0] sm:$0xf0]  ;;  %v6189_v63 = vld [vmem:[%s13284_s3 + $0x180] sm:$0xf]  ;;  %vm675_vm4 = vcmp.lt.s32.totalorder %v641_v54, 100  ;;  %1842 = vmatpush.bf16.msra.mxu1 %v6222_v61 }
  0x13   : > { %v8620_v0 = vld [vmem:[%s13284_s3 + $0x19c] sm:$0xf0]  ;;  %v8592_v54 = vld [vmem:[%s13284_s3 + $0xc4] sm:$0xf] }
  0x14   : > { %v6095_v55 = vld [vmem:[%s13284_s3 + $0xe0] sm:$0xf0] }
  0x16   : > { %493 = vmatpush.bf16.msra.mxu0 %v8567_v4  ;;  %v6226_v4 = vor.u32 %v8624_v57, %v6223_v62 }
  0x18   : > { %1855 = vmatpush.bf16.msra.mxu2 %v6226_v4  ;;  %v8584_v4 = vld [vmem:[%s13284_s3 + $0x84] sm:$0xf] }
  0x1a   : > { %494 = vmatpush.bf16.msra.mxu0 %v8566_v5  ;;  %v8616_v5 = vld [vmem:[%s13284_s3 + $0x184] sm:$0xf] }
  0x1e   : > { %495 = vmatpush.bf16.msra.mxu0 %v8565_v6  ;;  %v6191_v6 = vld [vmem:[%s13284_s3 + $0x1a0] sm:$0xf0] }
  0x21   : > { %5987 = vmatmul.msk.bf16.vlgmr.msra.gmra.mxu0 %vm459_vm1, %v8557_v7 }
  0x31   : > { %5988 = vmatmul.msk.bf16.gmra.mxu0 %vm459_vm1, %v8558_v8 }
  0x41   : > { %5989 = vmatmul.msk.bf16.gmra.mxu0 %vm459_vm1, %v8559_v9  ;;  %v6190_v9 = vor.u32 %v8620_v0, %v6189_v63  ;;  %v6098_v63 = vor.u32 %v8592_v54, %v6095_v55  ;;  %v6061_v0 = vld [vmem:[%s13284_s3 + $0x80] sm:$0xf]  ;;  %v8622_v54 = vld [vmem:[%s13284_s3 + $0x1ac] sm:$0xf0] }
  0x43   : > { %1843 = vmatpush.bf16.msra.mxu1 %v6190_v9 }
  0x51   : > { %5990 = vmatmul.msk.bf16.gmra.mxu0 %vm459_vm1, %v8560_v10 }
  0x61   : > { %5991 = vmatmul.msk.bf16.gmra.mxu0 %vm459_vm1, %v8561_v11 }
  0x71   : > { %5992 = vmatmul.msk.bf16.gmra.mxu0 %vm459_vm1, %v8562_v12  ;;  %v6194_v12 = vor.u32 %v8616_v5, %v6191_v6  ;;  %v6063_v5 = vld [vmem:[%s13284_s3 + $0xa0] sm:$0xf0] }
  0x73   : > { %1856 = vmatpush.bf16.msra.mxu2 %v6194_v12  ;;  %v6066_v12 = vor.u32 %v8584_v4, %v6063_v5  ;;  %v8618_v4 = vld [vmem:[%s13284_s3 + $0x194] sm:$0xf] }
  0x74   : > { %v6207_v5 = vld [vmem:[%s13284_s3 + $0x1b0] sm:$0xf0] }
  0x81   : > { %5993 = vmatmul.msk.bf16.gmra.mxu0 %vm459_vm1, %v8563_v13  ;;  %v6157_v13 = vld [vmem:[%s13284_s3 + $0x140] sm:$0xf] }
  0x9e   : > { %v497_v14 = vpop.f32.mrf.mxu0 }
  0x9f   : > { %v696_v19 = vsel %vm695_vm2, %v497_v14, -inf  ;;  %v750_v39 = vsel %vm695_vm2, %v497_v14, inf  ;;  %v8612_v14 = vld [vmem:[%s13284_s3 + $0x15c] sm:$0xf0] }
  0xa0   : > { %v6158_v33 = vor.u32 %v8612_v14, %v6157_v13  ;;  %v6029_v13 = vld [vmem:[%s13284_s3 + $0x40] sm:$0xf] }
  0xa2   : > { %1844 = vmatpush.bf16.msra.mxu1 %v6158_v33  ;;  %v8572_v33 = vld [vmem:[%s13284_s3 + $0x1c] sm:$0xf0] }
  0xa6   : > { %v499_v15 = vpop.f32.mrf.mxu0 }
  0xa7   : > { %v697_v40 = vsel %vm695_vm2, %v499_v15, -inf  ;;  %v751_v41 = vsel %vm695_vm2, %v499_v15, inf  ;;  %v8608_v15 = vld [vmem:[%s13284_s3 + $0x144] sm:$0xf] }
  0xae   : > { %v502_v16 = vpop.f32.mrf.mxu0 }
  0xaf   : > { %v698_v24 = vsel %vm695_vm2, %v502_v16, -inf  ;;  %v752_v42 = vsel %vm695_vm2, %v502_v16, inf }
  0xb6   : > { %v504_v17 = vpop.f32.mrf.mxu0 }
  0xb7   : > { %v699_v43 = vsel %vm695_vm2, %v504_v17, -inf  ;;  %v753_v44 = vsel %vm695_vm2, %v504_v17, inf }
  0xbe   : > { %v507_v18 = vpop.f32.mrf.mxu0 }
  0xbf   : > { %v700_v20 = vsel %vm695_vm2, %v507_v18, -inf  ;;  %v754_v45 = vsel %vm695_vm2, %v507_v18, inf }
  0xc0   : > { %v701_v21 = vmax.f32 %v696_v19, %v700_v20  ;;  %v755_v58 = vmin.f32 %v750_v39, %v754_v45 }
  0xc6   : > { %v509_v22 = vpop.f32.mrf.mxu0 }
  0xc7   : > { %v702_v47 = vsel %vm695_vm2, %v509_v22, -inf  ;;  %v756_v48 = vsel %vm695_vm2, %v509_v22, inf  ;;  %v6229_v22 = vld [vmem:[%s13284_s3 + $0x1c8] sm:$0xf] }
  0xc8   : > { %v703_v59 = vmax.f32 %v697_v40, %v702_v47  ;;  %v757_v60 = vmin.f32 %v751_v41, %v756_v48  ;;  %v6127_v40 = vld [vmem:[%s13284_s3 + $0x120] sm:$0xf0]  ;;  %v6197_v41 = vld [vmem:[%s13284_s3 + $0x188] sm:$0xf] }
  0xc9   : > { %v6165_v47 = vld [vmem:[%s13284_s3 + $0x148] sm:$0xf] }
  0xca   : > { %v8613_v48 = vld [vmem:[%s13284_s3 + $0x164] sm:$0xf0] }
  0xcb   : > { %v6166_v56 = vor.u32 %v8613_v48, %v6165_v47 }
  0xce   : > { %v512_v23 = vpop.f32.mrf.mxu0 }
  0xcf   : > { %v704_v25 = vsel %vm695_vm2, %v512_v23, -inf  ;;  %v758_v49 = vsel %vm695_vm2, %v512_v23, inf  ;;  %v8629_v23 = vld [vmem:[%s13284_s3 + $0x1e4] sm:$0xf0] }
  0xd0   : > { %v705_v26 = vmax.f32 %v698_v24, %v704_v25  ;;  %v759_v10 = vmin.f32 %v752_v42, %v758_v49  ;;  %v8621_v42 = vld [vmem:[%s13284_s3 + $0x1a4] sm:$0xf0] }
  0xd6   : > { %v514_v27 = vpop.f32.mrf.mxu0 }
  0xd7   : > { %v706_v50 = vsel %vm695_vm2, %v514_v27, -inf  ;;  %v760_v51 = vsel %vm695_vm2, %v514_v27, inf  ;;  %v6125_v27 = vld [vmem:[%s13284_s3 + $0x100] sm:$0xf] }
  0xd8   : > { %v707_v1 = vmax.f32 %v699_v43, %v706_v50  ;;  %v761_v11 = vmin.f32 %v753_v44, %v760_v51  ;;  %v6198_v43 = vor.u32 %v8621_v42, %v6197_v41  ;;  %v6093_v51 = vld [vmem:[%s13284_s3 + $0xc0] sm:$0xf]  ;;  %v6231_v41 = vld [vmem:[%s13284_s3 + $0x1e8] sm:$0xf0]  ;;  %v6237_v42 = vld [vmem:[%s13284_s3 + $0x1d0] sm:$0xf] }
  0xde   : > { %v517_v28 = vpop.f32.mrf.mxu0 }
  0xdf   : > { %v708_v29 = vsel %vm695_vm2, %v517_v28, -inf  ;;  %v762_v52 = vsel %vm695_vm2, %v517_v28, inf  ;;  %v6230_v28 = vor.u32 %v8629_v23, %v6229_v22 }
  0xe0   : > { %v9372_v30 = vmax.f32 %v701_v21, %v708_v29  ;;  %v763_v16 = vmin.f32 %v755_v58, %v762_v52  ;;  %v6159_v21 = vld [vmem:[%s13284_s3 + $0x160] sm:$0xf0]  ;;  %v6133_v58 = vld [vmem:[%s13284_s3 + $0x108] sm:$0xf] }
  0xe1   : > { %v6162_v39 = vor.u32 %v8608_v15, %v6159_v21  ;;  %1868 = vmatpush.bf16.msra.mxu3 %v6230_v28  ;;  %v8589_v21 = vld [vmem:[%s13284_s3 + $0xa4] sm:$0xf0] }
  0xe3   : > { %1857 = vmatpush.bf16.msra.mxu2 %v6162_v39 }
  0xe5   : > { %1869 = vmatpush.bf16.msra.mxu3 %v6198_v43  ;;  %v8630_v43 = vld [vmem:[%s13284_s3 + $0x1ec] sm:$0xf0] }
  0xe6   : > { %v519_v31 = vpop.f32.mrf.mxu0 }
  0xe7   : > { %v710_v53 = vsel %vm695_vm2, %v519_v31, -inf  ;;  %v764_v2 = vsel %vm695_vm2, %v519_v31, inf }
  0xe8   : > { %v711_v17 = vmax.f32 %v703_v59, %v710_v53  ;;  %v765_v18 = vmin.f32 %v757_v60, %v764_v2  ;;  %v8596_v53 = vld [vmem:[%s13284_s3 + $0xdc] sm:$0xf0]  ;;  %v8605_v59 = vld [vmem:[%s13284_s3 + $0x124] sm:$0xf0] }
  0xe9   : > { %v6094_v62 = vor.u32 %v8596_v53, %v6093_v51  ;;  %1870 = vmatpush.bf16.msra.mxu3 %v6166_v56  ;;  %v6134_v6 = vor.u32 %v8605_v59, %v6133_v58  ;;  %v8617_v51 = vld [vmem:[%s13284_s3 + $0x18c] sm:$0xf]  ;;  %v6205_v53 = vld [vmem:[%s13284_s3 + $0x190] sm:$0xf]  ;;  %v6005_v56 = vld [vmem:[%s13284_s3 + $0x8] sm:$0xf] }
  0xea   : > { %v8626_v58 = vld [vmem:[%s13284_s3 + $0x1d4] sm:$0xf] }
  0xeb   : > { %v6239_v59 = vld [vmem:[%s13284_s3 + $0x1f0] sm:$0xf0] }
  0xed   : > { %1871 = vmatpush.bf16.msra.mxu3 %v6134_v6 }
  0xee   : > { %v522_v34 = vpop.f32.mrf.mxu0 }
  0xef   : > { %v712_v35 = vsel %vm695_vm2, %v522_v34, -inf  ;;  %v766_v7 = vsel %vm695_vm2, %v522_v34, inf  ;;  %v8604_v34 = vld [vmem:[%s13284_s3 + $0x11c] sm:$0xf0] }
  0xf0   : > { %v9375_v36 = vmax.f32 %v705_v26, %v712_v35  ;;  %v767_v29 = vmin.f32 %v759_v10, %v766_v7  ;;  %v8600_v35 = vld [vmem:[%s13284_s3 + $0x104] sm:$0xf]  ;;  %v6126_v49 = vor.u32 %v8604_v34, %v6125_v27  ;;  %v6101_v7 = vld [vmem:[%s13284_s3 + $0xc8] sm:$0xf] }
  0xf1   : > { %v6130_v50 = vor.u32 %v8600_v35, %v6127_v40  ;;  %v8568_v35 = vld [vmem:[%s13284_s3 + $0x4] sm:$0xf] }
  0xf2   : > { %1845 = vmatpush.bf16.msra.mxu1 %v6126_v49 }
  0xf3   : > { %1858 = vmatpush.bf16.msra.mxu2 %v6130_v50  ;;  %v6238_v50 = vor.u32 %v8630_v43, %v6237_v42  ;;  %v6007_v42 = vld [vmem:[%s13284_s3 + $0x28] sm:$0xf0]  ;;  %v6013_v43 = vld [vmem:[%s13284_s3 + $0x10] sm:$0xf] }
  0xf6   : > { %v524_v46 = vpop.f32.mrf.mxu0  ;;  %1846 = vmatpush.bf16.msra.mxu1 %v6094_v62  ;;  %v8609_v62 = vld [vmem:[%s13284_s3 + $0x14c] sm:$0xf] }
  0xf7   : > { %v714_v3 = vsel %vm695_vm2, %v524_v46, -inf  ;;  %v768_v8 = vsel %vm695_vm2, %v524_v46, inf  ;;  %1859 = vmatpush.bf16.msra.mxu2 %v6098_v63  ;;  %v6167_v63 = vld [vmem:[%s13284_s3 + $0x168] sm:$0xf0] }
  0xf8   : > { %v715_v19 = vmax.f32 %v707_v1, %v714_v3  ;;  %v769_v24 = vmin.f32 %v761_v11, %v768_v8  ;;  %v8588_v3 = vld [vmem:[%s13284_s3 + $0x9c] sm:$0xf0]  ;;  %v8597_v8 = vld [vmem:[%s13284_s3 + $0xe4] sm:$0xf0]  ;;  %v6170_v6 = vor.u32 %v8609_v62, %v6167_v63 }
  0xf9   : > { %v6062_v11 = vor.u32 %v8588_v3, %v6061_v0  ;;  %v6173_v0 = vld [vmem:[%s13284_s3 + $0x150] sm:$0xf]  ;;  %v6242_v3 = vor.u32 %v8626_v58, %v6239_v59  ;;  %v6245_v58 = vld [vmem:[%s13284_s3 + $0x1d8] sm:$0xf] }
  0xfa   : > { %v725_v44 = vmax.f32 %v9375_v36, %v715_v19  ;;  %v6102_v19 = vor.u32 %v8597_v8, %v6101_v7  ;;  %v8601_v8 = vld [vmem:[%s13284_s3 + $0x10c] sm:$0xf]  ;;  %v8631_v59 = vld [vmem:[%s13284_s3 + $0x1f4] sm:$0xf0] }
  0xfb   : > { %1847 = vmatpush.bf16.msra.mxu1 %v6062_v11  ;;  %1860 = vmatpush.bf16.msra.mxu2 %v6066_v12  ;;  %v8606_v11 = vld [vmem:[%s13284_s3 + $0x12c] sm:$0xf0]  ;;  %v6210_v12 = vor.u32 %v8618_v4, %v6207_v5  ;;  %v8623_v4 = vld [vmem:[%s13284_s3 + $0x1b4] sm:$0xf0]  ;;  %v8619_v5 = vld [vmem:[%s13284_s3 + $0x19c] sm:$0xf] }
  0xfc   : > { %1872 = vmatpush.bf16.msra.mxu3 %v6102_v19  ;;  %v6109_v19 = vld [vmem:[%s13284_s3 + $0xd0] sm:$0xf] }
  0xfe   : > { %v527_v20 = vpop.f32.mrf.mxu0 }
  0xff   : > { %v691_v25 = vsel %vm675_vm4, %v527_v20, -inf  ;;  %v746_v26 = vsel %vm675_vm4, %v527_v20, inf  ;;  %v6069_v20 = vld [vmem:[%s13284_s3 + $0x88] sm:$0xf] }
 0x100   : > { %v716_v31 = vsel %vm695_vm2, %v691_v25, -inf  ;;  %v770_v32 = vsel %vm695_vm2, %v746_v26, inf  ;;  %v627_v25 = vld [vmem:[#allocation3] sm:$0x1]  ;;  %v6070_v34 = vor.u32 %v8589_v21, %v6069_v20  ;;  %v8598_v20 = vld [vmem:[%s13284_s3 + $0xec] sm:$0xf0] }
 0x101   : > { %v717_v37 = vmax.f32 %v9372_v30, %v716_v31  ;;  %v771_v38 = vmin.f32 %v763_v16, %v770_v32  ;;  %v779_v30 = vmin.f32 %v767_v29, %v769_v24  ;;  %v8580_v16 = vld [vmem:[%s13284_s3 + $0x5c] sm:$0xf0] }
 0x102   : > { %v626_v24 = vld [vmem:[#allocation2] sm:$0x1]  ;;  %v6030_v26 = vor.u32 %v8580_v16, %v6029_v13  ;;  %1873 = vmatpush.bf16.msra.mxu3 %v6070_v34  ;;  %v8610_v13 = vld [vmem:[%s13284_s3 + $0x154] sm:$0xf] }
 0x103   : > { %v724_v45 = vmax.f32 %v717_v37, %v711_v17  ;;  %v778_v46 = vmin.f32 %v771_v38, %v765_v18  ;;  %v8576_v17 = vld [vmem:[%s13284_s3 + $0x44] sm:$0xf]  ;;  %v788_v31 = vld [vmem:[%s13283_s2] sm:$0x1]  ;;  %v8625_v38 = vld [vmem:[%s13284_s3 + $0x1cc] sm:$0xf] }
 0x104   : > { %v6031_v18 = vld [vmem:[%s13284_s3 + $0x60] sm:$0xf0]  ;;  %v5997_v32 = vld [vmem:[%s13284_s3] sm:$0xf]  ;;  %1848 = vmatpush.bf16.msra.mxu1 %v6030_v26  ;;  %v6234_v49 = vor.u32 %v8625_v38, %v6231_v41  ;;  %v6077_v26 = vld [vmem:[%s13284_s3 + $0x90] sm:$0xf] }
 0x105   : > { %v726_v52 = vmax.f32 %v724_v45, %v725_v44  ;;  %v780_v36 = vmin.f32 %v778_v46, %v779_v30  ;;  %v6034_v27 = vor.u32 %v8576_v17, %v6031_v18  ;;  %v5999_v37 = vld [vmem:[%s13284_s3 + $0x20] sm:$0xf0]  ;;  %v5998_v44 = vor.u32 %v8572_v33, %v5997_v32  ;;  %v6037_v30 = vld [vmem:[%s13284_s3 + $0x48] sm:$0xf]  ;;  %v8593_v17 = vld [vmem:[%s13284_s3 + $0xcc] sm:$0xf] }
 0x106   : > { %v529_v57 = vpop.f32.mrf.mxu0  ;;  %v8581_v45 = vld [vmem:[%s13284_s3 + $0x64] sm:$0xf0]  ;;  %v6002_v48 = vor.u32 %v8568_v35, %v5999_v37  ;;  %v6103_v18 = vld [vmem:[%s13284_s3 + $0xe8] sm:$0xf0]  ;;  %v6045_v33 = vld [vmem:[%s13284_s3 + $0x50] sm:$0xf] }
 0x107   : > { %v727_v60 = vrot.slane %v726_v52, 4  ;;  %v781_v61 = vrot.slane %v780_v36, 4  ;;  %1861 = vmatpush.bf16.msra.mxu2 %v6034_v27  ;;  %v6038_v55 = vor.u32 %v8581_v45, %v6037_v30  ;;  %v8573_v57 = vld [vmem:[%s13284_s3 + $0x24] sm:$0xf0]  ;;  %v8590_v27 = vld [vmem:[%s13284_s3 + $0xac] sm:$0xf0] }
 0x108   : > { %1849 = vmatpush.bf16.msra.mxu1 %v5998_v44  ;;  %v6039_v32 = vld [vmem:[%s13284_s3 + $0x68] sm:$0xf0]  ;;  %v8582_v35 = vld [vmem:[%s13284_s3 + $0x6c] sm:$0xf0]  ;;  %v8602_v37 = vld [vmem:[%s13284_s3 + $0x114] sm:$0xf] }
 0x109   : > { %v728_v1 = vmax.f32 %v726_v52, %v727_v60  ;;  %v782_v2 = vmin.f32 %v780_v36, %v781_v61  ;;  %v6199_v52 = vld [vmem:[%s13284_s3 + $0x1a8] sm:$0xf0]  ;;  %v6206_v61 = vor.u32 %v8622_v54, %v6205_v53  ;;  %1874 = vmatpush.bf16.msra.mxu3 %v6038_v55  ;;  %v6143_v38 = vld [vmem:[%s13284_s3 + $0x130] sm:$0xf0]  ;;  %v8574_v30 = vld [vmem:[%s13284_s3 + $0x2c] sm:$0xf0] }
 0x10a   : > { %v6202_v60 = vor.u32 %v8617_v51, %v6199_v52  ;;  %v8569_v41 = vld [vmem:[%s13284_s3 + $0xc] sm:$0xf]  ;;  %v8594_v45 = vld [vmem:[%s13284_s3 + $0xd4] sm:$0xf] }
 0x10b   : > { %v729_v9 = vrot.slane %v728_v1, 2  ;;  %v783_v10 = vrot.slane %v782_v2, 2  ;;  %1862 = vmatpush.bf16.msra.mxu2 %v6002_v48  ;;  %v6010_v44 = vor.u32 %v8569_v41, %v6007_v42  ;;  %v6014_v48 = vor.u32 %v8574_v30, %v6013_v43  ;;  %v6079_v51 = vld [vmem:[%s13284_s3 + $0xb0] sm:$0xf0]  ;;  %v8587_v41 = vld [vmem:[%s13284_s3 + $0x9c] sm:$0xf] }
 0x10c   : > { %1881 = vmatpush.bf16.msrb.mxu1 %v6234_v49  ;;  %v6047_v53 = vld [vmem:[%s13284_s3 + $0x70] sm:$0xf0]  ;;  %v6087_v42 = vld [vmem:[%s13284_s3 + $0xb8] sm:$0xf0]  ;;  %v8660_v30 = vld [vmem:[%s13286_s5 + $0xdc] sm:$0xf0] }
 0x10d   : > { %v730_v14 = vmax.f32 %v728_v1, %v729_v9  ;;  %v784_v15 = vmin.f32 %v782_v2, %v783_v10  ;;  %v8614_v1 = vld [vmem:[%s13284_s3 + $0x16c] sm:$0xf0]  ;;  %v6006_v2 = vor.u32 %v8573_v57, %v6005_v56  ;;  %v6135_v9 = vld [vmem:[%s13284_s3 + $0x128] sm:$0xf0]  ;;  %v8570_v55 = vld [vmem:[%s13284_s3 + $0x14] sm:$0xf] }
 0x10e   : > { %v6174_v7 = vor.u32 %v8614_v1, %v6173_v0  ;;  %v6141_v10 = vld [vmem:[%s13284_s3 + $0x110] sm:$0xf]  ;;  %v6015_v56 = vld [vmem:[%s13284_s3 + $0x30] sm:$0xf0]  ;;  %v6246_v0 = vor.u32 %v8631_v59, %v6245_v58  ;;  %v8940_v58 = vld [vmem:[%s13286_s5 + $0x99c] sm:$0xf0] }
 0x10f   : > { %v731_v22 = vrot.slane %v730_v14, 1  ;;  %v785_v23 = vrot.slane %v784_v15, 1  ;;  %1894 = vmatpush.bf16.msrb.mxu2 %v6238_v50  ;;  %1875 = vmatpush.bf16.msra.mxu3 %v6006_v2  ;;  %v6142_v16 = vor.u32 %v8606_v11, %v6141_v10  ;;  %v8586_v50 = vld [vmem:[%s13284_s3 + $0x94] sm:$0xf]  ;;  %v6018_v57 = vor.u32 %v8570_v55, %v6015_v56  ;;  %v6181_v11 = vld [vmem:[%s13284_s3 + $0x158] sm:$0xf] }
 0x110   : > { %1882 = vmatpush.bf16.msrb.mxu1 %v6202_v60  ;;  %v6082_v52 = vor.u32 %v8586_v50, %v6079_v51  ;;  %v8627_v60 = vld [vmem:[%s13284_s3 + $0x1dc] sm:$0xf]  ;;  %v6053_v50 = vld [vmem:[%s13284_s3 + $0x58] sm:$0xf]  ;;  %v6317_v55 = vld [vmem:[%s13286_s5 + $0x80] sm:$0xf] }
 0x111   : > { %v732_v28 = vmax.f32 %v730_v14, %v731_v22  ;;  %v786_v29 = vmin.f32 %v784_v15, %v785_v23  ;;  %v6175_v14 = vld [vmem:[%s13284_s3 + $0x170] sm:$0xf0]  ;;  %v6138_v15 = vor.u32 %v8601_v8, %v6135_v9  ;;  %v6106_v22 = vor.u32 %v8593_v17, %v6103_v18  ;;  %v8692_v8 = vld [vmem:[%s13286_s5 + $0x1dc] sm:$0xf0]  ;;  %v8583_v51 = vld [vmem:[%s13284_s3 + $0x74] sm:$0xf0] }
 0x112   : > { %v6178_v21 = vor.u32 %v8610_v13, %v6175_v14  ;;  %v6110_v23 = vor.u32 %v8598_v20, %v6109_v19  ;;  %v6445_v9 = vld [vmem:[%s13286_s5 + $0x180] sm:$0xf] }
 0x113   : > { %v733_v39 = vmax.f32 %v626_v24, %v732_v28  ;;  %v787_v40 = vmin.f32 %v627_v25, %v786_v29  ;;  %1895 = vmatpush.bf16.msrb.mxu2 %v6206_v61  ;;  %1907 = vmatpush.bf16.msrb.mxu3 %v6242_v3  ;;  %v8585_v24 = vld [vmem:[%s13284_s3 + $0x8c] sm:$0xf]  ;;  %v6078_v29 = vor.u32 %v8590_v27, %v6077_v26  ;;  %v6247_v61 = vld [vmem:[%s13284_s3 + $0x1f8] sm:$0xf0]  ;;  %v6213_v3 = vld [vmem:[%s13284_s3 + $0x198] sm:$0xf] }
 0x114   : > { %1883 = vmatpush.bf16.msrb.mxu1 %v6170_v6  ;;  %v6071_v25 = vld [vmem:[%s13284_s3 + $0xa8] sm:$0xf0]  ;;  %v6250_v2 = vor.u32 %v8627_v60, %v6247_v61  ;;  %v6214_v6 = vor.u32 %v8623_v4, %v6213_v3  ;;  %v8684_v14 = vld [vmem:[%s13286_s5 + $0x19c] sm:$0xf0]  ;;  %v6054_v60 = vor.u32 %v8583_v51, %v6053_v50  ;;  %v6021_v61 = vld [vmem:[%s13284_s3 + $0x18] sm:$0xf] }
 0x115   : > { %v9554_v46 = vadd.f32 %v788_v31, %v733_v39  ;;  %v790_v47 = vadd.f32 %v788_v31, %v787_v40  ;;  %v6074_v28 = vor.u32 %v8585_v24, %v6071_v25  ;;  %v8577_v31 = vld [vmem:[%s13284_s3 + $0x4c] sm:$0xf]  ;;  %v6046_v39 = vor.u32 %v8582_v35, %v6045_v33  ;;  %v6413_v19 = vld [vmem:[%s13286_s5 + $0x140] sm:$0xf]  ;;  %v8603_v24 = vld [vmem:[%s13284_s3 + $0x11c] sm:$0xf] }
 0x116   : > { %v6042_v34 = vor.u32 %v8577_v31, %v6039_v32  ;;  %v6146_v40 = vor.u32 %v8602_v37, %v6143_v38  ;;  %v6446_v17 = vor.u32 %v8684_v14, %v6445_v9  ;;  %v8676_v20 = vld [vmem:[%s13286_s5 + $0x15c] sm:$0xf0]  ;;  %v6151_v25 = vld [vmem:[%s13284_s3 + $0x138] sm:$0xf0]  ;;  %v8599_v31 = vld [vmem:[%s13284_s3 + $0xf4] sm:$0xf0] }
 0x117   : > { %v792_v36 = vperm.slane %v790_v47, 0  ;;  %1896 = vmatpush.bf16.msrb.mxu2 %v6174_v7  ;;  %1908 = vmatpush.bf16.msrb.mxu3 %v6210_v12  ;;  %v6111_v47 = vld [vmem:[%s13284_s3 + $0xf0] sm:$0xf0]  ;;  %v6477_v7 = vld [vmem:[%s13286_s5 + $0x1c0] sm:$0xf]  ;;  %v6414_v26 = vor.u32 %v8676_v20, %v6413_v19 }
 0x118   : > { %1884 = vmatpush.bf16.msrb.mxu1 %v6138_v15  ;;  %v6114_v49 = vor.u32 %v8594_v45, %v6111_v47  ;;  %v8615_v12 = vld [vmem:[%s13284_s3 + $0x174] sm:$0xf0]  ;;  %v6478_v13 = vor.u32 %v8692_v8, %v6477_v7  ;;  %v8611_v15 = vld [vmem:[%s13284_s3 + $0x15c] sm:$0xf]  ;;  %v8668_v35 = vld [vmem:[%s13286_s5 + $0x11c] sm:$0xf0] }
 0x119   : > { %793 = vrot.lane.b32.xlu0 %v792_v36, %s9264_s27  ;;  %v8578_v36 = vld [vmem:[%s13284_s3 + $0x54] sm:$0xf]  ;;  %v6182_v18 = vor.u32 %v8615_v12, %v6181_v11  ;;  %v8595_v32 = vld [vmem:[%s13284_s3 + $0xdc] sm:$0xf]  ;;  %v6085_v38 = vld [vmem:[%s13284_s3 + $0x98] sm:$0xf] }
 0x11a   : > { %v6050_v54 = vor.u32 %v8578_v36, %v6047_v53  ;;  %v6119_v33 = vld [vmem:[%s13284_s3 + $0xf8] sm:$0xf0]  ;;  %v7501_v45 = vld [vmem:[%s13286_s5 + $0x9c0] sm:$0xf] }
 0x11b   : > { %1897 = vmatpush.bf16.msrb.mxu2 %v6142_v16  ;;  %1909 = vmatpush.bf16.msrb.mxu3 %v6178_v21  ;;  %v6183_v16 = vld [vmem:[%s13284_s3 + $0x178] sm:$0xf0]  ;;  %v8948_v47 = vld [vmem:[%s13286_s5 + $0x9dc] sm:$0xf0] }
 0x11c   : > { %1885 = vmatpush.bf16.msrb.mxu1 %v6106_v22  ;;  %v6186_v21 = vor.u32 %v8611_v15, %v6183_v16  ;;  %v6149_v22 = vld [vmem:[%s13284_s3 + $0x118] sm:$0xf]  ;;  %v8579_v36 = vld [vmem:[%s13284_s3 + $0x5c] sm:$0xf]  ;;  %v8652_v56 = vld [vmem:[%s13286_s5 + $0x9c] sm:$0xf0] }
 0x11d   : > { %v6055_v53 = vld [vmem:[%s13284_s3 + $0x78] sm:$0xf0]  ;;  %v6733_v3 = vld [vmem:[%s13286_s5 + $0x3c0] sm:$0xf] }
 0x11e   : > { %v8756_v4 = vld [vmem:[%s13286_s5 + $0x3dc] sm:$0xf0] }
 0x11f   : > { %1898 = vmatpush.bf16.msrb.mxu2 %v6110_v23  ;;  %1910 = vmatpush.bf16.msrb.mxu3 %v6146_v40  ;;  %v8607_v23 = vld [vmem:[%s13284_s3 + $0x134] sm:$0xf0]  ;;  %v6122_v40 = vor.u32 %v8595_v32, %v6119_v33  ;;  %v8932_v7 = vld [vmem:[%s13286_s5 + $0x95c] sm:$0xf0]  ;;  %v6734_v14 = vor.u32 %v8756_v4, %v6733_v3 }
 0x120   : > { %1886 = vmatpush.bf16.msrb.mxu1 %v6074_v28  ;;  %v6150_v27 = vor.u32 %v8607_v23, %v6149_v22  ;;  %v6154_v28 = vor.u32 %v8603_v24, %v6151_v25  ;;  %v8820_v8 = vld [vmem:[%s13286_s5 + $0x5dc] sm:$0xf0] }
 0x121   : > { %v6285_v9 = vld [vmem:[%s13286_s5 + $0x40] sm:$0xf] }
 0x122   : > { %v6701_v15 = vld [vmem:[%s13286_s5 + $0x380] sm:$0xf] }
 0x123   : > { %1899 = vmatpush.bf16.msrb.mxu2 %v6078_v29  ;;  %1911 = vmatpush.bf16.msrb.mxu3 %v6114_v49  ;;  %v6117_v29 = vld [vmem:[%s13284_s3 + $0xd8] sm:$0xf]  ;;  %v8748_v16 = vld [vmem:[%s13286_s5 + $0x39c] sm:$0xf0] }
 0x124   : > { %1887 = vmatpush.bf16.msrb.mxu1 %v6042_v34  ;;  %v6381_v34 = vld [vmem:[%s13286_s5 + $0x100] sm:$0xf]  ;;  %v6118_v37 = vor.u32 %v8599_v31, %v6117_v29  ;;  %v6702_v29 = vor.u32 %v8748_v16, %v6701_v15 }
 0x125   : > { %v6382_v43 = vor.u32 %v8668_v35, %v6381_v34  ;;  %v7405_v20 = vld [vmem:[%s13286_s5 + $0x900] sm:$0xf] }
 0x126   : > { %v8812_v22 = vld [vmem:[%s13286_s5 + $0x59c] sm:$0xf0] }
 0x127   : > { %1900 = vmatpush.bf16.msrb.mxu2 %v6046_v39  ;;  %1912 = vmatpush.bf16.msrb.mxu3 %v6082_v52  ;;  %v8591_v39 = vld [vmem:[%s13284_s3 + $0xb4] sm:$0xf0]  ;;  %v6090_v52 = vor.u32 %v8587_v41, %v6087_v42  ;;  %v6253_v23 = vld [vmem:[%s13286_s5] sm:$0xf] }
 0x128   : > { %1888 = vmatpush.bf16.msrb.mxu1 %v6010_v44  ;;  %v6349_v44 = vld [vmem:[%s13286_s5 + $0xc0] sm:$0xf]  ;;  %v6086_v49 = vor.u32 %v8591_v39, %v6085_v38 }
 0x129   : > { %v8636_v24 = vld [vmem:[%s13286_s5 + $0x1c] sm:$0xf0] }
 0x12a   : > { %v8916_v31 = vld [vmem:[%s13286_s5 + $0x8dc] sm:$0xf0]  ;;  %v6254_v35 = vor.u32 %v8636_v24, %v6253_v23 }
 0x12b   : > { %1901 = vmatpush.bf16.msrb.mxu2 %v6014_v48  ;;  %1913 = vmatpush.bf16.msrb.mxu3 %v6050_v54  ;;  %v7502_v48 = vor.u32 %v8948_v47, %v7501_v45  ;;  %v6350_v54 = vor.u32 %v8660_v30, %v6349_v44  ;;  %v6669_v33 = vld [vmem:[%s13286_s5 + $0x340] sm:$0xf] }
 0x12c   : > { %v8740_v34 = vld [vmem:[%s13286_s5 + $0x35c] sm:$0xf0] }
 0x12d   : > { %4591 = vmatpush.bf16.msrb.mxu0 %v7502_v48  ;;  %v8804_v38 = vld [vmem:[%s13286_s5 + $0x55c] sm:$0xf0]  ;;  %v6670_v30 = vor.u32 %v8740_v34, %v6669_v33 }
 0x12e   : > { %v8876_v42 = vld [vmem:[%s13286_s5 + $0x79c] sm:$0xf0] }
 0x12f   : > { %1914 = vmatpush.bf16.msrb.mxu3 %v6018_v57  ;;  %v7469_v57 = vld [vmem:[%s13286_s5 + $0x980] sm:$0xf] }
 0x130   : > { %v7470_v59 = vor.u32 %v8940_v58, %v7469_v57  ;;  %v8908_v44 = vld [vmem:[%s13286_s5 + $0x89c] sm:$0xf0] }
 0x131   : > { %v8732_v47 = vld [vmem:[%s13286_s5 + $0x31c] sm:$0xf0] }
 0x132   : > { %4592 = vmatpush.bf16.msrb.mxu0 %v7470_v59  ;;  %v6893_v48 = vld [vmem:[%s13286_s5 + $0x500] sm:$0xf] }
 0x133   : > { %v7181_v51 = vld [vmem:[%s13286_s5 + $0x740] sm:$0xf] }
 0x134   : > { %v6605_v57 = vld [vmem:[%s13286_s5 + $0x2c0] sm:$0xf] }
 0x135   : > { %v8724_v58 = vld [vmem:[%s13286_s5 + $0x2dc] sm:$0xf0] }
 0x136   : > { %v6861_v59 = vld [vmem:[%s13286_s5 + $0x4c0] sm:$0xf]  ;;  %v6606_v4 = vor.u32 %v8724_v58, %v6605_v57 }
 0x137   : > { %v8892_v3 = vld [vmem:[%s13286_s5 + $0x81c] sm:$0xf0] }
 0x138   : > { %v6541_v15 = vld [vmem:[%s13286_s5 + $0x240] sm:$0xf] }
 0x139   : > { %v8708_v16 = vld [vmem:[%s13286_s5 + $0x25c] sm:$0xf0] }
 0x13a   : > { %v6509_v24 = vld [vmem:[%s13286_s5 + $0x200] sm:$0xf] }
 0x13b   : > { %v9076_v33 = vld [vmem:[%s13286_s5 + $0xddc] sm:$0xf0] }
 0x13c   : > { %v7885_v57 = vld [vmem:[%s13286_s5 + $0xcc0] sm:$0xf] }
 0x18b   : > { %v794_v62 = vpop.permute.xlu0 %793 }
 0x18c   : > { %v796_v63 = vsel %vm695_vm2, %v9554_v46, %v794_v62  ;;  %v6215_v46 = vld [vmem:[%s13284_s3 + $0x1b8] sm:$0xf0]  ;;  %v8575_v62 = vld [vmem:[%s13284_s3 + $0x34] sm:$0xf0] }
 0x18d   : > { %v9708_v1 = vpack.c.bf16 %v796_v63, %v796_v63  ;;  %v6218_v10 = vor.u32 %v8619_v5, %v6215_v46  ;;  %v8571_v63 = vld [vmem:[%s13284_s3 + $0x1c] sm:$0xf]  ;;  %v6318_v5 = vor.u32 %v8652_v56, %v6317_v55  ;;  %v6989_v46 = vld [vmem:[%s13286_s5 + $0x5c0] sm:$0xf]  ;;  %v6022_v12 = vor.u32 %v8575_v62, %v6021_v61 }
 0x18e   : > { %v7149_v62 = vld [vmem:[%s13286_s5 + $0x700] sm:$0xf] }
 0x18f   : > { %1850 = vmatmul.bf16.vlgmr.msra.gmra.mxu1 %v9708_v1  ;;  %1863 = vmatmul.bf16.vlgmr.msra.gmra.mxu2 %v9708_v1 }
 0x190   : > { %1876 = vmatmul.bf16.vlgmr.msra.gmra.mxu3 %v9708_v1  ;;  %1920 = vmatpush.bf16.msra.mxu1 %v6246_v0  ;;  %v6058_v0 = vor.u32 %v8579_v36, %v6055_v53  ;;  %v8868_v36 = vld [vmem:[%s13286_s5 + $0x75c] sm:$0xf0] }
 0x191   : > { %1933 = vmatpush.bf16.msra.mxu2 %v6250_v2  ;;  %4539 = vmatpush.bf16.msra.mxu3 %v6478_v13  ;;  %v6023_v2 = vld [vmem:[%s13284_s3 + $0x38] sm:$0xf0]  ;;  %v7309_v53 = vld [vmem:[%s13286_s5 + $0x840] sm:$0xf]  ;;  %v7182_v61 = vor.u32 %v8868_v36, %v7181_v51 }
 0x192   : > { %v6026_v13 = vor.u32 %v8571_v63, %v6023_v2  ;;  %v7277_v2 = vld [vmem:[%s13286_s5 + $0x800] sm:$0xf] }
 0x193   : > { %v8988_v51 = vld [vmem:[%s13286_s5 + $0xb1c] sm:$0xf0] }
 0x194   : > { %1921 = vmatpush.bf16.msra.mxu1 %v6214_v6  ;;  %v7437_v6 = vld [vmem:[%s13286_s5 + $0x940] sm:$0xf] }
 0x195   : > { %1934 = vmatpush.bf16.msra.mxu2 %v6218_v10  ;;  %4540 = vmatpush.bf16.msra.mxu3 %v6446_v17  ;;  %v8644_v10 = vld [vmem:[%s13286_s5 + $0x5c] sm:$0xf0]  ;;  %v7438_v11 = vor.u32 %v8932_v7, %v7437_v6  ;;  %v6990_v17 = vor.u32 %v8820_v8, %v6989_v46 }
 0x196   : > { %v6286_v19 = vor.u32 %v8644_v10, %v6285_v9  ;;  %v6573_v46 = vld [vmem:[%s13286_s5 + $0x280] sm:$0xf]  ;;  %v7278_v10 = vor.u32 %v8892_v3, %v7277_v2 }
 0x197   : > { %4593 = vmatpush.bf16.msrb.mxu0 %v7438_v11  ;;  %v8716_v6 = vld [vmem:[%s13286_s5 + $0x29c] sm:$0xf0] }
 0x198   : > { %1922 = vmatpush.bf16.msra.mxu1 %v6182_v18  ;;  %v6957_v18 = vld [vmem:[%s13286_s5 + $0x580] sm:$0xf] }
 0x199   : > { %1935 = vmatpush.bf16.msra.mxu2 %v6186_v21  ;;  %4541 = vmatpush.bf16.msra.mxu3 %v6414_v26  ;;  %v8924_v21 = vld [vmem:[%s13286_s5 + $0x91c] sm:$0xf0]  ;;  %v6958_v32 = vor.u32 %v8812_v22, %v6957_v18  ;;  %v6542_v22 = vor.u32 %v8708_v16, %v6541_v15 }
 0x19a   : > { %v7406_v25 = vor.u32 %v8924_v21, %v7405_v20  ;;  %v7245_v26 = vld [vmem:[%s13286_s5 + $0x7c0] sm:$0xf] }
 0x19b   : > { %v6829_v7 = vld [vmem:[%s13286_s5 + $0x480] sm:$0xf] }
 0x19c   : > { %1923 = vmatpush.bf16.msra.mxu1 %v6150_v27  ;;  %v8884_v27 = vld [vmem:[%s13286_s5 + $0x7dc] sm:$0xf0]  ;;  %4594 = vmatpush.bf16.msrb.mxu0 %v7406_v25 }
 0x19d   : > { %1936 = vmatpush.bf16.msra.mxu2 %v6154_v28  ;;  %4542 = vmatpush.bf16.msra.mxu3 %v6382_v43  ;;  %v7373_v28 = vld [vmem:[%s13286_s5 + $0x8c0] sm:$0xf]  ;;  %v7246_v39 = vor.u32 %v8884_v27, %v7245_v26 }
 0x19e   : > { %v7374_v41 = vor.u32 %v8916_v31, %v7373_v28  ;;  %v7341_v43 = vld [vmem:[%s13286_s5 + $0x880] sm:$0xf] }
 0x19f   : > { %1889 = vmatmul.bf16.vlgmr.msrb.gmra.mxu1 %v9708_v1  ;;  %1902 = vmatmul.bf16.vlgmr.msrb.gmra.mxu2 %v9708_v1  ;;  %v8780_v8 = vld [vmem:[%s13286_s5 + $0x49c] sm:$0xf0] }
 0x1a0   : > { %1915 = vmatmul.bf16.vlgmr.msrb.gmra.mxu3 %v9708_v1  ;;  %1924 = vmatpush.bf16.msra.mxu1 %v6118_v37  ;;  %v6925_v37 = vld [vmem:[%s13286_s5 + $0x540] sm:$0xf] }
 0x1a1   : > { %1937 = vmatpush.bf16.msra.mxu2 %v6122_v40  ;;  %4543 = vmatpush.bf16.msra.mxu3 %v6350_v54  ;;  %v7213_v40 = vld [vmem:[%s13286_s5 + $0x780] sm:$0xf]  ;;  %v6926_v45 = vor.u32 %v8804_v38, %v6925_v37 }
 0x1a2   : > { %v7214_v50 = vor.u32 %v8876_v42, %v7213_v40  ;;  %4595 = vmatpush.bf16.msrb.mxu0 %v7374_v41  ;;  %v8900_v54 = vld [vmem:[%s13286_s5 + $0x85c] sm:$0xf0] }
 0x1a3   : > { %v7310_v63 = vor.u32 %v8900_v54, %v7309_v53  ;;  %v7117_v11 = vld [vmem:[%s13286_s5 + $0x6c0] sm:$0xf] }
 0x1a4   : > { %1925 = vmatpush.bf16.msra.mxu1 %v6086_v49  ;;  %v8796_v49 = vld [vmem:[%s13286_s5 + $0x51c] sm:$0xf0] }
 0x1a5   : > { %1938 = vmatpush.bf16.msra.mxu2 %v6090_v52  ;;  %4544 = vmatpush.bf16.msra.mxu3 %v6318_v5  ;;  %v7342_v52 = vor.u32 %v8908_v44, %v7341_v43  ;;  %v6894_v56 = vor.u32 %v8796_v49, %v6893_v48  ;;  %v8772_v18 = vld [vmem:[%s13286_s5 + $0x45c] sm:$0xf0] }
 0x1a6   : > { %v7085_v20 = vld [vmem:[%s13286_s5 + $0x680] sm:$0xf] }
 0x1a7   : > { %4596 = vmatpush.bf16.msrb.mxu0 %v7342_v52  ;;  %v8844_v21 = vld [vmem:[%s13286_s5 + $0x69c] sm:$0xf0] }
 0x1a8   : > { %1926 = vmatpush.bf16.msra.mxu1 %v6054_v60  ;;  %v8788_v60 = vld [vmem:[%s13286_s5 + $0x4dc] sm:$0xf0]  ;;  %v7086_v31 = vor.u32 %v8844_v21, %v7085_v20  ;;  %v8672_v20 = vld [vmem:[%s13286_s5 + $0x144] sm:$0xf] }
 0x1a9   : > { %1939 = vmatpush.bf16.msra.mxu2 %v6058_v0  ;;  %4545 = vmatpush.bf16.msra.mxu3 %v6286_v19  ;;  %v8860_v0 = vld [vmem:[%s13286_s5 + $0x71c] sm:$0xf0]  ;;  %v6862_v5 = vor.u32 %v8788_v60, %v6861_v59  ;;  %v8688_v60 = vld [vmem:[%s13286_s5 + $0x1c4] sm:$0xf] }
 0x1aa   : > { %v7150_v9 = vor.u32 %v8860_v0, %v7149_v62  ;;  %v8700_v25 = vld [vmem:[%s13286_s5 + $0x21c] sm:$0xf0] }
 0x1ab   : > { %4597 = vmatpush.bf16.msrb.mxu0 %v7310_v63  ;;  %v6765_v26 = vld [vmem:[%s13286_s5 + $0x400] sm:$0xf]  ;;  %v6510_v34 = vor.u32 %v8700_v25, %v6509_v24 }
 0x1ac   : > { %1927 = vmatpush.bf16.msra.mxu1 %v6022_v12  ;;  %v8852_v12 = vld [vmem:[%s13286_s5 + $0x6dc] sm:$0xf0] }
 0x1ad   : > { %1940 = vmatpush.bf16.msra.mxu2 %v6026_v13  ;;  %4546 = vmatpush.bf16.msra.mxu3 %v6254_v35  ;;  %v6574_v13 = vor.u32 %v8716_v6, %v6573_v46  ;;  %v7118_v19 = vor.u32 %v8852_v12, %v7117_v11  ;;  %v8764_v27 = vld [vmem:[%s13286_s5 + $0x41c] sm:$0xf0] }
 0x1ae   : > { %v7757_v28 = vld [vmem:[%s13286_s5 + $0xbc0] sm:$0xf]  ;;  %v6766_v35 = vor.u32 %v8764_v27, %v6765_v26 }
 0x1af   : > { %1928 = vmatmul.bf16.vlgmr.msra.gmra.mxu1 %v9708_v1  ;;  %4598 = vmatpush.bf16.msrb.mxu0 %v7278_v10  ;;  %v9004_v40 = vld [vmem:[%s13286_s5 + $0xb9c] sm:$0xf0] }
 0x1b0   : > { %4552 = vmatpush.bf16.msrb.mxu1 %v6734_v14  ;;  %1941 = vmatmul.bf16.vlgmr.msra.gmra.mxu2 %v9708_v1  ;;  %v6637_v1 = vld [vmem:[%s13286_s5 + $0x300] sm:$0xf]  ;;  %v6830_v14 = vor.u32 %v8780_v8, %v6829_v7  ;;  %v8680_v8 = vld [vmem:[%s13286_s5 + $0x184] sm:$0xf] }
 0x1b1   : > { %4565 = vmatpush.bf16.msrb.mxu2 %v6990_v17  ;;  %4578 = vmatpush.bf16.msrb.mxu3 %v7246_v39  ;;  %v6638_v55 = vor.u32 %v8732_v47, %v6637_v1  ;;  %v6797_v17 = vld [vmem:[%s13286_s5 + $0x440] sm:$0xf] }
 0x1b2   : > { %v6798_v23 = vor.u32 %v8772_v18, %v6797_v17  ;;  %v7725_v39 = vld [vmem:[%s13286_s5 + $0xb80] sm:$0xf] }
 0x1b3   : > { %v7981_v41 = vld [vmem:[%s13286_s5 + $0xd80] sm:$0xf]  ;;  %v7726_v43 = vor.u32 %v9004_v40, %v7725_v39  ;;  %v8648_v39 = vld [vmem:[%s13286_s5 + $0x84] sm:$0xf] }
 0x1b4   : > { %4553 = vmatpush.bf16.msrb.mxu1 %v6702_v29  ;;  %v9012_v29 = vld [vmem:[%s13286_s5 + $0xbdc] sm:$0xf0]  ;;  %v6319_v40 = vld [vmem:[%s13286_s5 + $0xa0] sm:$0xf0] }
 0x1b5   : > { %4566 = vmatpush.bf16.msrb.mxu2 %v6958_v32  ;;  %4579 = vmatpush.bf16.msrb.mxu3 %v7214_v50  ;;  %v8013_v32 = vld [vmem:[%s13286_s5 + $0xdc0] sm:$0xf]  ;;  %v7758_v37 = vor.u32 %v9012_v29, %v7757_v28  ;;  %v8664_v29 = vld [vmem:[%s13286_s5 + $0x104] sm:$0xf] }
 0x1b6   : > { %v8014_v38 = vor.u32 %v9076_v33, %v8013_v32  ;;  %v9068_v42 = vld [vmem:[%s13286_s5 + $0xd9c] sm:$0xf0] }
 0x1b7   : > { %v7982_v44 = vor.u32 %v9068_v42, %v7981_v41  ;;  %v7949_v1 = vld [vmem:[%s13286_s5 + $0xd40] sm:$0xf]  ;;  %v6322_v41 = vor.u32 %v8648_v39, %v6319_v40  ;;  %v8640_v42 = vld [vmem:[%s13286_s5 + $0x44] sm:$0xf] }
 0x1b8   : > { %4554 = vmatpush.bf16.msrb.mxu1 %v6670_v30  ;;  %v7693_v30 = vld [vmem:[%s13286_s5 + $0xb40] sm:$0xf]  ;;  %v8728_v40 = vld [vmem:[%s13286_s5 + $0x304] sm:$0xf] }
 0x1b9   : > { %4567 = vmatpush.bf16.msrb.mxu2 %v6926_v45  ;;  %4580 = vmatpush.bf16.msrb.mxu3 %v7182_v61  ;;  %v8996_v45 = vld [vmem:[%s13286_s5 + $0xb5c] sm:$0xf0]  ;;  %v6479_v61 = vld [vmem:[%s13286_s5 + $0x1e0] sm:$0xf0] }
 0x1ba   : > { %v9060_v47 = vld [vmem:[%s13286_s5 + $0xd5c] sm:$0xf0]  ;;  %v7694_v48 = vor.u32 %v8996_v45, %v7693_v30  ;;  %v6482_v63 = vor.u32 %v8688_v60, %v6479_v61  ;;  %v8632_v45 = vld [vmem:[%s13286_s5 + $0x4] sm:$0xf] }
 0x1bb   : > { %v7950_v49 = vor.u32 %v9060_v47, %v7949_v1  ;;  %v7661_v50 = vld [vmem:[%s13286_s5 + $0xb00] sm:$0xf]  ;;  %v6255_v1 = vld [vmem:[%s13286_s5 + $0x20] sm:$0xf0] }
 0x1bc   : > { %4555 = vmatpush.bf16.msrb.mxu1 %v6638_v55  ;;  %v7917_v52 = vld [vmem:[%s13286_s5 + $0xd00] sm:$0xf]  ;;  %v7662_v53 = vor.u32 %v8988_v51, %v7661_v50  ;;  %4643 = vmatpush.bf16.msra.mxu0 %v6482_v63  ;;  %v6258_v47 = vor.u32 %v8632_v45, %v6255_v1  ;;  %v6735_v63 = vld [vmem:[%s13286_s5 + $0x3e0] sm:$0xf0] }
 0x1bd   : > { %4568 = vmatpush.bf16.msrb.mxu2 %v6894_v56  ;;  %4581 = vmatpush.bf16.msrb.mxu3 %v7150_v9  ;;  %v9052_v36 = vld [vmem:[%s13286_s5 + $0xd1c] sm:$0xf0]  ;;  %v6447_v9 = vld [vmem:[%s13286_s5 + $0x1a0] sm:$0xf0] }
 0x1be   : > { %v7918_v54 = vor.u32 %v9052_v36, %v7917_v52  ;;  %v7629_v55 = vld [vmem:[%s13286_s5 + $0xac0] sm:$0xf]  ;;  %v6450_v11 = vor.u32 %v8680_v8, %v6447_v9  ;;  %v6895_v45 = vld [vmem:[%s13286_s5 + $0x520] sm:$0xf0] }
 0x1bf   : > { %v8980_v56 = vld [vmem:[%s13286_s5 + $0xadc] sm:$0xf0] }
 0x1c0   : > { %4556 = vmatpush.bf16.msrb.mxu1 %v6606_v4  ;;  %v7630_v58 = vor.u32 %v8980_v56, %v7629_v55  ;;  %v9044_v59 = vld [vmem:[%s13286_s5 + $0xcdc] sm:$0xf0]  ;;  %4644 = vmatpush.bf16.msra.mxu0 %v6450_v11 }
 0x1c1   : > { %4569 = vmatpush.bf16.msrb.mxu2 %v6862_v5  ;;  %4582 = vmatpush.bf16.msrb.mxu3 %v7118_v19  ;;  %v7886_v62 = vor.u32 %v9044_v59, %v7885_v57  ;;  %v7053_v0 = vld [vmem:[%s13286_s5 + $0x640] sm:$0xf] }
 0x1c2   : > { %v8836_v2 = vld [vmem:[%s13286_s5 + $0x65c] sm:$0xf0] }
 0x1c3   : > { %v7054_v3 = vor.u32 %v8836_v2, %v7053_v0  ;;  %v7597_v4 = vld [vmem:[%s13286_s5 + $0xa80] sm:$0xf] }
 0x1c4   : > { %4557 = vmatpush.bf16.msrb.mxu1 %v6574_v13  ;;  %v8972_v5 = vld [vmem:[%s13286_s5 + $0xa9c] sm:$0xf0] }
 0x1c5   : > { %4570 = vmatpush.bf16.msrb.mxu2 %v6830_v14  ;;  %4583 = vmatpush.bf16.msrb.mxu3 %v7086_v31  ;;  %v7853_v46 = vld [vmem:[%s13286_s5 + $0xc80] sm:$0xf]  ;;  %v7598_v6 = vor.u32 %v8972_v5, %v7597_v4  ;;  %v6383_v31 = vld [vmem:[%s13286_s5 + $0x120] sm:$0xf0] }
 0x1c6   : > { %v9036_v7 = vld [vmem:[%s13286_s5 + $0xc9c] sm:$0xf0]  ;;  %v6386_v33 = vor.u32 %v8664_v29, %v6383_v31  ;;  %v8816_v4 = vld [vmem:[%s13286_s5 + $0x5c4] sm:$0xf] }
 0x1c7   : > { %v7854_v10 = vor.u32 %v9036_v7, %v7853_v46  ;;  %v7021_v12 = vld [vmem:[%s13286_s5 + $0x600] sm:$0xf]  ;;  %v6991_v5 = vld [vmem:[%s13286_s5 + $0x5e0] sm:$0xf0] }
 0x1c8   : > { %4558 = vmatpush.bf16.msrb.mxu1 %v6542_v22  ;;  %v8828_v13 = vld [vmem:[%s13286_s5 + $0x61c] sm:$0xf0]  ;;  %v6415_v22 = vld [vmem:[%s13286_s5 + $0x160] sm:$0xf0]  ;;  %v6994_v11 = vor.u32 %v8816_v4, %v6991_v5 }
 0x1c9   : > { %4571 = vmatpush.bf16.msrb.mxu2 %v6798_v23  ;;  %4584 = vmatpush.bf16.msrb.mxu3 %v7054_v3  ;;  %v7022_v14 = vor.u32 %v8828_v13, %v7021_v12  ;;  %v7565_v15 = vld [vmem:[%s13286_s5 + $0xa40] sm:$0xf]  ;;  %v6418_v23 = vor.u32 %v8672_v20, %v6415_v22  ;;  %v8744_v12 = vld [vmem:[%s13286_s5 + $0x384] sm:$0xf] }
 0x1ca   : > { %v8964_v16 = vld [vmem:[%s13286_s5 + $0xa5c] sm:$0xf0]  ;;  %v6703_v13 = vld [vmem:[%s13286_s5 + $0x3a0] sm:$0xf0] }
 0x1cb   : > { %v7566_v17 = vor.u32 %v8964_v16, %v7565_v15  ;;  %v7821_v18 = vld [vmem:[%s13286_s5 + $0xc40] sm:$0xf]  ;;  %4645 = vmatpush.bf16.msra.mxu0 %v6418_v23  ;;  %v8808_v16 = vld [vmem:[%s13286_s5 + $0x584] sm:$0xf]  ;;  %v6706_v22 = vor.u32 %v8744_v12, %v6703_v13 }
 0x1cc   : > { %4559 = vmatpush.bf16.msrb.mxu1 %v6510_v34  ;;  %v9028_v19 = vld [vmem:[%s13286_s5 + $0xc5c] sm:$0xf0]  ;;  %v8564_v34 = vld [vmem:[%s9351_s24 + $0x38] sm:$0xff]  ;;  %v8800_v29 = vld [vmem:[%s13286_s5 + $0x544] sm:$0xf] }
 0x1cd   : > { %4572 = vmatpush.bf16.msrb.mxu2 %v6766_v35  ;;  %4585 = vmatpush.bf16.msrb.mxu3 %v7022_v14  ;;  %v7822_v21 = vor.u32 %v9028_v19, %v7821_v18  ;;  %v7533_v24 = vld [vmem:[%s13286_s5 + $0xa00] sm:$0xf]  ;;  %v8656_v35 = vld [vmem:[%s13286_s5 + $0xc4] sm:$0xf] }
 0x1ce   : > { %v8956_v25 = vld [vmem:[%s13286_s5 + $0xa1c] sm:$0xf0]  ;;  %5994 = vmatmul.msk.bf16.gmra.mxu0 %vm459_vm1, %v8564_v34  ;;  %v6927_v31 = vld [vmem:[%s13286_s5 + $0x560] sm:$0xf0] }
 0x1cf   : > { %v7789_v26 = vld [vmem:[%s13286_s5 + $0xc00] sm:$0xf]  ;;  %v7534_v27 = vor.u32 %v8956_v25, %v7533_v24  ;;  %4646 = vmatpush.bf16.msra.mxu0 %v6386_v33  ;;  %v8736_v25 = vld [vmem:[%s13286_s5 + $0x344] sm:$0xf] }
 0x1d0   : > { %4604 = vmatpush.bf16.msra.mxu1 %v7758_v37  ;;  %v9020_v28 = vld [vmem:[%s13286_s5 + $0xc1c] sm:$0xf0]  ;;  %v6351_v37 = vld [vmem:[%s13286_s5 + $0xe0] sm:$0xf0] }
 0x1d1   : > { %4617 = vmatpush.bf16.msra.mxu2 %v8014_v38  ;;  %v7790_v32 = vor.u32 %v9020_v28, %v7789_v26  ;;  %v6354_v38 = vor.u32 %v8656_v35, %v6351_v37  ;;  %v10185_v30 = vld [vmem:[%s13285_s4] sm:$0xff] }
 0x1d2   : > { %v8269_v51 = vld [vmem:[%s13286_s5 + $0xfc0] sm:$0xf]  ;;  %v1829_v18 = vperm.slane %v10185_v30, 3  ;;  %v6671_v26 = vld [vmem:[%s13286_s5 + $0x360] sm:$0xf0]  ;;  %v1830_v39 = vperm.slane %v10185_v30, 4 }
 0x1d3   : > { %4647 = vmatpush.bf16.msra.mxu0 %v6354_v38  ;;  %v9140_v52 = vld [vmem:[%s13286_s5 + $0xfdc] sm:$0xf0]  ;;  %v6674_v35 = vor.u32 %v8736_v25, %v6671_v26  ;;  %v6930_v38 = vor.u32 %v8800_v29, %v6927_v31  ;;  %v6575_v13 = vld [vmem:[%s13286_s5 + $0x2a0] sm:$0xf0] }
 0x1d4   : > { %4605 = vmatpush.bf16.msra.mxu1 %v7726_v43  ;;  %v6287_v43 = vld [vmem:[%s13286_s5 + $0x60] sm:$0xf0]  ;;  %v8270_v55 = vor.u32 %v9140_v52, %v8269_v51  ;;  %v8237_v57 = vld [vmem:[%s13286_s5 + $0xf80] sm:$0xf] }
 0x1d5   : > { %4618 = vmatpush.bf16.msra.mxu2 %v7982_v44  ;;  %v6290_v44 = vor.u32 %v8640_v42, %v6287_v43  ;;  %v9124_v7 = vld [vmem:[%s13286_s5 + $0xf5c] sm:$0xf0]  ;;  %v1831_v42 = vperm.slane %v10185_v30, 5  ;;  %v7439_v29 = vld [vmem:[%s13286_s5 + $0x960] sm:$0xf0] }
 0x1d6   : > { %v8173_v19 = vld [vmem:[%s13286_s5 + $0xf00] sm:$0xf] }
 0x1d7   : > { %4648 = vmatpush.bf16.msra.mxu0 %v6322_v41  ;;  %v9116_v20 = vld [vmem:[%s13286_s5 + $0xf1c] sm:$0xf0]  ;;  %v6639_v41 = vld [vmem:[%s13286_s5 + $0x320] sm:$0xf0] }
 0x1d8   : > { %4606 = vmatpush.bf16.msra.mxu1 %v7694_v48  ;;  %v1826_v48 = vperm.slane %v10185_v30, 0  ;;  %v8174_v28 = vor.u32 %v9116_v20, %v8173_v19  ;;  %v8141_v33 = vld [vmem:[%s13286_s5 + $0xec0] sm:$0xf] }
 0x1d9   : > { %4619 = vmatpush.bf16.msra.mxu2 %v7950_v49  ;;  %v9108_v34 = vld [vmem:[%s13286_s5 + $0xedc] sm:$0xf0] }
 0x1da   : > { %v8142_v43 = vor.u32 %v9108_v34, %v8141_v33  ;;  %v9084_v19 = vld [vmem:[%s13286_s5 + $0xe1c] sm:$0xf0]  ;;  %v6543_v33 = vld [vmem:[%s13286_s5 + $0x260] sm:$0xf0] }
 0x1db   : > { %4649 = vmatpush.bf16.msra.mxu0 %v6290_v44  ;;  %v8792_v44 = vld [vmem:[%s13286_s5 + $0x504] sm:$0xf] }
 0x1dc   : > { %4607 = vmatpush.bf16.msra.mxu1 %v7662_v53  ;;  %v1827_v53 = vperm.slane %v10185_v30, 1  ;;  %v8768_v34 = vld [vmem:[%s13286_s5 + $0x444] sm:$0xf] }
 0x1dd   : > { %4620 = vmatpush.bf16.msra.mxu2 %v7918_v54  ;;  %v1828_v54 = vperm.slane %v10185_v30, 2 }
 0x1df   : > { %4650 = vmatpush.bf16.msra.mxu0 %v6258_v47  ;;  %v8109_v47 = vld [vmem:[%s13286_s5 + $0xe80] sm:$0xf] }
 0x1e0   : > { %4608 = vmatpush.bf16.msra.mxu1 %v7630_v58  ;;  %v9132_v58 = vld [vmem:[%s13286_s5 + $0xf9c] sm:$0xf0] }
 0x1e1   : > { %4621 = vmatpush.bf16.msra.mxu2 %v7886_v62  ;;  %v8752_v62 = vld [vmem:[%s13286_s5 + $0x3c4] sm:$0xf]  ;;  %v8238_v3 = vor.u32 %v9132_v58, %v8237_v57 }
 0x1e2   : > { %v6738_v9 = vor.u32 %v8752_v62, %v6735_v63  ;;  %v6863_v62 = vld [vmem:[%s13286_s5 + $0x4e0] sm:$0xf0] }
 0x1e4   : > { %4609 = vmatpush.bf16.msra.mxu1 %v7598_v6  ;;  %v8205_v6 = vld [vmem:[%s13286_s5 + $0xf40] sm:$0xf] }
 0x1e5   : > { %4622 = vmatpush.bf16.msra.mxu2 %v7854_v10  ;;  %v8206_v15 = vor.u32 %v9124_v7, %v8205_v6  ;;  %v8712_v7 = vld [vmem:[%s13286_s5 + $0x284] sm:$0xf] }
 0x1e6   : > { %v6578_v25 = vor.u32 %v8712_v7, %v6575_v13  ;;  %v9000_v7 = vld [vmem:[%s13286_s5 + $0xb84] sm:$0xf] }
 0x1e7   : > { %v7983_v13 = vld [vmem:[%s13286_s5 + $0xda0] sm:$0xf0] }
 0x1e8   : > { %4610 = vmatpush.bf16.msra.mxu1 %v7566_v17  ;;  %v6959_v17 = vld [vmem:[%s13286_s5 + $0x5a0] sm:$0xf0] }
 0x1e9   : > { %4623 = vmatpush.bf16.msra.mxu2 %v7822_v21  ;;  %v6962_v24 = vor.u32 %v8808_v16, %v6959_v17  ;;  %v6831_v16 = vld [vmem:[%s13286_s5 + $0x4a0] sm:$0xf0]  ;;  %v1832_v17 = vperm.slane %v10185_v30, 6 }
 0x1ec   : > { %4611 = vmatpush.bf16.msra.mxu1 %v7534_v27 }
 0x1ed   : > { %4624 = vmatpush.bf16.msra.mxu2 %v7790_v32 }
 0x20c   : > { %v1851_v49 = vpop.f32.mrf.mxu1 }
 0x20d   : > { %v1852_v50 = vadd.f32 %v1851_v49, %v1826_v48  ;;  %v9100_v48 = vld [vmem:[%s13286_s5 + $0xe9c] sm:$0xf0] }
 0x20f   : > { %v1946_v36 = vmax.f32 %v1852_v50, 0.0  ;;  %v6642_v50 = vor.u32 %v8728_v40, %v6639_v41  ;;  %v7215_v41 = vld [vmem:[%s13286_s5 + $0x7a0] sm:$0xf0] }
 0x211   : > { %v10202_v56 = vpack.c.bf16 %v1946_v36, %v1946_v36  ;;  %v6898_v36 = vor.u32 %v8792_v44, %v6895_v45 }
 0x212   : > { %v1864_v59 = vpop.f32.mrf.mxu2 }
 0x213   : > { %v1865_v60 = vadd.f32 %v1864_v59, %v1827_v53  ;;  %v1877_v61 = vpop.f32.mrf.mxu3  ;;  %4547 = vmatmul.bf16.vlgmr.msra.gmra.mxu3 %v10202_v56  ;;  %v8720_v53 = vld [vmem:[%s13286_s5 + $0x2c4] sm:$0xf]  ;;  %v8110_v59 = vor.u32 %v9100_v48, %v8109_v47  ;;  %v1833_v48 = vperm.slane %v10185_v30, 7 }
 0x214   : > { %v1878_v0 = vadd.f32 %v1877_v61, %v1828_v54  ;;  %4630 = vmatpush.bf16.msra.mxu3 %v8270_v55  ;;  %v1853_v2 = vpop.f32.mrf.mxu1  ;;  %v8944_v54 = vld [vmem:[%s13286_s5 + $0x9c4] sm:$0xf] }
 0x215   : > { %v1947_v46 = vmax.f32 %v1865_v60, 0.0  ;;  %v7503_v55 = vld [vmem:[%s13286_s5 + $0x9e0] sm:$0xf0]  ;;  %v9092_v2 = vld [vmem:[%s13286_s5 + $0xe5c] sm:$0xf0] }
 0x216   : > { %v1948_v8 = vmax.f32 %v1878_v0, 0.0  ;;  %v6607_v60 = vld [vmem:[%s13286_s5 + $0x2e0] sm:$0xf0]  ;;  %v8077_v0 = vld [vmem:[%s13286_s5 + $0xe40] sm:$0xf]  ;;  %v7506_v4 = vor.u32 %v8944_v54, %v7503_v55 }
 0x217   : > { %v10229_v10 = vpack.c.bf16 %v1947_v46, %v1947_v46  ;;  %v8784_v61 = vld [vmem:[%s13286_s5 + $0x4c4] sm:$0xf]  ;;  %v6610_v46 = vor.u32 %v8720_v53, %v6607_v60  ;;  %v8078_v12 = vor.u32 %v9092_v2, %v8077_v0 }
 0x218   : > { %v10237_v14 = vpack.c.bf16 %v1948_v8, %v1948_v8  ;;  %4631 = vmatpush.bf16.msra.mxu3 %v8238_v3  ;;  %v6866_v6 = vor.u32 %v8784_v61, %v6863_v62  ;;  %v8936_v8 = vld [vmem:[%s13286_s5 + $0x984] sm:$0xf] }
 0x219   : > { %4560 = vmatmul.bf16.vlgmr.msrb.gmra.mxu1 %v10229_v10  ;;  %v9008_v30 = vld [vmem:[%s13286_s5 + $0xbc4] sm:$0xf] }
 0x21a   : > { %4573 = vmatmul.bf16.vlgmr.msrb.gmra.mxu2 %v10237_v14  ;;  %4656 = vmatpush.bf16.msrb.mxu1 %v6738_v9  ;;  %v1866_v21 = vpop.f32.mrf.mxu2  ;;  %v7471_v9 = vld [vmem:[%s13286_s5 + $0x9a0] sm:$0xf0] }
 0x21b   : > { %4669 = vmatpush.bf16.msrb.mxu2 %v6994_v11  ;;  %v1879_v23 = vpop.f32.mrf.mxu3  ;;  %v7474_v21 = vor.u32 %v8936_v8, %v7471_v9  ;;  %v7759_v54 = vld [vmem:[%s13286_s5 + $0xbe0] sm:$0xf0] }
 0x21c   : > { %4632 = vmatpush.bf16.msra.mxu3 %v8206_v15  ;;  %v1890_v27 = vpop.f32.mrf.mxu1  ;;  %v8776_v15 = vld [vmem:[%s13286_s5 + $0x484] sm:$0xf] }
 0x21d   : > { %v1891_v32 = vadd.f32 %v1890_v27, %v1829_v18  ;;  %v8045_v18 = vld [vmem:[%s13286_s5 + $0xe00] sm:$0xf]  ;;  %v7247_v23 = vld [vmem:[%s13286_s5 + $0x7e0] sm:$0xf0]  ;;  %v6834_v26 = vor.u32 %v8776_v15, %v6831_v16 }
 0x21e   : > { %4657 = vmatpush.bf16.msrb.mxu1 %v6706_v22  ;;  %v8880_v22 = vld [vmem:[%s13286_s5 + $0x7c4] sm:$0xf] }
 0x21f   : > { %v1949_v37 = vmax.f32 %v1891_v32, 0.0  ;;  %4670 = vmatpush.bf16.msrb.mxu2 %v6962_v24  ;;  %v8704_v27 = vld [vmem:[%s13286_s5 + $0x244] sm:$0xf]  ;;  %v8046_v32 = vor.u32 %v9084_v19, %v8045_v18 }
 0x220   : > { %4633 = vmatpush.bf16.msra.mxu3 %v8174_v28  ;;  %v8928_v28 = vld [vmem:[%s13286_s5 + $0x944] sm:$0xf]  ;;  %v6546_v45 = vor.u32 %v8704_v27, %v6543_v33 }
 0x221   : > { %v10286_v1 = vpack.c.bf16 %v1949_v37, %v1949_v37  ;;  %v7442_v40 = vor.u32 %v8928_v28, %v7439_v29  ;;  %v9072_v55 = vld [vmem:[%s13286_s5 + $0xdc4] sm:$0xf] }
 0x222   : > { %4658 = vmatpush.bf16.msrb.mxu1 %v6674_v35  ;;  %v1903_v49 = vpop.f32.mrf.mxu2  ;;  %v6799_v35 = vld [vmem:[%s13286_s5 + $0x460] sm:$0xf0] }
 0x223   : > { %4671 = vmatpush.bf16.msrb.mxu2 %v6930_v38  ;;  %v1904_v51 = vadd.f32 %v1903_v49, %v1830_v39  ;;  %v1916_v52 = vpop.f32.mrf.mxu3  ;;  %4586 = vmatmul.bf16.vlgmr.msrb.gmra.mxu3 %v10286_v1  ;;  %v7250_v38 = vor.u32 %v8880_v22, %v7247_v23  ;;  %v8872_v39 = vld [vmem:[%s13286_s5 + $0x784] sm:$0xf]  ;;  %v6802_v47 = vor.u32 %v8768_v34, %v6799_v35 }
 0x224   : > { %v1917_v57 = vadd.f32 %v1916_v52, %v1831_v42  ;;  %4634 = vmatpush.bf16.msra.mxu3 %v8142_v43  ;;  %v1892_v58 = vpop.f32.mrf.mxu1  ;;  %v8696_v42 = vld [vmem:[%s13286_s5 + $0x204] sm:$0xf]  ;;  %v7218_v53 = vor.u32 %v8872_v39, %v7215_v41 }
 0x225   : > { %v1950_v63 = vmax.f32 %v1904_v51, 0.0  ;;  %v6511_v43 = vld [vmem:[%s13286_s5 + $0x220] sm:$0xf0] }
 0x226   : > { %v1951_v3 = vmax.f32 %v1917_v57, 0.0  ;;  %4659 = vmatpush.bf16.msrb.mxu1 %v6642_v50  ;;  %v8920_v49 = vld [vmem:[%s13286_s5 + $0x904] sm:$0xf]  ;;  %v6514_v62 = vor.u32 %v8696_v42, %v6511_v43 }
 0x227   : > { %v10319_v5 = vpack.c.bf16 %v1950_v63, %v1950_v63  ;;  %4672 = vmatpush.bf16.msrb.mxu2 %v6898_v36  ;;  %v7407_v50 = vld [vmem:[%s13286_s5 + $0x920] sm:$0xf0] }
 0x228   : > { %v10330_v11 = vpack.c.bf16 %v1951_v3, %v1951_v3  ;;  %4635 = vmatpush.bf16.msra.mxu3 %v8110_v59  ;;  %v8760_v51 = vld [vmem:[%s13286_s5 + $0x404] sm:$0xf]  ;;  %v7410_v58 = vor.u32 %v8920_v49, %v7407_v50  ;;  %v7762_v3 = vor.u32 %v9008_v30, %v7759_v54 }
 0x229   : > { %4599 = vmatmul.bf16.vlgmr.msrb.gmra.mxu0 %v10319_v5  ;;  %v6767_v52 = vld [vmem:[%s13286_s5 + $0x420] sm:$0xf0] }
 0x22a   : > { %4612 = vmatmul.bf16.vlgmr.msra.gmra.mxu1 %v10330_v11  ;;  %4695 = vmatpush.bf16.msrb.mxu0 %v7506_v4  ;;  %v1905_v20 = vpop.f32.mrf.mxu2  ;;  %v8015_v57 = vld [vmem:[%s13286_s5 + $0xde0] sm:$0xf0]  ;;  %v6770_v63 = vor.u32 %v8760_v51, %v6767_v52 }
 0x22b   : > { %4660 = vmatpush.bf16.msrb.mxu1 %v6610_v46  ;;  %4673 = vmatpush.bf16.msrb.mxu2 %v6866_v6  ;;  %v1918_v24 = vpop.f32.mrf.mxu3  ;;  %v8864_v59 = vld [vmem:[%s13286_s5 + $0x744] sm:$0xf]  ;;  %v8018_v4 = vor.u32 %v9072_v55, %v8015_v57  ;;  %v6485_v57 = vld [vmem:[%s13286_s5 + $0x1c8] sm:$0xf] }
 0x22c   : > { %4636 = vmatpush.bf16.msra.mxu3 %v8078_v12  ;;  %v1929_v31 = vpop.f32.mrf.mxu1  ;;  %v7183_v60 = vld [vmem:[%s13286_s5 + $0x760] sm:$0xf0] }
 0x22d   : > { %v1930_v37 = vadd.f32 %v1929_v31, %v1832_v17  ;;  %v8912_v46 = vld [vmem:[%s13286_s5 + $0x8c4] sm:$0xf]  ;;  %v7186_v8 = vor.u32 %v8864_v59, %v7183_v60 }
 0x22e   : > { %4696 = vmatpush.bf16.msrb.mxu0 %v7474_v21  ;;  %v7375_v6 = vld [vmem:[%s13286_s5 + $0x8e0] sm:$0xf0] }
 0x22f   : > { %v1952_v44 = vmax.f32 %v1930_v37, 0.0  ;;  %4661 = vmatpush.bf16.msrb.mxu1 %v6578_v25  ;;  %4674 = vmatpush.bf16.msrb.mxu2 %v6834_v26  ;;  %v7727_v9 = vld [vmem:[%s13286_s5 + $0xba0] sm:$0xf0]  ;;  %v7378_v18 = vor.u32 %v8912_v46, %v7375_v6 }
 0x230   : > { %4637 = vmatpush.bf16.msra.mxu3 %v8046_v32  ;;  %v9064_v12 = vld [vmem:[%s13286_s5 + $0xd84] sm:$0xf]  ;;  %v7730_v20 = vor.u32 %v9000_v7, %v7727_v9  ;;  %v6453_v7 = vld [vmem:[%s13286_s5 + $0x188] sm:$0xf] }
 0x231   : > { %v10402_v36 = vpack.c.bf16 %v1952_v44, %v1952_v44  ;;  %v8856_v16 = vld [vmem:[%s13286_s5 + $0x704] sm:$0xf]  ;;  %v7986_v21 = vor.u32 %v9064_v12, %v7983_v13 }
 0x232   : > { %4697 = vmatpush.bf16.msrb.mxu0 %v7442_v40  ;;  %v7151_v17 = vld [vmem:[%s13286_s5 + $0x720] sm:$0xf0] }
 0x233   : > { %4662 = vmatpush.bf16.msrb.mxu1 %v6546_v45  ;;  %4675 = vmatpush.bf16.msrb.mxu2 %v6802_v47  ;;  %v1942_v61 = vpop.f32.mrf.mxu2  ;;  %v8904_v22 = vld [vmem:[%s13286_s5 + $0x884] sm:$0xf]  ;;  %v7154_v25 = vor.u32 %v8856_v16, %v7151_v17 }
 0x234   : > { %4682 = vmatpush.bf16.msrb.mxu3 %v7250_v38  ;;  %v1943_v0 = vadd.f32 %v1942_v61, %v1833_v48  ;;  %4625 = vmatmul.bf16.vlgmr.msra.gmra.mxu2 %v10402_v36  ;;  %v1931_v2 = vpop.f32.mrf.mxu1  ;;  %v7343_v23 = vld [vmem:[%s13286_s5 + $0x8a0] sm:$0xf0] }
 0x235   : > { %v8992_v24 = vld [vmem:[%s13286_s5 + $0xb44] sm:$0xf]  ;;  %v7346_v33 = vor.u32 %v8904_v22, %v7343_v23 }
 0x236   : > { %v1953_v15 = vmax.f32 %v1943_v0, 0.0  ;;  %4698 = vmatpush.bf16.msrb.mxu0 %v7410_v58  ;;  %v7695_v26 = vld [vmem:[%s13286_s5 + $0xb60] sm:$0xf0]  ;;  %v8693_v58 = vld [vmem:[%s13286_s5 + $0x1e4] sm:$0xf0] }
 0x237   : > { %4663 = vmatpush.bf16.msrb.mxu1 %v6514_v62  ;;  %4676 = vmatpush.bf16.msrb.mxu2 %v6770_v63  ;;  %v9056_v27 = vld [vmem:[%s13286_s5 + $0xd44] sm:$0xf]  ;;  %v7698_v34 = vor.u32 %v8992_v24, %v7695_v26  ;;  %v6421_v26 = vld [vmem:[%s13286_s5 + $0x148] sm:$0xf] }
 0x238   : > { %4683 = vmatpush.bf16.msrb.mxu3 %v7218_v53  ;;  %v10444_v19 = vpack.c.bf16 %v1953_v15, %v1953_v15  ;;  %v7951_v28 = vld [vmem:[%s13286_s5 + $0xd60] sm:$0xf0] }
 0x239   : > { %4651 = vmatmul.bf16.vlgmr.msra.gmra.mxu0 %v10202_v56  ;;  %v8848_v29 = vld [vmem:[%s13286_s5 + $0x6c4] sm:$0xf]  ;;  %v7954_v35 = vor.u32 %v9056_v27, %v7951_v28  ;;  %v8677_v27 = vld [vmem:[%s13286_s5 + $0x164] sm:$0xf0] }
 0x23a   : > { %4638 = vmatmul.bf16.vlgmr.msra.gmra.mxu3 %v10444_v19  ;;  %4664 = vmatmul.bf16.vlgmr.msrb.gmra.mxu1 %v10229_v10  ;;  %v7119_v31 = vld [vmem:[%s13286_s5 + $0x6e0] sm:$0xf0] }
 0x23b   : > { %4708 = vmatpush.bf16.msra.mxu1 %v7762_v3  ;;  %4721 = vmatpush.bf16.msra.mxu2 %v8018_v4  ;;  %v1944_v32 = vpop.f32.mrf.mxu2  ;;  %v8896_v37 = vld [vmem:[%s13286_s5 + $0x844] sm:$0xf]  ;;  %v7122_v40 = vor.u32 %v8848_v29, %v7119_v31  ;;  %v6486_v3 = vor.u32 %v8693_v58, %v6485_v57  ;;  %v6709_v57 = vld [vmem:[%s13286_s5 + $0x388] sm:$0xf] }
 0x23c   : > { %4684 = vmatpush.bf16.msrb.mxu3 %v7186_v8  ;;  %4699 = vmatpush.bf16.msrb.mxu0 %v7378_v18  ;;  %v7311_v38 = vld [vmem:[%s13286_s5 + $0x860] sm:$0xf0]  ;;  %v8685_v8 = vld [vmem:[%s13286_s5 + $0x1a4] sm:$0xf0] }
 0x23d   : > { %v8984_v39 = vld [vmem:[%s13286_s5 + $0xb04] sm:$0xf]  ;;  %v7314_v47 = vor.u32 %v8896_v37, %v7311_v38  ;;  %v6422_v37 = vor.u32 %v8677_v27, %v6421_v26  ;;  %v8749_v58 = vld [vmem:[%s13286_s5 + $0x3a4] sm:$0xf0] }
 0x23e   : > { %v7663_v41 = vld [vmem:[%s13286_s5 + $0xb20] sm:$0xf0] }
 0x23f   : > { %4709 = vmatpush.bf16.msra.mxu1 %v7730_v20  ;;  %4722 = vmatpush.bf16.msra.mxu2 %v7986_v21  ;;  %v9048_v42 = vld [vmem:[%s13286_s5 + $0xd04] sm:$0xf]  ;;  %v7666_v49 = vor.u32 %v8984_v39, %v7663_v41  ;;  %v6454_v20 = vor.u32 %v8685_v8, %v6453_v7  ;;  %v6389_v39 = vld [vmem:[%s13286_s5 + $0x108] sm:$0xf] }
 0x240   : > { %4685 = vmatpush.bf16.msrb.mxu3 %v7154_v25  ;;  %v7919_v43 = vld [vmem:[%s13286_s5 + $0xd20] sm:$0xf0]  ;;  %4700 = vmatpush.bf16.msrb.mxu0 %v7346_v33  ;;  %v8741_v7 = vld [vmem:[%s13286_s5 + $0x364] sm:$0xf0] }
 0x241   : > { %v8840_v44 = vld [vmem:[%s13286_s5 + $0x684] sm:$0xf]  ;;  %v7922_v50 = vor.u32 %v9048_v42, %v7919_v43  ;;  %v6741_v42 = vld [vmem:[%s13286_s5 + $0x3c8] sm:$0xf] }
 0x242   : > { %v7087_v45 = vld [vmem:[%s13286_s5 + $0x6a0] sm:$0xf0]  ;;  %v8757_v43 = vld [vmem:[%s13286_s5 + $0x3e4] sm:$0xf0] }
 0x243   : > { %v8888_v48 = vld [vmem:[%s13286_s5 + $0x804] sm:$0xf]  ;;  %4710 = vmatpush.bf16.msra.mxu1 %v7698_v34  ;;  %4723 = vmatpush.bf16.msra.mxu2 %v7954_v35  ;;  %v7090_v53 = vor.u32 %v8840_v44, %v7087_v45  ;;  %v6997_v44 = vld [vmem:[%s13286_s5 + $0x5c8] sm:$0xf] }
 0x244   : > { %v7279_v51 = vld [vmem:[%s13286_s5 + $0x820] sm:$0xf0]  ;;  %4686 = vmatpush.bf16.msrb.mxu3 %v7122_v40  ;;  %4701 = vmatpush.bf16.msrb.mxu0 %v7314_v47  ;;  %v8669_v40 = vld [vmem:[%s13286_s5 + $0x124] sm:$0xf0] }
 0x245   : > { %v8976_v52 = vld [vmem:[%s13286_s5 + $0xac4] sm:$0xf]  ;;  %v7282_v61 = vor.u32 %v8888_v48, %v7279_v51  ;;  %4677 = vmatmul.bf16.vlgmr.msrb.gmra.mxu2 %v10237_v14  ;;  %v8821_v45 = vld [vmem:[%s13286_s5 + $0x5e4] sm:$0xf0]  ;;  %v6390_v51 = vor.u32 %v8669_v40, %v6389_v39 }
 0x246   : > { %v7631_v30 = vld [vmem:[%s13286_s5 + $0xae0] sm:$0xf0]  ;;  %v6933_v8 = vld [vmem:[%s13286_s5 + $0x548] sm:$0xf] }
 0x247   : > { %v9040_v54 = vld [vmem:[%s13286_s5 + $0xcc4] sm:$0xf]  ;;  %4711 = vmatpush.bf16.msra.mxu1 %v7666_v49  ;;  %4724 = vmatpush.bf16.msra.mxu2 %v7922_v50  ;;  %v7634_v62 = vor.u32 %v8976_v52, %v7631_v30  ;;  %v6742_v52 = vor.u32 %v8757_v43, %v6741_v42  ;;  %v6357_v30 = vld [vmem:[%s13286_s5 + $0xc8] sm:$0xf] }
 0x248   : > { %v7887_v55 = vld [vmem:[%s13286_s5 + $0xce0] sm:$0xf0]  ;;  %4687 = vmatpush.bf16.msrb.mxu3 %v7090_v53  ;;  %4702 = vmatpush.bf16.msrb.mxu0 %v7282_v61  ;;  %v8661_v53 = vld [vmem:[%s13286_s5 + $0xe4] sm:$0xf0] }
 0x249   : > { %v8832_v59 = vld [vmem:[%s13286_s5 + $0x644] sm:$0xf]  ;;  %v7890_v63 = vor.u32 %v9040_v54, %v7887_v55  ;;  %v6998_v54 = vor.u32 %v8821_v45, %v6997_v44  ;;  %v8789_v39 = vld [vmem:[%s13286_s5 + $0x4e4] sm:$0xf0] }
 0x24a   : > { %v7055_v60 = vld [vmem:[%s13286_s5 + $0x660] sm:$0xf0]  ;;  %v7509_v40 = vld [vmem:[%s13286_s5 + $0x9c8] sm:$0xf] }
 0x24b   : > { %v8968_v0 = vld [vmem:[%s13286_s5 + $0xa84] sm:$0xf]  ;;  %v7058_v4 = vor.u32 %v8832_v59, %v7055_v60  ;;  %4712 = vmatpush.bf16.msra.mxu1 %v7634_v62  ;;  %4725 = vmatpush.bf16.msra.mxu2 %v7890_v63  ;;  %v6965_v59 = vld [vmem:[%s13286_s5 + $0x588] sm:$0xf]  ;;  %v6358_v63 = vor.u32 %v8661_v53, %v6357_v30 }
 0x24c   : > { %v7599_v2 = vld [vmem:[%s13286_s5 + $0xaa0] sm:$0xf0]  ;;  %4747 = vmatpush.bf16.msra.mxu0 %v6486_v3  ;;  %v8813_v60 = vld [vmem:[%s13286_s5 + $0x5a4] sm:$0xf0] }
 0x24d   : > { %v9032_v46 = vld [vmem:[%s13286_s5 + $0xc84] sm:$0xf]  ;;  %v7602_v16 = vor.u32 %v8968_v0, %v7599_v2  ;;  %4688 = vmatpush.bf16.msrb.mxu3 %v7058_v4  ;;  %4703 = vmatmul.bf16.vlgmr.msrb.gmra.mxu0 %v10319_v5  ;;  %v6710_v0 = vor.u32 %v8749_v58, %v6709_v57  ;;  %v6325_v2 = vld [vmem:[%s13286_s5 + $0x88] sm:$0xf]  ;;  %v6966_v4 = vor.u32 %v8813_v60, %v6965_v59 }
 0x24e   : > { %v7855_v6 = vld [vmem:[%s13286_s5 + $0xca0] sm:$0xf0]  ;;  %v8653_v3 = vld [vmem:[%s13286_s5 + $0xa4] sm:$0xf0] }
 0x24f   : > { %v8824_v9 = vld [vmem:[%s13286_s5 + $0x604] sm:$0xf]  ;;  %v7858_v17 = vor.u32 %v9032_v46, %v7855_v6  ;;  %4713 = vmatpush.bf16.msra.mxu1 %v7602_v16  ;;  %v6677_v6 = vld [vmem:[%s13286_s5 + $0x348] sm:$0xf] }
 0x250   : > { %v7023_v12 = vld [vmem:[%s13286_s5 + $0x620] sm:$0xf0]  ;;  %4748 = vmatpush.bf16.msra.mxu0 %v6454_v20  ;;  %v6678_v16 = vor.u32 %v8741_v7, %v6677_v6  ;;  %v8781_v30 = vld [vmem:[%s13286_s5 + $0x4a4] sm:$0xf0] }
 0x251   : > { %v9136_v13 = vld [vmem:[%s13286_s5 + $0xfc4] sm:$0xf]  ;;  %v7026_v21 = vor.u32 %v8824_v9, %v7023_v12  ;;  %4726 = vmatpush.bf16.msra.mxu2 %v7858_v17  ;;  %v8805_v9 = vld [vmem:[%s13286_s5 + $0x564] sm:$0xf0] }
 0x252   : > { %v8271_v15 = vld [vmem:[%s13286_s5 + $0xfe0] sm:$0xf0]  ;;  %v6293_v17 = vld [vmem:[%s13286_s5 + $0x48] sm:$0xf]  ;;  %v6934_v20 = vor.u32 %v8805_v9, %v6933_v8 }
 0x253   : > { %v8960_v18 = vld [vmem:[%s13286_s5 + $0xa44] sm:$0xf]  ;;  %v8274_v25 = vor.u32 %v9136_v13, %v8271_v15  ;;  %4689 = vmatpush.bf16.msrb.mxu3 %v7026_v21  ;;  %v6326_v15 = vor.u32 %v8653_v3, %v6325_v2  ;;  %v7477_v53 = vld [vmem:[%s13286_s5 + $0x988] sm:$0xf] }
 0x254   : > { %v7567_v22 = vld [vmem:[%s13286_s5 + $0xa60] sm:$0xf0]  ;;  %4749 = vmatpush.bf16.msra.mxu0 %v6422_v37  ;;  %v8725_v37 = vld [vmem:[%s13286_s5 + $0x2e4] sm:$0xf0] }
 0x255   : > { %v9024_v23 = vld [vmem:[%s13286_s5 + $0xc44] sm:$0xf]  ;;  %v7570_v31 = vor.u32 %v8960_v18, %v7567_v22  ;;  %v8645_v18 = vld [vmem:[%s13286_s5 + $0x64] sm:$0xf0] }
 0x256   : > { %v7823_v24 = vld [vmem:[%s13286_s5 + $0xc60] sm:$0xf0]  ;;  %4690 = vmatmul.bf16.vlgmr.msrb.gmra.mxu3 %v10286_v1  ;;  %v6645_v22 = vld [vmem:[%s13286_s5 + $0x308] sm:$0xf] }
 0x257   : > { %v9128_v28 = vld [vmem:[%s13286_s5 + $0xf84] sm:$0xf]  ;;  %v7826_v32 = vor.u32 %v9024_v23, %v7823_v24  ;;  %4734 = vmatpush.bf16.msra.mxu3 %v8274_v25  ;;  %4714 = vmatpush.bf16.msra.mxu1 %v7570_v31  ;;  %v8733_v23 = vld [vmem:[%s13286_s5 + $0x324] sm:$0xf0] }
 0x258   : > { %v8239_v29 = vld [vmem:[%s13286_s5 + $0xfa0] sm:$0xf0]  ;;  %4750 = vmatpush.bf16.msra.mxu0 %v6390_v51  ;;  %v6901_v24 = vld [vmem:[%s13286_s5 + $0x508] sm:$0xf] }
 0x259   : > { %v8952_v33 = vld [vmem:[%s13286_s5 + $0xa04] sm:$0xf]  ;;  %v8242_v41 = vor.u32 %v9128_v28, %v8239_v29  ;;  %4727 = vmatpush.bf16.msra.mxu2 %v7826_v32  ;;  %v8797_v25 = vld [vmem:[%s13286_s5 + $0x524] sm:$0xf0]  ;;  %v6294_v28 = vor.u32 %v8645_v18, %v6293_v17  ;;  %v6646_v29 = vor.u32 %v8733_v23, %v6645_v22 }
 0x25a   : > { %v7535_v34 = vld [vmem:[%s13286_s5 + $0xa20] sm:$0xf0]  ;;  %v6261_v31 = vld [vmem:[%s13286_s5 + $0x8] sm:$0xf] }
 0x25b   : > { %v9016_v35 = vld [vmem:[%s13286_s5 + $0xc04] sm:$0xf]  ;;  %v7538_v49 = vor.u32 %v8952_v33, %v7535_v34  ;;  %4735 = vmatpush.bf16.msra.mxu3 %v8242_v41  ;;  %v8637_v32 = vld [vmem:[%s13286_s5 + $0x24] sm:$0xf0]  ;;  %v6902_v33 = vor.u32 %v8797_v25, %v6901_v24 }
 0x25c   : > { %v7791_v38 = vld [vmem:[%s13286_s5 + $0xc20] sm:$0xf0]  ;;  %4751 = vmatpush.bf16.msra.mxu0 %v6358_v63  ;;  %v8949_v41 = vld [vmem:[%s13286_s5 + $0x9e4] sm:$0xf0]  ;;  %v6262_v44 = vor.u32 %v8637_v32, %v6261_v31 }
 0x25d   : > { %v9120_v47 = vld [vmem:[%s13286_s5 + $0xf44] sm:$0xf]  ;;  %v7794_v50 = vor.u32 %v9016_v35, %v7791_v38  ;;  %4715 = vmatpush.bf16.msra.mxu1 %v7538_v49  ;;  %v6613_v35 = vld [vmem:[%s13286_s5 + $0x2c8] sm:$0xf] }
 0x25e   : > { %v8207_v48 = vld [vmem:[%s13286_s5 + $0xf60] sm:$0xf0]  ;;  %v6869_v38 = vld [vmem:[%s13286_s5 + $0x4c8] sm:$0xf]  ;;  %v6614_v45 = vor.u32 %v8725_v37, %v6613_v35 }
 0x25f   : > { %v8210_v55 = vor.u32 %v9120_v47, %v8207_v48  ;;  %v9112_v61 = vld [vmem:[%s13286_s5 + $0xf04] sm:$0xf]  ;;  %4728 = vmatpush.bf16.msra.mxu2 %v7794_v50  ;;  %v6870_v47 = vor.u32 %v8789_v39, %v6869_v38  ;;  %v7510_v48 = vor.u32 %v8949_v41, %v7509_v40  ;;  %v6581_v49 = vld [vmem:[%s13286_s5 + $0x288] sm:$0xf] }
 0x260   : > { %v8175_v62 = vld [vmem:[%s13286_s5 + $0xf20] sm:$0xf0]  ;;  %4716 = vmatmul.bf16.vlgmr.msra.gmra.mxu1 %v10330_v11  ;;  %4752 = vmatpush.bf16.msra.mxu0 %v6326_v15  ;;  %v8717_v50 = vld [vmem:[%s13286_s5 + $0x2a4] sm:$0xf0] }
 0x261   : > { %4760 = vmatpush.bf16.msrb.mxu1 %v6742_v52  ;;  %4736 = vmatpush.bf16.msra.mxu3 %v8210_v55  ;;  %v8178_v46 = vor.u32 %v9112_v61, %v8175_v62  ;;  %v9104_v12 = vld [vmem:[%s13286_s5 + $0xec4] sm:$0xf]  ;;  %v6837_v51 = vld [vmem:[%s13286_s5 + $0x488] sm:$0xf]  ;;  %v6582_v58 = vor.u32 %v8717_v50, %v6581_v49 }
 0x262   : > { %4729 = vmatmul.bf16.vlgmr.msra.gmra.mxu2 %v10402_v36  ;;  %v8143_v13 = vld [vmem:[%s13286_s5 + $0xee0] sm:$0xf0]  ;;  %v7253_v59 = vld [vmem:[%s13286_s5 + $0x7c8] sm:$0xf]  ;;  %v6838_v61 = vor.u32 %v8781_v30, %v6837_v51 }
 0x263   : > { %4773 = vmatpush.bf16.msrb.mxu2 %v6998_v54  ;;  %v8146_v21 = vor.u32 %v9104_v12, %v8143_v13  ;;  %v9096_v26 = vld [vmem:[%s13286_s5 + $0xe84] sm:$0xf]  ;;  %v8941_v54 = vld [vmem:[%s13286_s5 + $0x9a4] sm:$0xf0] }
 0x264   : > { %v8111_v27 = vld [vmem:[%s13286_s5 + $0xea0] sm:$0xf0]  ;;  %4753 = vmatpush.bf16.msra.mxu0 %v6294_v28  ;;  %v8885_v60 = vld [vmem:[%s13286_s5 + $0x7e4] sm:$0xf0]  ;;  %v7478_v62 = vor.u32 %v8941_v54, %v7477_v53 }
 0x265   : > { %4761 = vmatpush.bf16.msrb.mxu1 %v6710_v0  ;;  %4737 = vmatpush.bf16.msra.mxu3 %v8178_v46  ;;  %v8114_v34 = vor.u32 %v9096_v26, %v8111_v27  ;;  %v9088_v42 = vld [vmem:[%s13286_s5 + $0xe44] sm:$0xf]  ;;  %v6549_v63 = vld [vmem:[%s13286_s5 + $0x248] sm:$0xf]  ;;  %v7254_v7 = vor.u32 %v8885_v60, %v7253_v59 }
 0x266   : > { %v8079_v43 = vld [vmem:[%s13286_s5 + $0xe60] sm:$0xf0]  ;;  %v8709_v0 = vld [vmem:[%s13286_s5 + $0x264] sm:$0xf0] }
 0x267   : > { %4774 = vmatpush.bf16.msrb.mxu2 %v6966_v4  ;;  %v8082_v52 = vor.u32 %v9088_v42, %v8079_v43  ;;  %v9080_v55 = vld [vmem:[%s13286_s5 + $0xe04] sm:$0xf]  ;;  %v6805_v2 = vld [vmem:[%s13286_s5 + $0x448] sm:$0xf]  ;;  %v6550_v8 = vor.u32 %v8709_v0, %v6549_v63 }
 0x268   : > { %v8047_v57 = vld [vmem:[%s13286_s5 + $0xe20] sm:$0xf0]  ;;  %4754 = vmatpush.bf16.msra.mxu0 %v6262_v44  ;;  %v8773_v4 = vld [vmem:[%s13286_s5 + $0x464] sm:$0xf0] }
 0x269   : > { %4762 = vmatpush.bf16.msrb.mxu1 %v6678_v16  ;;  %4738 = vmatpush.bf16.msra.mxu3 %v8146_v21  ;;  %v8050_v3 = vor.u32 %v9080_v55, %v8047_v57  ;;  %v7445_v46 = vld [vmem:[%s13286_s5 + $0x948] sm:$0xf]  ;;  %v6806_v15 = vor.u32 %v8773_v4, %v6805_v2  ;;  %v532_v2 = vpop.f32.mrf.mxu0 }
 0x26a   : > { %v8933_v6 = vld [vmem:[%s13286_s5 + $0x964] sm:$0xf0] }
 0x26b   : > { %4775 = vmatpush.bf16.msrb.mxu2 %v6934_v20  ;;  %4755 = vmatmul.bf16.vlgmr.msra.gmra.mxu0 %v10202_v56  ;;  %v7221_v9 = vld [vmem:[%s13286_s5 + $0x788] sm:$0xf]  ;;  %v7446_v16 = vor.u32 %v8933_v6, %v7445_v46 }
 0x26c   : > { %4799 = vmatpush.bf16.msrb.mxu0 %v7510_v48  ;;  %v8877_v12 = vld [vmem:[%s13286_s5 + $0x7a4] sm:$0xf0] }
 0x26d   : > { %4763 = vmatpush.bf16.msrb.mxu1 %v6646_v29  ;;  %4739 = vmatpush.bf16.msra.mxu3 %v8114_v34  ;;  %v6517_v13 = vld [vmem:[%s13286_s5 + $0x208] sm:$0xf]  ;;  %v7222_v24 = vor.u32 %v8877_v12, %v7221_v9 }
 0x26e   : > { %v8701_v17 = vld [vmem:[%s13286_s5 + $0x224] sm:$0xf0] }
 0x26f   : > { %4776 = vmatpush.bf16.msrb.mxu2 %v6902_v33  ;;  %v6773_v18 = vld [vmem:[%s13286_s5 + $0x408] sm:$0xf]  ;;  %v6518_v28 = vor.u32 %v8701_v17, %v6517_v13 }
 0x270   : > { %4800 = vmatpush.bf16.msrb.mxu0 %v7478_v62  ;;  %v8765_v20 = vld [vmem:[%s13286_s5 + $0x424] sm:$0xf0] }
 0x271   : > { %4764 = vmatpush.bf16.msrb.mxu1 %v6614_v45  ;;  %4740 = vmatpush.bf16.msra.mxu3 %v8082_v52  ;;  %v7413_v21 = vld [vmem:[%s13286_s5 + $0x908] sm:$0xf]  ;;  %v6774_v32 = vor.u32 %v8765_v20, %v6773_v18 }
 0x272   : > { %v8925_v22 = vld [vmem:[%s13286_s5 + $0x924] sm:$0xf0] }
 0x273   : > { %4777 = vmatpush.bf16.msrb.mxu2 %v6870_v47  ;;  %v7765_v23 = vld [vmem:[%s13286_s5 + $0xbc8] sm:$0xf]  ;;  %v7414_v33 = vor.u32 %v8925_v22, %v7413_v21 }
 0x274   : > { %v9013_v25 = vld [vmem:[%s13286_s5 + $0xbe4] sm:$0xf0]  ;;  %4801 = vmatpush.bf16.msrb.mxu0 %v7446_v16 }
 0x275   : > { %4765 = vmatpush.bf16.msrb.mxu1 %v6582_v58  ;;  %4741 = vmatpush.bf16.msra.mxu3 %v8050_v3  ;;  %v8021_v26 = vld [vmem:[%s13286_s5 + $0xdc8] sm:$0xf]  ;;  %v7766_v34 = vor.u32 %v9013_v25, %v7765_v23  ;;  %v8689_v23 = vld [vmem:[%s13286_s5 + $0x1cc] sm:$0xf] }
 0x276   : > { %v9077_v27 = vld [vmem:[%s13286_s5 + $0xde4] sm:$0xf0] }
 0x277   : > { %4778 = vmatpush.bf16.msrb.mxu2 %v6838_v61  ;;  %v7189_v29 = vld [vmem:[%s13286_s5 + $0x748] sm:$0xf]  ;;  %v8022_v35 = vor.u32 %v9077_v27, %v8021_v26 }
 0x278   : > { %v8869_v31 = vld [vmem:[%s13286_s5 + $0x764] sm:$0xf0]  ;;  %4742 = vmatmul.bf16.vlgmr.msra.gmra.mxu3 %v10444_v19  ;;  %4802 = vmatpush.bf16.msrb.mxu0 %v7414_v33  ;;  %v534_v33 = vpop.f32.mrf.mxu0 }
 0x279   : > { %4786 = vmatpush.bf16.msrb.mxu3 %v7254_v7  ;;  %4766 = vmatpush.bf16.msrb.mxu1 %v6550_v8  ;;  %v7381_v37 = vld [vmem:[%s13286_s5 + $0x8c8] sm:$0xf]  ;;  %v7190_v40 = vor.u32 %v8869_v31, %v7189_v29  ;;  %v8649_v33 = vld [vmem:[%s13286_s5 + $0x8c] sm:$0xf] }
 0x27a   : > { %v8917_v38 = vld [vmem:[%s13286_s5 + $0x8e4] sm:$0xf0] }
 0x27b   : > { %4779 = vmatpush.bf16.msrb.mxu2 %v6806_v15  ;;  %v7733_v39 = vld [vmem:[%s13286_s5 + $0xb88] sm:$0xf]  ;;  %v7382_v47 = vor.u32 %v8917_v38, %v7381_v37 }
 0x27c   : > { %v9005_v41 = vld [vmem:[%s13286_s5 + $0xba4] sm:$0xf0] }
 0x27d   : > { %4787 = vmatpush.bf16.msrb.mxu3 %v7222_v24  ;;  %v7989_v42 = vld [vmem:[%s13286_s5 + $0xd88] sm:$0xf]  ;;  %4767 = vmatpush.bf16.msrb.mxu1 %v6518_v28  ;;  %v7734_v48 = vor.u32 %v9005_v41, %v7733_v39  ;;  %v6487_v24 = vld [vmem:[%s13286_s5 + $0x1e8] sm:$0xf0] }
 0x27e   : > { %v9069_v43 = vld [vmem:[%s13286_s5 + $0xda4] sm:$0xf0]  ;;  %4803 = vmatpush.bf16.msrb.mxu0 %v7382_v47  ;;  %v8681_v39 = vld [vmem:[%s13286_s5 + $0x18c] sm:$0xf] }
 0x27f   : > { %v7157_v44 = vld [vmem:[%s13286_s5 + $0x708] sm:$0xf]  ;;  %4780 = vmatpush.bf16.msrb.mxu2 %v6774_v32  ;;  %v7990_v49 = vor.u32 %v9069_v43, %v7989_v42 }
 0x280   : > { %v8861_v45 = vld [vmem:[%s13286_s5 + $0x724] sm:$0xf0]  ;;  %4768 = vmatmul.bf16.vlgmr.msrb.gmra.mxu1 %v10229_v10 }
 0x281   : > { %4812 = vmatpush.bf16.msra.mxu1 %v7766_v34  ;;  %v7349_v50 = vld [vmem:[%s13286_s5 + $0x888] sm:$0xf]  ;;  %4788 = vmatpush.bf16.msrb.mxu3 %v7190_v40  ;;  %v7158_v30 = vor.u32 %v8861_v45, %v7157_v44  ;;  %v6490_v34 = vor.u32 %v8689_v23, %v6487_v24  ;;  %v6455_v40 = vld [vmem:[%s13286_s5 + $0x1a8] sm:$0xf0] }
 0x282   : > { %v8909_v51 = vld [vmem:[%s13286_s5 + $0x8a4] sm:$0xf0]  ;;  %4781 = vmatmul.bf16.vlgmr.msrb.gmra.mxu2 %v10237_v14  ;;  %v8745_v24 = vld [vmem:[%s13286_s5 + $0x38c] sm:$0xf] }
 0x283   : > { %4825 = vmatpush.bf16.msra.mxu2 %v8022_v35  ;;  %v7701_v52 = vld [vmem:[%s13286_s5 + $0xb48] sm:$0xf]  ;;  %v7350_v59 = vor.u32 %v8909_v51, %v7349_v50 }
 0x284   : > { %v8997_v53 = vld [vmem:[%s13286_s5 + $0xb64] sm:$0xf0] }
 0x285   : > { %v7957_v54 = vld [vmem:[%s13286_s5 + $0xd48] sm:$0xf]  ;;  %4813 = vmatpush.bf16.msra.mxu1 %v7734_v48  ;;  %v7702_v60 = vor.u32 %v8997_v53, %v7701_v52  ;;  %4789 = vmatpush.bf16.msrb.mxu3 %v7158_v30 }
 0x286   : > { %v9061_v55 = vld [vmem:[%s13286_s5 + $0xd64] sm:$0xf0]  ;;  %4804 = vmatpush.bf16.msrb.mxu0 %v7350_v59 }
 0x287   : > { %v7125_v57 = vld [vmem:[%s13286_s5 + $0x6c8] sm:$0xf]  ;;  %4826 = vmatpush.bf16.msra.mxu2 %v7990_v49  ;;  %v7958_v61 = vor.u32 %v9061_v55, %v7957_v54  ;;  %v6458_v49 = vor.u32 %v8681_v39, %v6455_v40  ;;  %v8673_v54 = vld [vmem:[%s13286_s5 + $0x14c] sm:$0xf] }
 0x288   : > { %v8853_v58 = vld [vmem:[%s13286_s5 + $0x6e4] sm:$0xf0]  ;;  %v6423_v55 = vld [vmem:[%s13286_s5 + $0x168] sm:$0xf0] }
 0x289   : > { %v7317_v62 = vld [vmem:[%s13286_s5 + $0x848] sm:$0xf]  ;;  %v7126_v3 = vor.u32 %v8853_v58, %v7125_v57  ;;  %4814 = vmatpush.bf16.msra.mxu1 %v7702_v60  ;;  %v8737_v39 = vld [vmem:[%s13286_s5 + $0x34c] sm:$0xf] }
 0x28a   : > { %v8901_v63 = vld [vmem:[%s13286_s5 + $0x864] sm:$0xf0]  ;;  %v6679_v40 = vld [vmem:[%s13286_s5 + $0x368] sm:$0xf0] }
 0x28b   : > { %v7669_v0 = vld [vmem:[%s13286_s5 + $0xb08] sm:$0xf]  ;;  %v7318_v9 = vor.u32 %v8901_v63, %v7317_v62  ;;  %4827 = vmatpush.bf16.msra.mxu2 %v7958_v61  ;;  %4790 = vmatpush.bf16.msrb.mxu3 %v7126_v3  ;;  %v8665_v3 = vld [vmem:[%s13286_s5 + $0x10c] sm:$0xf] }
 0x28c   : > { %v8989_v4 = vld [vmem:[%s13286_s5 + $0xb24] sm:$0xf0] }
 0x28d   : > { %v7925_v46 = vld [vmem:[%s13286_s5 + $0xd08] sm:$0xf]  ;;  %v7670_v13 = vor.u32 %v8989_v4, %v7669_v0  ;;  %4805 = vmatpush.bf16.msrb.mxu0 %v7318_v9  ;;  %v6426_v0 = vor.u32 %v8673_v54, %v6423_v55  ;;  %v6391_v4 = vld [vmem:[%s13286_s5 + $0x128] sm:$0xf0] }
 0x28e   : > { %v9053_v6 = vld [vmem:[%s13286_s5 + $0xd24] sm:$0xf0]  ;;  %v6999_v9 = vld [vmem:[%s13286_s5 + $0x5e8] sm:$0xf0] }
 0x28f   : > { %v7093_v7 = vld [vmem:[%s13286_s5 + $0x688] sm:$0xf]  ;;  %v7926_v15 = vor.u32 %v9053_v6, %v7925_v46  ;;  %4815 = vmatpush.bf16.msra.mxu1 %v7670_v13  ;;  %v8753_v6 = vld [vmem:[%s13286_s5 + $0x3cc] sm:$0xf] }
 0x290   : > { %v8845_v8 = vld [vmem:[%s13286_s5 + $0x6a4] sm:$0xf0]  ;;  %v8793_v54 = vld [vmem:[%s13286_s5 + $0x50c] sm:$0xf] }
 0x291   : > { %v7285_v12 = vld [vmem:[%s13286_s5 + $0x808] sm:$0xf]  ;;  %v7094_v20 = vor.u32 %v8845_v8, %v7093_v7  ;;  %4828 = vmatpush.bf16.msra.mxu2 %v7926_v15  ;;  %v6743_v7 = vld [vmem:[%s13286_s5 + $0x3e8] sm:$0xf0] }
 0x292   : > { %v8893_v16 = vld [vmem:[%s13286_s5 + $0x824] sm:$0xf0]  ;;  %v8817_v8 = vld [vmem:[%s13286_s5 + $0x5cc] sm:$0xf] }
 0x293   : > { %v7637_v17 = vld [vmem:[%s13286_s5 + $0xac8] sm:$0xf]  ;;  %v7286_v27 = vor.u32 %v8893_v16, %v7285_v12  ;;  %4791 = vmatpush.bf16.msrb.mxu3 %v7094_v20  ;;  %v8657_v20 = vld [vmem:[%s13286_s5 + $0xcc] sm:$0xf] }
 0x294   : > { %v8981_v18 = vld [vmem:[%s13286_s5 + $0xae4] sm:$0xf0] }
 0x295   : > { %v7893_v21 = vld [vmem:[%s13286_s5 + $0xcc8] sm:$0xf]  ;;  %v7638_v28 = vor.u32 %v8981_v18, %v7637_v17  ;;  %4806 = vmatpush.bf16.msrb.mxu0 %v7286_v27  ;;  %v6394_v17 = vor.u32 %v8665_v3, %v6391_v4  ;;  %v6746_v18 = vor.u32 %v8753_v6, %v6743_v7  ;;  %v6967_v27 = vld [vmem:[%s13286_s5 + $0x5a8] sm:$0xf0] }
 0x296   : > { %v9045_v22 = vld [vmem:[%s13286_s5 + $0xce4] sm:$0xf0]  ;;  %v4548_v55 = vpop.f32.mrf.mxu3  ;;  %v8721_v6 = vld [vmem:[%s13286_s5 + $0x2cc] sm:$0xf] }
 0x297   : > { %v7061_v25 = vld [vmem:[%s13286_s5 + $0x648] sm:$0xf]  ;;  %v7894_v29 = vor.u32 %v9045_v22, %v7893_v21  ;;  %4816 = vmatpush.bf16.msra.mxu1 %v7638_v28  ;;  %v6359_v21 = vld [vmem:[%s13286_s5 + $0xe8] sm:$0xf0]  ;;  %v7002_v22 = vor.u32 %v8817_v8, %v6999_v9 }
 0x298   : > { %v8837_v26 = vld [vmem:[%s13286_s5 + $0x664] sm:$0xf0]  ;;  %4807 = vmatmul.bf16.vlgmr.msrb.gmra.mxu0 %v10319_v5  ;;  %v6615_v7 = vld [vmem:[%s13286_s5 + $0x2e8] sm:$0xf0] }
 0x299   : > { %v7605_v31 = vld [vmem:[%s13286_s5 + $0xa88] sm:$0xf]  ;;  %v7062_v35 = vor.u32 %v8837_v26, %v7061_v25  ;;  %4829 = vmatpush.bf16.msra.mxu2 %v7894_v29  ;;  %4851 = vmatpush.bf16.msra.mxu0 %v6490_v34  ;;  %v6711_v25 = vld [vmem:[%s13286_s5 + $0x3a8] sm:$0xf0] }
 0x29a   : > { %v8973_v32 = vld [vmem:[%s13286_s5 + $0xaa4] sm:$0xf0]  ;;  %v8809_v26 = vld [vmem:[%s13286_s5 + $0x58c] sm:$0xf] }
 0x29b   : > { %v7861_v37 = vld [vmem:[%s13286_s5 + $0xc88] sm:$0xf]  ;;  %v7606_v45 = vor.u32 %v8973_v32, %v7605_v31  ;;  %4792 = vmatpush.bf16.msrb.mxu3 %v7062_v35  ;;  %v6362_v31 = vor.u32 %v8657_v20, %v6359_v21  ;;  %v6714_v32 = vor.u32 %v8745_v24, %v6711_v25  ;;  %v6327_v34 = vld [vmem:[%s13286_s5 + $0xa8] sm:$0xf0]  ;;  %v11045_v35 = vld [vmem:[%s13287_s6] sm:$0xff] }
 0x29c   : > { %v9037_v38 = vld [vmem:[%s13286_s5 + $0xca4] sm:$0xf0]  ;;  %v8785_v8 = vld [vmem:[%s13286_s5 + $0x4cc] sm:$0xf] }
 0x29d   : > { %v7029_v41 = vld [vmem:[%s13286_s5 + $0x608] sm:$0xf]  ;;  %v7862_v47 = vor.u32 %v9037_v38, %v7861_v37  ;;  %4817 = vmatpush.bf16.msra.mxu1 %v7606_v45  ;;  %4852 = vmatpush.bf16.msra.mxu0 %v6458_v49  ;;  %v6970_v37 = vor.u32 %v8809_v26, %v6967_v27  ;;  %v4523_v45 = vperm.slane %v11045_v35, 0  ;;  %v8641_v49 = vld [vmem:[%s13286_s5 + $0x4c] sm:$0xf]  ;;  %v4574_v20 = vpop.f32.mrf.mxu2 }
 0x29e   : > { %v8829_v42 = vld [vmem:[%s13286_s5 + $0x624] sm:$0xf0]  ;;  %v6871_v9 = vld [vmem:[%s13286_s5 + $0x4e8] sm:$0xf0]  ;;  %v4550_v27 = vpop.f32.mrf.mxu3 }
 0x29f   : > { %v8277_v43 = vld [vmem:[%s13286_s5 + $0xfc8] sm:$0xf]  ;;  %v7030_v50 = vor.u32 %v8829_v42, %v7029_v41  ;;  %4830 = vmatpush.bf16.msra.mxu2 %v7862_v47  ;;  %v8801_v41 = vld [vmem:[%s13286_s5 + $0x54c] sm:$0xf]  ;;  %v6330_v47 = vor.u32 %v8649_v33, %v6327_v34  ;;  %v6874_v21 = vor.u32 %v8785_v8, %v6871_v9 }
 0x2a0   : > { %v9141_v44 = vld [vmem:[%s13286_s5 + $0xfe4] sm:$0xf0]  ;;  %v6935_v42 = vld [vmem:[%s13286_s5 + $0x568] sm:$0xf0] }
 0x2a1   : > { %v7573_v48 = vld [vmem:[%s13286_s5 + $0xa48] sm:$0xf]  ;;  %v8278_v53 = vor.u32 %v9141_v44, %v8277_v43  ;;  %4793 = vmatpush.bf16.msrb.mxu3 %v7030_v50  ;;  %4853 = vmatpush.bf16.msra.mxu0 %v6426_v0  ;;  %v6295_v50 = vld [vmem:[%s13286_s5 + $0x68] sm:$0xf0] }
 0x2a2   : > { %v8965_v51 = vld [vmem:[%s13286_s5 + $0xa64] sm:$0xf0]  ;;  %v8633_v0 = vld [vmem:[%s13286_s5 + $0xc] sm:$0xf] }
 0x2a3   : > { %v7829_v52 = vld [vmem:[%s13286_s5 + $0xc48] sm:$0xf]  ;;  %v7574_v59 = vor.u32 %v8965_v51, %v7573_v48  ;;  %v6682_v48 = vor.u32 %v8737_v39, %v6679_v40  ;;  %v6938_v51 = vor.u32 %v8801_v41, %v6935_v42  ;;  %v6583_v24 = vld [vmem:[%s13286_s5 + $0x2a8] sm:$0xf0] }
 0x2a4   : > { %v9029_v30 = vld [vmem:[%s13286_s5 + $0xc64] sm:$0xf0]  ;;  %4794 = vmatmul.bf16.vlgmr.msrb.gmra.mxu3 %v10286_v1  ;;  %v8777_v25 = vld [vmem:[%s13286_s5 + $0x48c] sm:$0xf] }
 0x2a5   : > { %v8245_v57 = vld [vmem:[%s13286_s5 + $0xf88] sm:$0xf]  ;;  %v7830_v60 = vor.u32 %v9029_v30, %v7829_v52  ;;  %4838 = vmatpush.bf16.msra.mxu3 %v8278_v53  ;;  %4818 = vmatpush.bf16.msra.mxu1 %v7574_v59  ;;  %v8729_v30 = vld [vmem:[%s13286_s5 + $0x30c] sm:$0xf] }
 0x2a6   : > { %v9133_v58 = vld [vmem:[%s13286_s5 + $0xfa4] sm:$0xf0]  ;;  %4854 = vmatpush.bf16.msra.mxu0 %v6394_v17  ;;  %v6647_v53 = vld [vmem:[%s13286_s5 + $0x328] sm:$0xf0] }
 0x2a7   : > { %v7541_v61 = vld [vmem:[%s13286_s5 + $0xa08] sm:$0xf]  ;;  %v8246_v46 = vor.u32 %v9133_v58, %v8245_v57  ;;  %4831 = vmatpush.bf16.msra.mxu2 %v7830_v60  ;;  %v4561_v57 = vpop.f32.mrf.mxu1  ;;  %v6903_v58 = vld [vmem:[%s13286_s5 + $0x528] sm:$0xf0] }
 0x2a8   : > { %v8957_v62 = vld [vmem:[%s13286_s5 + $0xa24] sm:$0xf0]  ;;  %v6906_v4 = vor.u32 %v8793_v54, %v6903_v58  ;;  %v7479_v33 = vld [vmem:[%s13286_s5 + $0x9a8] sm:$0xf0] }
 0x2a9   : > { %v7797_v63 = vld [vmem:[%s13286_s5 + $0xc08] sm:$0xf]  ;;  %v7542_v15 = vor.u32 %v8957_v62, %v7541_v61  ;;  %4839 = vmatpush.bf16.msra.mxu3 %v8246_v46  ;;  %v4549_v61 = vadd.f32 %v4548_v55, %v4523_v45  ;;  %v6298_v62 = vor.u32 %v8641_v49, %v6295_v50  ;;  %v8881_v39 = vld [vmem:[%s13286_s5 + $0x7cc] sm:$0xf]  ;;  %v4576_v55 = vpop.f32.mrf.mxu2 }
 0x2aa   : > { %v9021_v2 = vld [vmem:[%s13286_s5 + $0xc24] sm:$0xf0]  ;;  %4855 = vmatpush.bf16.msra.mxu0 %v6362_v31  ;;  %v6839_v31 = vld [vmem:[%s13286_s5 + $0x4a8] sm:$0xf0] }
 0x2ab   : > { %v8213_v12 = vld [vmem:[%s13286_s5 + $0xf48] sm:$0xf]  ;;  %v7798_v16 = vor.u32 %v9021_v2, %v7797_v63  ;;  %4819 = vmatpush.bf16.msra.mxu1 %v7542_v15  ;;  %v6650_v63 = vor.u32 %v8729_v30, %v6647_v53  ;;  %v6263_v2 = vld [vmem:[%s13286_s5 + $0x28] sm:$0xf0]  ;;  %v4562_v3 = vadd.f32 %v4561_v57, %v4549_v61  ;;  %v6842_v41 = vor.u32 %v8777_v25, %v6839_v31 }
 0x2ac   : > { %v9125_v13 = vld [vmem:[%s13286_s5 + $0xf64] sm:$0xf0]  ;;  %v6266_v17 = vor.u32 %v8633_v0, %v6263_v2  ;;  %v7255_v40 = vld [vmem:[%s13286_s5 + $0x7e8] sm:$0xf0] }
 0x2ad   : > { %v8214_v23 = vor.u32 %v9125_v13, %v8213_v12  ;;  %v8181_v28 = vld [vmem:[%s13286_s5 + $0xf08] sm:$0xf]  ;;  %4832 = vmatpush.bf16.msra.mxu2 %v7798_v16  ;;  %v8945_v12 = vld [vmem:[%s13286_s5 + $0x9cc] sm:$0xf]  ;;  %v4575_v26 = vadd.f32 %v4574_v20, %v4562_v3 }
 0x2ae   : > { %v9117_v29 = vld [vmem:[%s13286_s5 + $0xf24] sm:$0xf0]  ;;  %4820 = vmatmul.bf16.vlgmr.msra.gmra.mxu1 %v10330_v11  ;;  %4856 = vmatpush.bf16.msra.mxu0 %v6330_v47  ;;  %v7511_v13 = vld [vmem:[%s13286_s5 + $0x9e8] sm:$0xf0] }
 0x2af   : > { %4864 = vmatpush.bf16.msrb.mxu1 %v6746_v18  ;;  %4840 = vmatpush.bf16.msra.mxu3 %v8214_v23  ;;  %v8182_v38 = vor.u32 %v9117_v29, %v8181_v28  ;;  %v8149_v43 = vld [vmem:[%s13286_s5 + $0xec8] sm:$0xf]  ;;  %v6618_v18 = vor.u32 %v8721_v6, %v6615_v7  ;;  %v8713_v23 = vld [vmem:[%s13286_s5 + $0x28c] sm:$0xf]  ;;  %v4563_v28 = vpop.f32.mrf.mxu1 }
 0x2b0   : > { %4833 = vmatmul.bf16.vlgmr.msra.gmra.mxu2 %v10402_v36  ;;  %v9109_v44 = vld [vmem:[%s13286_s5 + $0xee4] sm:$0xf0]  ;;  %v8769_v45 = vld [vmem:[%s13286_s5 + $0x44c] sm:$0xf] }
 0x2b1   : > { %4877 = vmatpush.bf16.msrb.mxu2 %v7002_v22  ;;  %v8150_v52 = vor.u32 %v9109_v44, %v8149_v43  ;;  %v8117_v59 = vld [vmem:[%s13286_s5 + $0xe88] sm:$0xf]  ;;  %v7514_v22 = vor.u32 %v8945_v12, %v7511_v13  ;;  %v8705_v43 = vld [vmem:[%s13286_s5 + $0x24c] sm:$0xf] }
 0x2b2   : > { %v9101_v60 = vld [vmem:[%s13286_s5 + $0xea4] sm:$0xf0]  ;;  %4857 = vmatpush.bf16.msra.mxu0 %v6298_v62  ;;  %v6551_v44 = vld [vmem:[%s13286_s5 + $0x268] sm:$0xf0]  ;;  %v4587_v62 = vpop.f32.mrf.mxu3 }
 0x2b3   : > { %4865 = vmatpush.bf16.msrb.mxu1 %v6714_v32  ;;  %4841 = vmatpush.bf16.msra.mxu3 %v8182_v38  ;;  %v8118_v46 = vor.u32 %v9101_v60, %v8117_v59  ;;  %v8085_v15 = vld [vmem:[%s13286_s5 + $0xe48] sm:$0xf]  ;;  %v8937_v32 = vld [vmem:[%s13286_s5 + $0x98c] sm:$0xf]  ;;  %v6586_v38 = vor.u32 %v8713_v23, %v6583_v24 }
 0x2b4   : > { %v9093_v16 = vld [vmem:[%s13286_s5 + $0xe64] sm:$0xf0]  ;;  %v7482_v42 = vor.u32 %v8937_v32, %v7479_v33  ;;  %v8929_v49 = vld [vmem:[%s13286_s5 + $0x94c] sm:$0xf] }
 0x2b5   : > { %4878 = vmatpush.bf16.msrb.mxu2 %v6970_v37  ;;  %v8086_v29 = vor.u32 %v9093_v16, %v8085_v15  ;;  %v8053_v34 = vld [vmem:[%s13286_s5 + $0xe08] sm:$0xf]  ;;  %v7447_v50 = vld [vmem:[%s13286_s5 + $0x968] sm:$0xf0] }
 0x2b6   : > { %v9085_v37 = vld [vmem:[%s13286_s5 + $0xe24] sm:$0xf0]  ;;  %4858 = vmatpush.bf16.msra.mxu0 %v6266_v17  ;;  %v8873_v30 = vld [vmem:[%s13286_s5 + $0x78c] sm:$0xf]  ;;  %v7450_v58 = vor.u32 %v8929_v49, %v7447_v50 }
 0x2b7   : > { %4866 = vmatpush.bf16.msrb.mxu1 %v6682_v48  ;;  %4842 = vmatpush.bf16.msra.mxu3 %v8150_v52  ;;  %v8054_v47 = vor.u32 %v9085_v37, %v8053_v34  ;;  %v6807_v48 = vld [vmem:[%s13286_s5 + $0x468] sm:$0xf0]  ;;  %v6554_v52 = vor.u32 %v8705_v43, %v6551_v44 }
 0x2b8   : > { %v7223_v53 = vld [vmem:[%s13286_s5 + $0x7a8] sm:$0xf0]  ;;  %v6810_v57 = vor.u32 %v8769_v45, %v6807_v48 }
 0x2b9   : > { %4879 = vmatpush.bf16.msrb.mxu2 %v6938_v51  ;;  %4859 = vmatmul.bf16.vlgmr.msra.gmra.mxu0 %v10202_v56  ;;  %v7258_v51 = vor.u32 %v8881_v39, %v7255_v40  ;;  %v8697_v54 = vld [vmem:[%s13286_s5 + $0x20c] sm:$0xf]  ;;  %v7226_v6 = vor.u32 %v8873_v30, %v7223_v53 }
 0x2ba   : > { %4903 = vmatpush.bf16.msrb.mxu0 %v7514_v22  ;;  %v6519_v59 = vld [vmem:[%s13286_s5 + $0x228] sm:$0xf0]  ;;  %v4589_v34 = vpop.f32.mrf.mxu3 }
 0x2bb   : > { %4867 = vmatpush.bf16.msrb.mxu1 %v6650_v63  ;;  %4843 = vmatpush.bf16.msra.mxu3 %v8118_v46  ;;  %v8761_v60 = vld [vmem:[%s13286_s5 + $0x40c] sm:$0xf]  ;;  %v4600_v63 = vpop.f32.mrf.mxu0  ;;  %v4613_v46 = vpop.f32.mrf.mxu1  ;;  %v6522_v12 = vor.u32 %v8697_v54, %v6519_v59  ;;  %v4524_v59 = vperm.slane %v11045_v35, 1 }
 0x2bc   : > { %v6775_v61 = vld [vmem:[%s13286_s5 + $0x428] sm:$0xf0] }
 0x2bd   : > { %4880 = vmatpush.bf16.msrb.mxu2 %v6906_v4  ;;  %v8921_v0 = vld [vmem:[%s13286_s5 + $0x90c] sm:$0xf]  ;;  %v4588_v4 = vadd.f32 %v4587_v62, %v4575_v26  ;;  %v6778_v17 = vor.u32 %v8761_v60, %v6775_v61 }
 0x2be   : > { %4904 = vmatpush.bf16.msrb.mxu0 %v7482_v42  ;;  %v7415_v2 = vld [vmem:[%s13286_s5 + $0x928] sm:$0xf0] }
 0x2bf   : > { %4868 = vmatpush.bf16.msrb.mxu1 %v6618_v18  ;;  %4844 = vmatpush.bf16.msra.mxu3 %v8086_v29  ;;  %v9009_v3 = vld [vmem:[%s13286_s5 + $0xbcc] sm:$0xf]  ;;  %v4601_v16 = vadd.f32 %v4600_v63, %v4588_v4  ;;  %v7418_v18 = vor.u32 %v8921_v0, %v7415_v2 }
 0x2c0   : > { %v7767_v7 = vld [vmem:[%s13286_s5 + $0xbe8] sm:$0xf0] }
 0x2c1   : > { %4881 = vmatpush.bf16.msrb.mxu2 %v6874_v21  ;;  %v9073_v8 = vld [vmem:[%s13286_s5 + $0xdcc] sm:$0xf]  ;;  %v7770_v20 = vor.u32 %v9009_v3, %v7767_v7  ;;  %v11223_v25 = vadd.f32 %v4613_v46, %v4601_v16 }
 0x2c2   : > { %v8023_v9 = vld [vmem:[%s13286_s5 + $0xde8] sm:$0xf0]  ;;  %4905 = vmatpush.bf16.msrb.mxu0 %v7450_v58 }
 0x2c3   : > { %4869 = vmatpush.bf16.msrb.mxu1 %v6586_v38  ;;  %4845 = vmatpush.bf16.msra.mxu3 %v8054_v47  ;;  %v8865_v13 = vld [vmem:[%s13286_s5 + $0x74c] sm:$0xf]  ;;  %v8026_v21 = vor.u32 %v9073_v8, %v8023_v9  ;;  %v4602_v37 = vpop.f32.mrf.mxu0  ;;  %v4615_v43 = vpop.f32.mrf.mxu1 }
 0x2c4   : > { %v7191_v15 = vld [vmem:[%s13286_s5 + $0x768] sm:$0xf0]  ;;  %v4626_v9 = vpop.f32.mrf.mxu2  ;;  %v6461_v37 = vld [vmem:[%s13286_s5 + $0x190] sm:$0xf] }
 0x2c5   : > { %4882 = vmatpush.bf16.msrb.mxu2 %v6842_v41  ;;  %v8913_v22 = vld [vmem:[%s13286_s5 + $0x8cc] sm:$0xf]  ;;  %v7194_v26 = vor.u32 %v8865_v13, %v7191_v15 }
 0x2c6   : > { %4846 = vmatmul.bf16.vlgmr.msra.gmra.mxu3 %v10444_v19  ;;  %v7383_v23 = vld [vmem:[%s13286_s5 + $0x8e8] sm:$0xf0]  ;;  %4906 = vmatpush.bf16.msrb.mxu0 %v7418_v18  ;;  %v6493_v18 = vld [vmem:[%s13286_s5 + $0x1d0] sm:$0xf] }
 0x2c7   : > { %4890 = vmatpush.bf16.msrb.mxu3 %v7258_v51  ;;  %4870 = vmatpush.bf16.msrb.mxu1 %v6554_v52  ;;  %v9001_v24 = vld [vmem:[%s13286_s5 + $0xb8c] sm:$0xf]  ;;  %v7386_v33 = vor.u32 %v8913_v22, %v7383_v23 }
 0x2c8   : > { %v7735_v27 = vld [vmem:[%s13286_s5 + $0xba8] sm:$0xf0] }
 0x2c9   : > { %4883 = vmatpush.bf16.msrb.mxu2 %v6810_v57  ;;  %v9065_v28 = vld [vmem:[%s13286_s5 + $0xd8c] sm:$0xf]  ;;  %v7738_v38 = vor.u32 %v9001_v24, %v7735_v27 }
 0x2ca   : > { %v7991_v29 = vld [vmem:[%s13286_s5 + $0xda8] sm:$0xf0]  ;;  %4907 = vmatpush.bf16.msrb.mxu0 %v7386_v33 }
 0x2cb   : > { %4891 = vmatpush.bf16.msrb.mxu3 %v7226_v6  ;;  %4871 = vmatpush.bf16.msrb.mxu1 %v6522_v12  ;;  %v8857_v31 = vld [vmem:[%s13286_s5 + $0x70c] sm:$0xf]  ;;  %v7994_v39 = vor.u32 %v9065_v28, %v7991_v29  ;;  %v4652_v3 = vpop.f32.mrf.mxu0  ;;  %v4665_v13 = vpop.f32.mrf.mxu1 }
 0x2cc   : > { %v7159_v32 = vld [vmem:[%s13286_s5 + $0x728] sm:$0xf0]  ;;  %v4653_v12 = vadd.f32 %v4652_v3, %v4524_v59  ;;  %v8678_v59 = vld [vmem:[%s13286_s5 + $0x16c] sm:$0xf0] }
 0x2cd   : > { %4884 = vmatpush.bf16.msrb.mxu2 %v6778_v17  ;;  %v8905_v40 = vld [vmem:[%s13286_s5 + $0x88c] sm:$0xf]  ;;  %v7162_v44 = vor.u32 %v8857_v31, %v7159_v32 }
 0x2ce   : > { %v7351_v41 = vld [vmem:[%s13286_s5 + $0x8a8] sm:$0xf0]  ;;  %4872 = vmatmul.bf16.vlgmr.msrb.gmra.mxu1 %v10229_v10  ;;  %v11322_v24 = vadd.f32 %v4665_v13, %v4653_v12  ;;  %v8758_v12 = vld [vmem:[%s13286_s5 + $0x3ec] sm:$0xf0] }
 0x2cf   : > { %4916 = vmatpush.bf16.msra.mxu1 %v7770_v20  ;;  %v8993_v42 = vld [vmem:[%s13286_s5 + $0xb4c] sm:$0xf]  ;;  %4892 = vmatpush.bf16.msrb.mxu3 %v7194_v26  ;;  %v7354_v51 = vor.u32 %v8905_v40, %v7351_v41  ;;  %v4627_v20 = vadd.f32 %v4626_v9, %v11223_v25  ;;  %v4639_v41 = vpop.f32.mrf.mxu3  ;;  %v6749_v9 = vld [vmem:[%s13286_s5 + $0x3d0] sm:$0xf] }
 0x2d0   : > { %v7703_v45 = vld [vmem:[%s13286_s5 + $0xb68] sm:$0xf0]  ;;  %4885 = vmatmul.bf16.vlgmr.msrb.gmra.mxu2 %v10237_v14  ;;  %v7005_v13 = vld [vmem:[%s13286_s5 + $0x5d0] sm:$0xf] }
 0x2d1   : > { %4929 = vmatpush.bf16.msra.mxu2 %v8026_v21  ;;  %v9057_v47 = vld [vmem:[%s13286_s5 + $0xd4c] sm:$0xf]  ;;  %v7706_v30 = vor.u32 %v8993_v42, %v7703_v45  ;;  %4908 = vmatpush.bf16.msrb.mxu0 %v7354_v51  ;;  %v8694_v21 = vld [vmem:[%s13286_s5 + $0x1ec] sm:$0xf0] }
 0x2d2   : > { %v7959_v48 = vld [vmem:[%s13286_s5 + $0xd68] sm:$0xf0]  ;;  %v6494_v31 = vor.u32 %v8694_v21, %v6493_v18 }
 0x2d3   : > { %v8849_v49 = vld [vmem:[%s13286_s5 + $0x6cc] sm:$0xf]  ;;  %4917 = vmatpush.bf16.msra.mxu1 %v7738_v38  ;;  %v7962_v53 = vor.u32 %v9057_v47, %v7959_v48  ;;  %4893 = vmatpush.bf16.msrb.mxu3 %v7162_v44  ;;  %v8686_v38 = vld [vmem:[%s13286_s5 + $0x1ac] sm:$0xf0]  ;;  %v11354_v44 = vadd.f32 %v4639_v41, %v4627_v20  ;;  %v4654_v45 = vpop.f32.mrf.mxu0  ;;  %v4667_v51 = vpop.f32.mrf.mxu1 }
 0x2d4   : > { %v7127_v50 = vld [vmem:[%s13286_s5 + $0x6e8] sm:$0xf0]  ;;  %v8806_v51 = vld [vmem:[%s13286_s5 + $0x56c] sm:$0xf0] }
 0x2d5   : > { %v8897_v52 = vld [vmem:[%s13286_s5 + $0x84c] sm:$0xf]  ;;  %4930 = vmatpush.bf16.msra.mxu2 %v7994_v39  ;;  %v7130_v58 = vor.u32 %v8849_v49, %v7127_v50  ;;  %v4628_v50 = vpop.f32.mrf.mxu2 }
 0x2d6   : > { %v7319_v54 = vld [vmem:[%s13286_s5 + $0x868] sm:$0xf0]  ;;  %v6941_v50 = vld [vmem:[%s13286_s5 + $0x550] sm:$0xf] }
 0x2d7   : > { %v8985_v55 = vld [vmem:[%s13286_s5 + $0xb0c] sm:$0xf]  ;;  %v7322_v0 = vor.u32 %v8897_v52, %v7319_v54  ;;  %4918 = vmatpush.bf16.msra.mxu1 %v7706_v30  ;;  %4894 = vmatpush.bf16.msrb.mxu3 %v7130_v58  ;;  %v6462_v52 = vor.u32 %v8686_v38, %v6461_v37  ;;  %v6429_v58 = vld [vmem:[%s13286_s5 + $0x150] sm:$0xf] }
 0x2d8   : > { %v7671_v57 = vld [vmem:[%s13286_s5 + $0xb28] sm:$0xf0]  ;;  %v8814_v38 = vld [vmem:[%s13286_s5 + $0x5ac] sm:$0xf0] }
 0x2d9   : > { %v9049_v60 = vld [vmem:[%s13286_s5 + $0xd0c] sm:$0xf]  ;;  %4931 = vmatpush.bf16.msra.mxu2 %v7962_v53  ;;  %v7674_v4 = vor.u32 %v8985_v55, %v7671_v57  ;;  %4909 = vmatpush.bf16.msrb.mxu0 %v7322_v0 }
 0x2da   : > { %v7927_v61 = vld [vmem:[%s13286_s5 + $0xd28] sm:$0xf0] }
 0x2db   : > { %v8841_v62 = vld [vmem:[%s13286_s5 + $0x68c] sm:$0xf]  ;;  %v7930_v46 = vor.u32 %v9049_v60, %v7927_v61  ;;  %4919 = vmatpush.bf16.msra.mxu1 %v7674_v4  ;;  %v6430_v4 = vor.u32 %v8678_v59, %v6429_v58  ;;  %v8646_v58 = vld [vmem:[%s13286_s5 + $0x6c] sm:$0xf0] }
 0x2dc   : > { %v7095_v63 = vld [vmem:[%s13286_s5 + $0x6a8] sm:$0xf0] }
 0x2dd   : > { %v8889_v2 = vld [vmem:[%s13286_s5 + $0x80c] sm:$0xf]  ;;  %v7098_v15 = vor.u32 %v8841_v62, %v7095_v63  ;;  %4932 = vmatpush.bf16.msra.mxu2 %v7930_v46 }
 0x2de   : > { %v7287_v6 = vld [vmem:[%s13286_s5 + $0x828] sm:$0xf0] }
 0x2df   : > { %v8977_v7 = vld [vmem:[%s13286_s5 + $0xacc] sm:$0xf]  ;;  %v7290_v26 = vor.u32 %v8889_v2, %v7287_v6  ;;  %4895 = vmatpush.bf16.msrb.mxu3 %v7098_v15  ;;  %v6397_v6 = vld [vmem:[%s13286_s5 + $0x110] sm:$0xf]  ;;  %v4641_v15 = vpop.f32.mrf.mxu3 }
 0x2e0   : > { %v7639_v8 = vld [vmem:[%s13286_s5 + $0xae8] sm:$0xf0] }
 0x2e1   : > { %v9041_v16 = vld [vmem:[%s13286_s5 + $0xccc] sm:$0xf]  ;;  %v7642_v27 = vor.u32 %v8977_v7, %v7639_v8  ;;  %4910 = vmatpush.bf16.msrb.mxu0 %v7290_v26  ;;  %v8670_v7 = vld [vmem:[%s13286_s5 + $0x12c] sm:$0xf0]  ;;  %v6750_v26 = vor.u32 %v8758_v12, %v6749_v9  ;;  %v4717_v12 = vpop.f32.mrf.mxu1 }
 0x2e2   : > { %v7895_v17 = vld [vmem:[%s13286_s5 + $0xce8] sm:$0xf0] }
 0x2e3   : > { %v8833_v22 = vld [vmem:[%s13286_s5 + $0x64c] sm:$0xf]  ;;  %v7898_v25 = vor.u32 %v9041_v16, %v7895_v17  ;;  %4920 = vmatpush.bf16.msra.mxu1 %v7642_v27  ;;  %v8822_v16 = vld [vmem:[%s13286_s5 + $0x5ec] sm:$0xf0] }
 0x2e4   : > { %v7063_v23 = vld [vmem:[%s13286_s5 + $0x668] sm:$0xf0]  ;;  %4911 = vmatmul.bf16.vlgmr.msrb.gmra.mxu0 %v10319_v5  ;;  %v6365_v27 = vld [vmem:[%s13286_s5 + $0xd0] sm:$0xf] }
 0x2e5   : > { %v8969_v28 = vld [vmem:[%s13286_s5 + $0xa8c] sm:$0xf]  ;;  %v7066_v32 = vor.u32 %v8833_v22, %v7063_v23  ;;  %4933 = vmatpush.bf16.msra.mxu2 %v7898_v25  ;;  %4955 = vmatpush.bf16.msra.mxu0 %v6494_v31  ;;  %v11418_v22 = vpop.f32.mrf.mxu0  ;;  %v6398_v23 = vor.u32 %v8670_v7, %v6397_v6  ;;  %v8662_v25 = vld [vmem:[%s13286_s5 + $0xec] sm:$0xf0] }
 0x2e6   : > { %v7607_v29 = vld [vmem:[%s13286_s5 + $0xaa8] sm:$0xf0]  ;;  %v6366_v41 = vor.u32 %v8662_v25, %v6365_v27  ;;  %v6269_v7 = vld [vmem:[%s13286_s5 + $0x10] sm:$0xf] }
 0x2e7   : > { %v9033_v33 = vld [vmem:[%s13286_s5 + $0xc8c] sm:$0xf]  ;;  %v7610_v47 = vor.u32 %v8969_v28, %v7607_v29  ;;  %4896 = vmatpush.bf16.msrb.mxu3 %v7066_v32  ;;  %v4678_v28 = vpop.f32.mrf.mxu2  ;;  %v7006_v29 = vor.u32 %v8822_v16, %v7005_v13  ;;  %v6717_v32 = vld [vmem:[%s13286_s5 + $0x390] sm:$0xf]  ;;  %v4691_v9 = vpop.f32.mrf.mxu3 }
 0x2e8   : > { %v7863_v34 = vld [vmem:[%s13286_s5 + $0xca8] sm:$0xf0]  ;;  %v4679_v37 = vadd.f32 %v4678_v28, %v11322_v24  ;;  %v6333_v24 = vld [vmem:[%s13286_s5 + $0x90] sm:$0xf] }
 0x2e9   : > { %v8825_v39 = vld [vmem:[%s13286_s5 + $0x60c] sm:$0xf]  ;;  %v7866_v48 = vor.u32 %v9033_v33, %v7863_v34  ;;  %4921 = vmatpush.bf16.msra.mxu1 %v7610_v47  ;;  %4956 = vmatpush.bf16.msra.mxu0 %v6462_v52  ;;  %v8750_v33 = vld [vmem:[%s13286_s5 + $0x3ac] sm:$0xf0] }
 0x2ea   : > { %v7031_v40 = vld [vmem:[%s13286_s5 + $0x628] sm:$0xf0]  ;;  %v6973_v34 = vld [vmem:[%s13286_s5 + $0x590] sm:$0xf] }
 0x2eb   : > { %v9137_v42 = vld [vmem:[%s13286_s5 + $0xfcc] sm:$0xf]  ;;  %v7034_v30 = vor.u32 %v8825_v39, %v7031_v40  ;;  %4934 = vmatpush.bf16.msra.mxu2 %v7866_v48  ;;  %v6974_v45 = vor.u32 %v8814_v38, %v6973_v34  ;;  %v6685_v48 = vld [vmem:[%s13286_s5 + $0x350] sm:$0xf] }
 0x2ec   : > { %v8279_v43 = vld [vmem:[%s13286_s5 + $0xfe8] sm:$0xf0]  ;;  %v6621_v16 = vld [vmem:[%s13286_s5 + $0x2d0] sm:$0xf] }
 0x2ed   : > { %v8961_v49 = vld [vmem:[%s13286_s5 + $0xa4c] sm:$0xf]  ;;  %v8282_v57 = vor.u32 %v9137_v42, %v8279_v43  ;;  %4897 = vmatpush.bf16.msrb.mxu3 %v7034_v30  ;;  %4957 = vmatpush.bf16.msra.mxu0 %v6430_v4  ;;  %v6718_v42 = vor.u32 %v8750_v33, %v6717_v32  ;;  %v8654_v43 = vld [vmem:[%s13286_s5 + $0xac] sm:$0xf0] }
 0x2ee   : > { %v7575_v53 = vld [vmem:[%s13286_s5 + $0xa68] sm:$0xf0]  ;;  %v6589_v34 = vld [vmem:[%s13286_s5 + $0x290] sm:$0xf] }
 0x2ef   : > { %v9025_v54 = vld [vmem:[%s13286_s5 + $0xc4c] sm:$0xf]  ;;  %v7578_v62 = vor.u32 %v8961_v49, %v7575_v53  ;;  %v8742_v49 = vld [vmem:[%s13286_s5 + $0x36c] sm:$0xf0]  ;;  %v4706_v53 = vpop.f32.mrf.mxu0  ;;  %v4680_v59 = vpop.f32.mrf.mxu2 }
 0x2f0   : > { %v7831_v55 = vld [vmem:[%s13286_s5 + $0xc68] sm:$0xf0]  ;;  %4898 = vmatmul.bf16.vlgmr.msrb.gmra.mxu3 %v10286_v1  ;;  %v8774_v59 = vld [vmem:[%s13286_s5 + $0x46c] sm:$0xf0] }
 0x2f1   : > { %v9129_v60 = vld [vmem:[%s13286_s5 + $0xf8c] sm:$0xf]  ;;  %v7834_v63 = vor.u32 %v9025_v54, %v7831_v55  ;;  %4942 = vmatpush.bf16.msra.mxu3 %v8282_v57  ;;  %4922 = vmatpush.bf16.msra.mxu1 %v7578_v62  ;;  %v6334_v54 = vor.u32 %v8654_v43, %v6333_v24  ;;  %v6686_v55 = vor.u32 %v8742_v49, %v6685_v48  ;;  %v6301_v57 = vld [vmem:[%s13286_s5 + $0x50] sm:$0xf] }
 0x2f2   : > { %v8247_v61 = vld [vmem:[%s13286_s5 + $0xfa8] sm:$0xf0]  ;;  %4958 = vmatpush.bf16.msra.mxu0 %v6398_v23  ;;  %v6653_v62 = vld [vmem:[%s13286_s5 + $0x310] sm:$0xf] }
 0x2f3   : > { %v8953_v0 = vld [vmem:[%s13286_s5 + $0xa0c] sm:$0xf]  ;;  %v8250_v8 = vor.u32 %v9129_v60, %v8247_v61  ;;  %4935 = vmatpush.bf16.msra.mxu2 %v7834_v63  ;;  %v6942_v60 = vor.u32 %v8806_v51, %v6941_v50  ;;  %v8734_v63 = vld [vmem:[%s13286_s5 + $0x32c] sm:$0xf0]  ;;  %v4693_v51 = vpop.f32.mrf.mxu3 }
 0x2f4   : > { %v7543_v2 = vld [vmem:[%s13286_s5 + $0xa28] sm:$0xf0]  ;;  %v6654_v6 = vor.u32 %v8734_v63, %v6653_v62  ;;  %v7517_v23 = vld [vmem:[%s13286_s5 + $0x9d0] sm:$0xf] }
 0x2f5   : > { %v9017_v3 = vld [vmem:[%s13286_s5 + $0xc0c] sm:$0xf]  ;;  %v7546_v20 = vor.u32 %v8953_v0, %v7543_v2  ;;  %4943 = vmatpush.bf16.msra.mxu3 %v8250_v8  ;;  %v6909_v0 = vld [vmem:[%s13286_s5 + $0x510] sm:$0xf] }
 0x2f6   : > { %v7799_v46 = vld [vmem:[%s13286_s5 + $0xc28] sm:$0xf0]  ;;  %4959 = vmatpush.bf16.msra.mxu0 %v6366_v41  ;;  %v8798_v2 = vld [vmem:[%s13286_s5 + $0x52c] sm:$0xf0] }
 0x2f7   : > { %v9121_v17 = vld [vmem:[%s13286_s5 + $0xf4c] sm:$0xf]  ;;  %v7802_v21 = vor.u32 %v9017_v3, %v7799_v46  ;;  %4923 = vmatpush.bf16.msra.mxu1 %v7546_v20  ;;  %v6302_v46 = vor.u32 %v8646_v58, %v6301_v57  ;;  %v8638_v8 = vld [vmem:[%s13286_s5 + $0x2c] sm:$0xf0]  ;;  %v6910_v13 = vor.u32 %v8798_v2, %v6909_v0  ;;  %v4692_v20 = vadd.f32 %v4691_v9, %v4679_v37  ;;  %v4730_v24 = vpop.f32.mrf.mxu2 }
 0x2f8   : > { %v8215_v18 = vld [vmem:[%s13286_s5 + $0xf68] sm:$0xf0]  ;;  %v8718_v37 = vld [vmem:[%s13286_s5 + $0x2ac] sm:$0xf0] }
 0x2f9   : > { %v8218_v31 = vor.u32 %v9121_v17, %v8215_v18  ;;  %v9113_v39 = vld [vmem:[%s13286_s5 + $0xf0c] sm:$0xf]  ;;  %4936 = vmatpush.bf16.msra.mxu2 %v7802_v21  ;;  %v8726_v17 = vld [vmem:[%s13286_s5 + $0x2ec] sm:$0xf0]  ;;  %v4705_v28 = vadd.f32 %v11418_v22, %v4692_v20  ;;  %v6590_v48 = vor.u32 %v8718_v37, %v6589_v34 }
 0x2fa   : > { %v8183_v40 = vld [vmem:[%s13286_s5 + $0xf28] sm:$0xf0]  ;;  %4924 = vmatmul.bf16.vlgmr.msra.gmra.mxu1 %v10330_v11  ;;  %4960 = vmatpush.bf16.msra.mxu0 %v6334_v54  ;;  %v6877_v18 = vld [vmem:[%s13286_s5 + $0x4d0] sm:$0xf] }
 0x2fb   : > { %4968 = vmatpush.bf16.msrb.mxu1 %v6750_v26  ;;  %4944 = vmatpush.bf16.msra.mxu3 %v8218_v31  ;;  %v8186_v47 = vor.u32 %v9113_v39, %v8183_v40  ;;  %v9105_v52 = vld [vmem:[%s13286_s5 + $0xecc] sm:$0xf]  ;;  %v8790_v21 = vld [vmem:[%s13286_s5 + $0x4ec] sm:$0xf0]  ;;  %v6622_v31 = vor.u32 %v8726_v17, %v6621_v16  ;;  %v4718_v38 = vadd.f32 %v4717_v12, %v4705_v28  ;;  %v4756_v28 = vpop.f32.mrf.mxu0 }
 0x2fc   : > { %4937 = vmatmul.bf16.vlgmr.msra.gmra.mxu2 %v10402_v36  ;;  %v8151_v30 = vld [vmem:[%s13286_s5 + $0xee8] sm:$0xf0]  ;;  %v8950_v26 = vld [vmem:[%s13286_s5 + $0x9ec] sm:$0xf0]  ;;  %v6878_v32 = vor.u32 %v8790_v21, %v6877_v18 }
 0x2fd   : > { %4981 = vmatpush.bf16.msrb.mxu2 %v7006_v29  ;;  %v8154_v61 = vor.u32 %v9105_v52, %v8151_v30  ;;  %v9097_v3 = vld [vmem:[%s13286_s5 + $0xe8c] sm:$0xf]  ;;  %v6270_v29 = vor.u32 %v8638_v8, %v6269_v7  ;;  %v7518_v33 = vor.u32 %v8950_v26, %v7517_v23  ;;  %v6845_v22 = vld [vmem:[%s13286_s5 + $0x490] sm:$0xf]  ;;  %v4719_v52 = vpop.f32.mrf.mxu1 }
 0x2fe   : > { %v8119_v4 = vld [vmem:[%s13286_s5 + $0xea8] sm:$0xf0]  ;;  %4961 = vmatpush.bf16.msra.mxu0 %v6302_v46  ;;  %v8782_v40 = vld [vmem:[%s13286_s5 + $0x4ac] sm:$0xf0] }
 0x2ff   : > { %4969 = vmatpush.bf16.msrb.mxu1 %v6718_v42  ;;  %4945 = vmatpush.bf16.msra.mxu3 %v8186_v47  ;;  %v8122_v15 = vor.u32 %v9097_v3, %v8119_v4  ;;  %v9089_v27 = vld [vmem:[%s13286_s5 + $0xe4c] sm:$0xf]  ;;  %v7485_v41 = vld [vmem:[%s13286_s5 + $0x990] sm:$0xf]  ;;  %v11550_v47 = vadd.f32 %v4730_v24, %v4718_v38  ;;  %v6846_v30 = vor.u32 %v8782_v40, %v6845_v22 }
 0x300   : > { %v8087_v25 = vld [vmem:[%s13286_s5 + $0xe68] sm:$0xf0]  ;;  %v8942_v42 = vld [vmem:[%s13286_s5 + $0x9ac] sm:$0xf0] }
 0x301   : > { %4982 = vmatpush.bf16.msrb.mxu2 %v6974_v45  ;;  %v8090_v39 = vor.u32 %v9089_v27, %v8087_v25  ;;  %v9081_v43 = vld [vmem:[%s13286_s5 + $0xe0c] sm:$0xf]  ;;  %v7261_v49 = vld [vmem:[%s13286_s5 + $0x7d0] sm:$0xf]  ;;  %v7486_v53 = vor.u32 %v8942_v42, %v7485_v41 }
 0x302   : > { %v8055_v45 = vld [vmem:[%s13286_s5 + $0xe28] sm:$0xf0]  ;;  %4962 = vmatpush.bf16.msra.mxu0 %v6270_v29  ;;  %v8886_v50 = vld [vmem:[%s13286_s5 + $0x7ec] sm:$0xf0] }
 0x303   : > { %4970 = vmatpush.bf16.msrb.mxu1 %v6686_v55  ;;  %4946 = vmatpush.bf16.msra.mxu3 %v8154_v61  ;;  %v6557_v54 = vld [vmem:[%s13286_s5 + $0x250] sm:$0xf]  ;;  %v8058_v58 = vor.u32 %v9081_v43, %v8055_v45  ;;  %v7262_v62 = vor.u32 %v8886_v50, %v7261_v49 }
 0x304   : > { %v8710_v55 = vld [vmem:[%s13286_s5 + $0x26c] sm:$0xf0] }
 0x305   : > { %4983 = vmatpush.bf16.msrb.mxu2 %v6942_v60  ;;  %v6813_v57 = vld [vmem:[%s13286_s5 + $0x450] sm:$0xf]  ;;  %4963 = vmatmul.bf16.vlgmr.msra.gmra.mxu0 %v10202_v56  ;;  %v6558_v63 = vor.u32 %v8710_v55, %v6557_v54  ;;  %v4525_v55 = vperm.slane %v11045_v35, 2 }
 0x306   : > { %5007 = vmatpush.bf16.msrb.mxu0 %v7518_v33  ;;  %v7453_v60 = vld [vmem:[%s13286_s5 + $0x950] sm:$0xf]  ;;  %v6814_v4 = vor.u32 %v8774_v59, %v6813_v57 }
 0x307   : > { %4971 = vmatpush.bf16.msrb.mxu1 %v6654_v6  ;;  %4947 = vmatpush.bf16.msra.mxu3 %v8122_v15  ;;  %v8934_v61 = vld [vmem:[%s13286_s5 + $0x96c] sm:$0xf0]  ;;  %v4732_v15 = vpop.f32.mrf.mxu2 }
 0x308   : > { %v7229_v0 = vld [vmem:[%s13286_s5 + $0x790] sm:$0xf]  ;;  %v7454_v46 = vor.u32 %v8934_v61, %v7453_v60 }
 0x309   : > { %4984 = vmatpush.bf16.msrb.mxu2 %v6910_v13  ;;  %v8878_v2 = vld [vmem:[%s13286_s5 + $0x7ac] sm:$0xf0] }
 0x30a   : > { %v6525_v3 = vld [vmem:[%s13286_s5 + $0x210] sm:$0xf]  ;;  %5008 = vmatpush.bf16.msrb.mxu0 %v7486_v53  ;;  %v7230_v16 = vor.u32 %v8878_v2, %v7229_v0 }
 0x30b   : > { %4972 = vmatpush.bf16.msrb.mxu1 %v6622_v31  ;;  %4948 = vmatpush.bf16.msra.mxu3 %v8090_v39  ;;  %v8702_v6 = vld [vmem:[%s13286_s5 + $0x22c] sm:$0xf0] }
 0x30c   : > { %v6781_v7 = vld [vmem:[%s13286_s5 + $0x410] sm:$0xf]  ;;  %v6526_v21 = vor.u32 %v8702_v6, %v6525_v3  ;;  %v4757_v6 = vadd.f32 %v4756_v28, %v4525_v55  ;;  %v6495_v28 = vld [vmem:[%s13286_s5 + $0x1f0] sm:$0xf0] }
 0x30d   : > { %4985 = vmatpush.bf16.msrb.mxu2 %v6878_v32  ;;  %v8766_v8 = vld [vmem:[%s13286_s5 + $0x42c] sm:$0xf0] }
 0x30e   : > { %v7421_v9 = vld [vmem:[%s13286_s5 + $0x910] sm:$0xf]  ;;  %5009 = vmatpush.bf16.msrb.mxu0 %v7454_v46  ;;  %v6782_v27 = vor.u32 %v8766_v8, %v6781_v7 }
 0x30f   : > { %4973 = vmatpush.bf16.msrb.mxu1 %v6590_v48  ;;  %4949 = vmatpush.bf16.msra.mxu3 %v8058_v58  ;;  %v8926_v12 = vld [vmem:[%s13286_s5 + $0x92c] sm:$0xf0]  ;;  %v4758_v58 = vpop.f32.mrf.mxu0 }
 0x310   : > { %v7773_v13 = vld [vmem:[%s13286_s5 + $0xbd0] sm:$0xf]  ;;  %v7422_v25 = vor.u32 %v8926_v12, %v7421_v9  ;;  %v4769_v9 = vpop.f32.mrf.mxu1 }
 0x311   : > { %4986 = vmatpush.bf16.msrb.mxu2 %v6846_v30  ;;  %v9014_v17 = vld [vmem:[%s13286_s5 + $0xbec] sm:$0xf0] }
 0x312   : > { %v8029_v18 = vld [vmem:[%s13286_s5 + $0xdd0] sm:$0xf]  ;;  %4950 = vmatmul.bf16.vlgmr.msra.gmra.mxu3 %v10444_v19  ;;  %v7774_v29 = vor.u32 %v9014_v17, %v7773_v13  ;;  %5010 = vmatpush.bf16.msrb.mxu0 %v7422_v25 }
 0x313   : > { %4994 = vmatpush.bf16.msrb.mxu3 %v7262_v62  ;;  %v9078_v20 = vld [vmem:[%s13286_s5 + $0xdec] sm:$0xf0]  ;;  %4974 = vmatpush.bf16.msrb.mxu1 %v6558_v63 }
 0x314   : > { %v7197_v23 = vld [vmem:[%s13286_s5 + $0x750] sm:$0xf]  ;;  %v8030_v31 = vor.u32 %v9078_v20, %v8029_v18  ;;  %v4743_v18 = vpop.f32.mrf.mxu3  ;;  %v4770_v20 = vadd.f32 %v4769_v9, %v4757_v6  ;;  %v8666_v9 = vld [vmem:[%s13286_s5 + $0x114] sm:$0xf] }
 0x315   : > { %v8870_v26 = vld [vmem:[%s13286_s5 + $0x76c] sm:$0xf0]  ;;  %4987 = vmatpush.bf16.msrb.mxu2 %v6814_v4  ;;  %v11717_v25 = vadd.f32 %v4743_v18, %v11550_v47 }
 0x316   : > { %v7389_v32 = vld [vmem:[%s13286_s5 + $0x8d0] sm:$0xf]  ;;  %v7198_v37 = vor.u32 %v8870_v26, %v7197_v23 }
 0x317   : > { %v8918_v33 = vld [vmem:[%s13286_s5 + $0x8ec] sm:$0xf0]  ;;  %4995 = vmatpush.bf16.msrb.mxu3 %v7230_v16  ;;  %4975 = vmatpush.bf16.msrb.mxu1 %v6526_v21 }
 0x318   : > { %v7741_v34 = vld [vmem:[%s13286_s5 + $0xb90] sm:$0xf]  ;;  %v7390_v42 = vor.u32 %v8918_v33, %v7389_v32 }
 0x319   : > { %v9006_v22 = vld [vmem:[%s13286_s5 + $0xbac] sm:$0xf0]  ;;  %4988 = vmatpush.bf16.msrb.mxu2 %v6782_v27  ;;  %v8690_v27 = vld [vmem:[%s13286_s5 + $0x1d4] sm:$0xf] }
 0x31a   : > { %v7997_v38 = vld [vmem:[%s13286_s5 + $0xd90] sm:$0xf]  ;;  %v7742_v24 = vor.u32 %v9006_v22, %v7741_v34  ;;  %4976 = vmatmul.bf16.vlgmr.msrb.gmra.mxu1 %v10229_v10  ;;  %5011 = vmatpush.bf16.msrb.mxu0 %v7390_v42  ;;  %v6498_v22 = vor.u32 %v8690_v27, %v6495_v28  ;;  %v6463_v42 = vld [vmem:[%s13286_s5 + $0x1b0] sm:$0xf0]  ;;  %v11822_v28 = vpop.f32.mrf.mxu0 }
 0x31b   : > { %v9070_v39 = vld [vmem:[%s13286_s5 + $0xdac] sm:$0xf0]  ;;  %5020 = vmatpush.bf16.msra.mxu1 %v7774_v29  ;;  %4996 = vmatpush.bf16.msrb.mxu3 %v7198_v37 }
 0x31c   : > { %v7165_v40 = vld [vmem:[%s13286_s5 + $0x710] sm:$0xf]  ;;  %v7998_v43 = vor.u32 %v9070_v39, %v7997_v38  ;;  %4989 = vmatmul.bf16.vlgmr.msrb.gmra.mxu2 %v10237_v14 }
 0x31d   : > { %v8862_v41 = vld [vmem:[%s13286_s5 + $0x72c] sm:$0xf0]  ;;  %5033 = vmatpush.bf16.msra.mxu2 %v8030_v31 }
 0x31e   : > { %v7357_v45 = vld [vmem:[%s13286_s5 + $0x890] sm:$0xf]  ;;  %v7166_v50 = vor.u32 %v8862_v41, %v7165_v40  ;;  %v8682_v41 = vld [vmem:[%s13286_s5 + $0x194] sm:$0xf] }
 0x31f   : > { %v8910_v48 = vld [vmem:[%s13286_s5 + $0x8ac] sm:$0xf0]  ;;  %5021 = vmatpush.bf16.msra.mxu1 %v7742_v24  ;;  %v6466_v55 = vor.u32 %v8682_v41, %v6463_v42 }
 0x320   : > { %v7709_v49 = vld [vmem:[%s13286_s5 + $0xb50] sm:$0xf]  ;;  %v7358_v57 = vor.u32 %v8910_v48, %v7357_v45  ;;  %4997 = vmatpush.bf16.msrb.mxu3 %v7166_v50  ;;  %v4782_v45 = vpop.f32.mrf.mxu2 }
 0x321   : > { %v8998_v51 = vld [vmem:[%s13286_s5 + $0xb6c] sm:$0xf0]  ;;  %5034 = vmatpush.bf16.msra.mxu2 %v7998_v43  ;;  %v11758_v50 = vadd.f32 %v4782_v45, %v4770_v20  ;;  %v7007_v20 = vld [vmem:[%s13286_s5 + $0x5f0] sm:$0xf0] }
 0x322   : > { %v7965_v52 = vld [vmem:[%s13286_s5 + $0xd50] sm:$0xf]  ;;  %v7710_v59 = vor.u32 %v8998_v51, %v7709_v49  ;;  %5012 = vmatpush.bf16.msrb.mxu0 %v7358_v57  ;;  %v4771_v51 = vpop.f32.mrf.mxu1  ;;  %v6335_v45 = vld [vmem:[%s13286_s5 + $0xb0] sm:$0xf0] }
 0x323   : > { %v9062_v30 = vld [vmem:[%s13286_s5 + $0xd6c] sm:$0xf0]  ;;  %v8738_v51 = vld [vmem:[%s13286_s5 + $0x354] sm:$0xf] }
 0x324   : > { %v7133_v53 = vld [vmem:[%s13286_s5 + $0x6d0] sm:$0xf]  ;;  %v7966_v60 = vor.u32 %v9062_v30, %v7965_v52  ;;  %5022 = vmatpush.bf16.msra.mxu1 %v7710_v59 }
 0x325   : > { %v8854_v54 = vld [vmem:[%s13286_s5 + $0x6ec] sm:$0xf0] }
 0x326   : > { %v7325_v61 = vld [vmem:[%s13286_s5 + $0x850] sm:$0xf]  ;;  %v7134_v35 = vor.u32 %v8854_v54, %v7133_v53  ;;  %5035 = vmatpush.bf16.msra.mxu2 %v7966_v60  ;;  %v4745_v54 = vpop.f32.mrf.mxu3 }
 0x327   : > { %v8902_v62 = vld [vmem:[%s13286_s5 + $0x86c] sm:$0xf0] }
 0x328   : > { %v7677_v63 = vld [vmem:[%s13286_s5 + $0xb10] sm:$0xf]  ;;  %v7326_v7 = vor.u32 %v8902_v62, %v7325_v61  ;;  %4998 = vmatpush.bf16.msrb.mxu3 %v7134_v35  ;;  %v8674_v62 = vld [vmem:[%s13286_s5 + $0x154] sm:$0xf]  ;;  %v4784_v18 = vpop.f32.mrf.mxu2 }
 0x329   : > { %v8990_v0 = vld [vmem:[%s13286_s5 + $0xb2c] sm:$0xf0]  ;;  %v6623_v18 = vld [vmem:[%s13286_s5 + $0x2f0] sm:$0xf0] }
 0x32a   : > { %v7933_v2 = vld [vmem:[%s13286_s5 + $0xd10] sm:$0xf]  ;;  %v7678_v12 = vor.u32 %v8990_v0, %v7677_v63  ;;  %5013 = vmatpush.bf16.msrb.mxu0 %v7326_v7  ;;  %v6431_v63 = vld [vmem:[%s13286_s5 + $0x170] sm:$0xf0] }
 0x32b   : > { %v9054_v3 = vld [vmem:[%s13286_s5 + $0xd2c] sm:$0xf0]  ;;  %v6434_v7 = vor.u32 %v8674_v62, %v6431_v63 }
 0x32c   : > { %v7101_v4 = vld [vmem:[%s13286_s5 + $0x690] sm:$0xf]  ;;  %v7934_v13 = vor.u32 %v9054_v3, %v7933_v2  ;;  %5023 = vmatpush.bf16.msra.mxu1 %v7678_v12  ;;  %v6399_v12 = vld [vmem:[%s13286_s5 + $0x130] sm:$0xf0] }
 0x32d   : > { %v8846_v46 = vld [vmem:[%s13286_s5 + $0x6ac] sm:$0xf0] }
 0x32e   : > { %v7293_v8 = vld [vmem:[%s13286_s5 + $0x810] sm:$0xf]  ;;  %v7102_v21 = vor.u32 %v8846_v46, %v7101_v4  ;;  %5036 = vmatpush.bf16.msra.mxu2 %v7934_v13 }
 0x32f   : > { %v8894_v15 = vld [vmem:[%s13286_s5 + $0x82c] sm:$0xf0] }
 0x330   : > { %v7645_v16 = vld [vmem:[%s13286_s5 + $0xad0] sm:$0xf]  ;;  %v7294_v32 = vor.u32 %v8894_v15, %v7293_v8  ;;  %4999 = vmatpush.bf16.msrb.mxu3 %v7102_v21  ;;  %v8754_v15 = vld [vmem:[%s13286_s5 + $0x3d4] sm:$0xf] }
 0x331   : > { %v8982_v17 = vld [vmem:[%s13286_s5 + $0xaec] sm:$0xf0] }
 0x332   : > { %v7901_v23 = vld [vmem:[%s13286_s5 + $0xcd0] sm:$0xf]  ;;  %v7646_v33 = vor.u32 %v8982_v17, %v7645_v16  ;;  %5014 = vmatpush.bf16.msrb.mxu0 %v7294_v32  ;;  %v6751_v16 = vld [vmem:[%s13286_s5 + $0x3f0] sm:$0xf0] }
 0x333   : > { %v9046_v26 = vld [vmem:[%s13286_s5 + $0xcec] sm:$0xf0]  ;;  %v8818_v17 = vld [vmem:[%s13286_s5 + $0x5d4] sm:$0xf] }
 0x334   : > { %v7069_v29 = vld [vmem:[%s13286_s5 + $0x650] sm:$0xf]  ;;  %v7902_v34 = vor.u32 %v9046_v26, %v7901_v23  ;;  %5024 = vmatpush.bf16.msra.mxu1 %v7646_v33  ;;  %v8658_v32 = vld [vmem:[%s13286_s5 + $0xd4] sm:$0xf] }
 0x335   : > { %v8838_v31 = vld [vmem:[%s13286_s5 + $0x66c] sm:$0xf0]  ;;  %5015 = vmatmul.bf16.vlgmr.msrb.gmra.mxu0 %v10319_v5  ;;  %v6367_v33 = vld [vmem:[%s13286_s5 + $0xf0] sm:$0xf0] }
 0x336   : > { %v7613_v47 = vld [vmem:[%s13286_s5 + $0xa90] sm:$0xf]  ;;  %v7070_v38 = vor.u32 %v8838_v31, %v7069_v29  ;;  %5037 = vmatpush.bf16.msra.mxu2 %v7902_v34  ;;  %5059 = vmatpush.bf16.msra.mxu0 %v6498_v22  ;;  %v6402_v29 = vor.u32 %v8666_v9, %v6399_v12  ;;  %v6754_v31 = vor.u32 %v8754_v15, %v6751_v16  ;;  %v6719_v22 = vld [vmem:[%s13286_s5 + $0x3b0] sm:$0xf0]  ;;  %v4795_v12 = vpop.f32.mrf.mxu3 }
 0x337   : > { %v8974_v37 = vld [vmem:[%s13286_s5 + $0xaac] sm:$0xf0]  ;;  %v7010_v34 = vor.u32 %v8818_v17, %v7007_v20  ;;  %v6370_v42 = vor.u32 %v8658_v32, %v6367_v33  ;;  %v6271_v9 = vld [vmem:[%s13286_s5 + $0x30] sm:$0xf0] }
 0x338   : > { %v7869_v39 = vld [vmem:[%s13286_s5 + $0xc90] sm:$0xf]  ;;  %v7614_v52 = vor.u32 %v8974_v37, %v7613_v47  ;;  %5000 = vmatpush.bf16.msrb.mxu3 %v7070_v38  ;;  %v8746_v37 = vld [vmem:[%s13286_s5 + $0x394] sm:$0xf] }
 0x339   : > { %v9038_v40 = vld [vmem:[%s13286_s5 + $0xcac] sm:$0xf0]  ;;  %v8810_v38 = vld [vmem:[%s13286_s5 + $0x594] sm:$0xf] }
 0x33a   : > { %v7037_v24 = vld [vmem:[%s13286_s5 + $0x610] sm:$0xf]  ;;  %v7870_v30 = vor.u32 %v9038_v40, %v7869_v39  ;;  %5025 = vmatpush.bf16.msra.mxu1 %v7614_v52  ;;  %5060 = vmatpush.bf16.msra.mxu0 %v6466_v55  ;;  %v6975_v39 = vld [vmem:[%s13286_s5 + $0x5b0] sm:$0xf0] }
 0x33b   : > { %v8830_v43 = vld [vmem:[%s13286_s5 + $0x62c] sm:$0xf0]  ;;  %v6687_v52 = vld [vmem:[%s13286_s5 + $0x370] sm:$0xf0] }
 0x33c   : > { %v8285_v48 = vld [vmem:[%s13286_s5 + $0xfd0] sm:$0xf]  ;;  %v7038_v57 = vor.u32 %v8830_v43, %v7037_v24  ;;  %5038 = vmatpush.bf16.msra.mxu2 %v7870_v30  ;;  %v6722_v24 = vor.u32 %v8746_v37, %v6719_v22  ;;  %v8650_v43 = vld [vmem:[%s13286_s5 + $0x94] sm:$0xf] }
 0x33d   : > { %v9142_v49 = vld [vmem:[%s13286_s5 + $0xfec] sm:$0xf0]  ;;  %v8802_v30 = vld [vmem:[%s13286_s5 + $0x554] sm:$0xf] }
 0x33e   : > { %v7581_v53 = vld [vmem:[%s13286_s5 + $0xa50] sm:$0xf]  ;;  %v8286_v61 = vor.u32 %v9142_v49, %v8285_v48  ;;  %5001 = vmatpush.bf16.msrb.mxu3 %v7038_v57  ;;  %5061 = vmatpush.bf16.msra.mxu0 %v6434_v7  ;;  %v6978_v48 = vor.u32 %v8810_v38, %v6975_v39  ;;  %v4810_v57 = vpop.f32.mrf.mxu0  ;;  %v8722_v17 = vld [vmem:[%s13286_s5 + $0x2d4] sm:$0xf] }
 0x33f   : > { %v8966_v58 = vld [vmem:[%s13286_s5 + $0xa6c] sm:$0xf0]  ;;  %v8786_v20 = vld [vmem:[%s13286_s5 + $0x4d4] sm:$0xf]  ;;  %v6626_v33 = vor.u32 %v8722_v17, %v6623_v18 }
 0x340   : > { %v7837_v59 = vld [vmem:[%s13286_s5 + $0xc50] sm:$0xf]  ;;  %v7582_v2 = vor.u32 %v8966_v58, %v7581_v53  ;;  %v6943_v53 = vld [vmem:[%s13286_s5 + $0x570] sm:$0xf0]  ;;  %v6338_v58 = vor.u32 %v8650_v43, %v6335_v45 }
 0x341   : > { %v9030_v60 = vld [vmem:[%s13286_s5 + $0xc6c] sm:$0xf0]  ;;  %5002 = vmatmul.bf16.vlgmr.msrb.gmra.mxu3 %v10286_v1  ;;  %v6946_v62 = vor.u32 %v8802_v30, %v6943_v53  ;;  %v8714_v37 = vld [vmem:[%s13286_s5 + $0x294] sm:$0xf]  ;;  %v4797_v30 = vpop.f32.mrf.mxu3 }
 0x342   : > { %v8253_v35 = vld [vmem:[%s13286_s5 + $0xf90] sm:$0xf]  ;;  %v7838_v3 = vor.u32 %v9030_v60, %v7837_v59  ;;  %5046 = vmatpush.bf16.msra.mxu3 %v8286_v61  ;;  %5026 = vmatpush.bf16.msra.mxu1 %v7582_v2  ;;  %v6690_v59 = vor.u32 %v8738_v51, %v6687_v52  ;;  %v8642_v60 = vld [vmem:[%s13286_s5 + $0x54] sm:$0xf] }
 0x343   : > { %v9134_v0 = vld [vmem:[%s13286_s5 + $0xfac] sm:$0xf0]  ;;  %5062 = vmatpush.bf16.msra.mxu0 %v6402_v29  ;;  %v6303_v61 = vld [vmem:[%s13286_s5 + $0x70] sm:$0xf0] }
 0x344   : > { %v7549_v4 = vld [vmem:[%s13286_s5 + $0xa10] sm:$0xf]  ;;  %v8254_v13 = vor.u32 %v9134_v0, %v8253_v35  ;;  %5039 = vmatpush.bf16.msra.mxu2 %v7838_v3  ;;  %v8730_v35 = vld [vmem:[%s13286_s5 + $0x314] sm:$0xf] }
 0x345   : > { %v8958_v46 = vld [vmem:[%s13286_s5 + $0xa2c] sm:$0xf0]  ;;  %v6655_v0 = vld [vmem:[%s13286_s5 + $0x330] sm:$0xf0] }
 0x346   : > { %v7805_v6 = vld [vmem:[%s13286_s5 + $0xc10] sm:$0xf]  ;;  %v7550_v26 = vor.u32 %v8958_v46, %v7549_v4  ;;  %5047 = vmatpush.bf16.msra.mxu3 %v8254_v13  ;;  %v8794_v2 = vld [vmem:[%s13286_s5 + $0x514] sm:$0xf]  ;;  %v6658_v7 = vor.u32 %v8730_v35, %v6655_v0  ;;  %v4821_v13 = vpop.f32.mrf.mxu1 }
 0x347   : > { %v9022_v8 = vld [vmem:[%s13286_s5 + $0xc2c] sm:$0xf0]  ;;  %5063 = vmatpush.bf16.msra.mxu0 %v6370_v42  ;;  %v6911_v3 = vld [vmem:[%s13286_s5 + $0x530] sm:$0xf0] }
 0x348   : > { %v8221_v21 = vld [vmem:[%s13286_s5 + $0xf50] sm:$0xf]  ;;  %v7806_v27 = vor.u32 %v9022_v8, %v7805_v6  ;;  %5027 = vmatpush.bf16.msra.mxu1 %v7550_v26  ;;  %v6306_v6 = vor.u32 %v8642_v60, %v6303_v61  ;;  %v8634_v8 = vld [vmem:[%s13286_s5 + $0x14] sm:$0xf]  ;;  %v6914_v15 = vor.u32 %v8794_v2, %v6911_v3 }
 0x349   : > { %v9126_v23 = vld [vmem:[%s13286_s5 + $0xf6c] sm:$0xf0]  ;;  %v8946_v26 = vld [vmem:[%s13286_s5 + $0x9d4] sm:$0xf]  ;;  %v6274_v32 = vor.u32 %v8634_v8, %v6271_v9 }
 0x34a   : > { %v8222_v47 = vor.u32 %v9126_v23, %v8221_v21  ;;  %v8189_v40 = vld [vmem:[%s13286_s5 + $0xf10] sm:$0xf]  ;;  %5040 = vmatpush.bf16.msra.mxu2 %v7806_v27  ;;  %v4796_v21 = vadd.f32 %v4795_v12, %v11758_v50  ;;  %v6879_v23 = vld [vmem:[%s13286_s5 + $0x4f0] sm:$0xf0] }
 0x34b   : > { %v9118_v41 = vld [vmem:[%s13286_s5 + $0xf2c] sm:$0xf0]  ;;  %5028 = vmatmul.bf16.vlgmr.msra.gmra.mxu1 %v10330_v11  ;;  %5064 = vmatpush.bf16.msra.mxu0 %v6338_v58  ;;  %v7519_v27 = vld [vmem:[%s13286_s5 + $0x9f0] sm:$0xf0] }
 0x34c   : > { %5072 = vmatpush.bf16.msrb.mxu1 %v6754_v31  ;;  %5048 = vmatpush.bf16.msra.mxu3 %v8222_v47  ;;  %v8190_v49 = vor.u32 %v9118_v41, %v8189_v40  ;;  %v8157_v54 = vld [vmem:[%s13286_s5 + $0xed0] sm:$0xf]  ;;  %v4809_v31 = vadd.f32 %v11822_v28, %v4796_v21  ;;  %v7522_v47 = vor.u32 %v8946_v26, %v7519_v27  ;;  %v6591_v22 = vld [vmem:[%s13286_s5 + $0x2b0] sm:$0xf0] }
 0x34d   : > { %5041 = vmatmul.bf16.vlgmr.msra.gmra.mxu2 %v10402_v36  ;;  %v9110_v55 = vld [vmem:[%s13286_s5 + $0xeec] sm:$0xf0]  ;;  %v8778_v28 = vld [vmem:[%s13286_s5 + $0x494] sm:$0xf] }
 0x34e   : > { %5085 = vmatpush.bf16.msrb.mxu2 %v7010_v34  ;;  %v8158_v63 = vor.u32 %v9110_v55, %v8157_v54  ;;  %v8125_v4 = vld [vmem:[%s13286_s5 + $0xe90] sm:$0xf]  ;;  %v6882_v34 = vor.u32 %v8786_v20, %v6879_v23  ;;  %v4822_v38 = vadd.f32 %v4821_v13, %v4809_v31  ;;  %v6847_v40 = vld [vmem:[%s13286_s5 + $0x4b0] sm:$0xf0]  ;;  %v4823_v53 = vpop.f32.mrf.mxu1  ;;  %v4860_v31 = vpop.f32.mrf.mxu0 }
 0x34f   : > { %v9102_v46 = vld [vmem:[%s13286_s5 + $0xeac] sm:$0xf0]  ;;  %5065 = vmatpush.bf16.msra.mxu0 %v6306_v6  ;;  %v8938_v41 = vld [vmem:[%s13286_s5 + $0x994] sm:$0xf]  ;;  %v6850_v54 = vor.u32 %v8778_v28, %v6847_v40 }
 0x350   : > { %5073 = vmatpush.bf16.msrb.mxu1 %v6722_v24  ;;  %5049 = vmatpush.bf16.msra.mxu3 %v8190_v49  ;;  %v8126_v16 = vor.u32 %v9102_v46, %v8125_v4  ;;  %v8093_v29 = vld [vmem:[%s13286_s5 + $0xe50] sm:$0xf]  ;;  %v7487_v42 = vld [vmem:[%s13286_s5 + $0x9b0] sm:$0xf0]  ;;  %v4834_v24 = vpop.f32.mrf.mxu2  ;;  %v6594_v49 = vor.u32 %v8714_v37, %v6591_v22 }
 0x351   : > { %v9094_v50 = vld [vmem:[%s13286_s5 + $0xe6c] sm:$0xf0]  ;;  %v8882_v51 = vld [vmem:[%s13286_s5 + $0x7d4] sm:$0xf]  ;;  %v7490_v55 = vor.u32 %v8938_v41, %v7487_v42 }
 0x352   : > { %5086 = vmatpush.bf16.msrb.mxu2 %v6978_v48  ;;  %v8094_v39 = vor.u32 %v9094_v50, %v8093_v29  ;;  %v8061_v43 = vld [vmem:[%s13286_s5 + $0xe10] sm:$0xf]  ;;  %v11954_v48 = vadd.f32 %v4834_v24, %v4822_v38  ;;  %v7263_v52 = vld [vmem:[%s13286_s5 + $0x7f0] sm:$0xf0] }
 0x353   : > { %v9086_v45 = vld [vmem:[%s13286_s5 + $0xe2c] sm:$0xf0]  ;;  %5066 = vmatpush.bf16.msra.mxu0 %v6274_v32  ;;  %v8706_v57 = vld [vmem:[%s13286_s5 + $0x254] sm:$0xf]  ;;  %v7266_v35 = vor.u32 %v8882_v51, %v7263_v52 }
 0x354   : > { %5074 = vmatpush.bf16.msrb.mxu1 %v6690_v59  ;;  %5050 = vmatpush.bf16.msra.mxu3 %v8158_v63  ;;  %v6559_v58 = vld [vmem:[%s13286_s5 + $0x270] sm:$0xf0]  ;;  %v8062_v60 = vor.u32 %v9086_v45, %v8061_v43 }
 0x355   : > { %v8770_v59 = vld [vmem:[%s13286_s5 + $0x454] sm:$0xf]  ;;  %v6562_v0 = vor.u32 %v8706_v57, %v6559_v58  ;;  %v12077_v58 = vld [vmem:[%s13287_s6] sm:$0xff] }
 0x356   : > { %5087 = vmatpush.bf16.msrb.mxu2 %v6946_v62  ;;  %v6815_v61 = vld [vmem:[%s13286_s5 + $0x470] sm:$0xf0]  ;;  %5067 = vmatmul.bf16.vlgmr.msra.gmra.mxu0 %v10202_v56 }
 0x357   : > { %5111 = vmatpush.bf16.msrb.mxu0 %v7522_v47  ;;  %v8930_v62 = vld [vmem:[%s13286_s5 + $0x954] sm:$0xf]  ;;  %v6818_v46 = vor.u32 %v8770_v59, %v6815_v61  ;;  %v4526_v59 = vperm.slane %v12077_v58, 3  ;;  %v4862_v61 = vpop.f32.mrf.mxu0 }
 0x358   : > { %5075 = vmatpush.bf16.msrb.mxu1 %v6658_v7  ;;  %5051 = vmatpush.bf16.msra.mxu3 %v8126_v16  ;;  %v7455_v63 = vld [vmem:[%s13286_s5 + $0x970] sm:$0xf0]  ;;  %v4836_v16 = vpop.f32.mrf.mxu2 }
 0x359   : > { %v8874_v2 = vld [vmem:[%s13286_s5 + $0x794] sm:$0xf]  ;;  %v7458_v6 = vor.u32 %v8930_v62, %v7455_v63 }
 0x35a   : > { %5088 = vmatpush.bf16.msrb.mxu2 %v6914_v15  ;;  %v7231_v3 = vld [vmem:[%s13286_s5 + $0x7b0] sm:$0xf0] }
 0x35b   : > { %v8698_v4 = vld [vmem:[%s13286_s5 + $0x214] sm:$0xf]  ;;  %5112 = vmatpush.bf16.msrb.mxu0 %v7490_v55  ;;  %v7234_v17 = vor.u32 %v8874_v2, %v7231_v3 }
 0x35c   : > { %5076 = vmatpush.bf16.msrb.mxu1 %v6626_v33  ;;  %5052 = vmatpush.bf16.msra.mxu3 %v8094_v39  ;;  %v6527_v7 = vld [vmem:[%s13286_s5 + $0x230] sm:$0xf0] }
 0x35d   : > { %v8762_v8 = vld [vmem:[%s13286_s5 + $0x414] sm:$0xf]  ;;  %v6530_v23 = vor.u32 %v8698_v4, %v6527_v7 }
 0x35e   : > { %5089 = vmatpush.bf16.msrb.mxu2 %v6882_v34  ;;  %v6783_v9 = vld [vmem:[%s13286_s5 + $0x430] sm:$0xf0] }
 0x35f   : > { %v8922_v12 = vld [vmem:[%s13286_s5 + $0x914] sm:$0xf]  ;;  %5113 = vmatpush.bf16.msrb.mxu0 %v7458_v6  ;;  %v6786_v29 = vor.u32 %v8762_v8, %v6783_v9  ;;  %v4861_v9 = vadd.f32 %v4860_v31, %v4526_v59  ;;  %v6501_v31 = vld [vmem:[%s13286_s5 + $0x1d8] sm:$0xf] }
 0x360   : > { %5077 = vmatpush.bf16.msrb.mxu1 %v6594_v49  ;;  %5053 = vmatpush.bf16.msra.mxu3 %v8062_v60  ;;  %v7423_v13 = vld [vmem:[%s13286_s5 + $0x930] sm:$0xf0] }
 0x361   : > { %v9010_v15 = vld [vmem:[%s13286_s5 + $0xbd4] sm:$0xf]  ;;  %v7426_v50 = vor.u32 %v8922_v12, %v7423_v13 }
 0x362   : > { %5090 = vmatpush.bf16.msrb.mxu2 %v6850_v54  ;;  %v7775_v18 = vld [vmem:[%s13286_s5 + $0xbf0] sm:$0xf0] }
 0x363   : > { %v9074_v20 = vld [vmem:[%s13286_s5 + $0xdd4] sm:$0xf]  ;;  %5054 = vmatmul.bf16.vlgmr.msra.gmra.mxu3 %v10444_v19  ;;  %v7778_v32 = vor.u32 %v9010_v15, %v7775_v18  ;;  %5114 = vmatpush.bf16.msrb.mxu0 %v7426_v50  ;;  %v4873_v15 = vpop.f32.mrf.mxu1 }
 0x364   : > { %5098 = vmatpush.bf16.msrb.mxu3 %v7266_v35  ;;  %v8031_v21 = vld [vmem:[%s13286_s5 + $0xdf0] sm:$0xf0]  ;;  %5078 = vmatpush.bf16.msrb.mxu1 %v6562_v0 }
 0x365   : > { %v8866_v26 = vld [vmem:[%s13286_s5 + $0x754] sm:$0xf]  ;;  %v8034_v33 = vor.u32 %v9074_v20, %v8031_v21 }
 0x366   : > { %v7199_v27 = vld [vmem:[%s13286_s5 + $0x770] sm:$0xf0]  ;;  %5091 = vmatpush.bf16.msrb.mxu2 %v6818_v46 }
 0x367   : > { %v8914_v34 = vld [vmem:[%s13286_s5 + $0x8d4] sm:$0xf]  ;;  %v7202_v22 = vor.u32 %v8866_v26, %v7199_v27  ;;  %v4874_v26 = vadd.f32 %v4873_v15, %v4861_v9 }
 0x368   : > { %v7391_v47 = vld [vmem:[%s13286_s5 + $0x8f0] sm:$0xf0]  ;;  %5099 = vmatpush.bf16.msrb.mxu3 %v7234_v17  ;;  %5079 = vmatpush.bf16.msrb.mxu1 %v6530_v23  ;;  %v4847_v23 = vpop.f32.mrf.mxu3 }
 0x369   : > { %v9002_v37 = vld [vmem:[%s13286_s5 + $0xb94] sm:$0xf]  ;;  %v7394_v42 = vor.u32 %v8914_v34, %v7391_v47 }
 0x36a   : > { %v7743_v28 = vld [vmem:[%s13286_s5 + $0xbb0] sm:$0xf0]  ;;  %5092 = vmatpush.bf16.msrb.mxu2 %v6786_v29 }
 0x36b   : > { %v9066_v38 = vld [vmem:[%s13286_s5 + $0xd94] sm:$0xf]  ;;  %v7746_v24 = vor.u32 %v9002_v37, %v7743_v28  ;;  %5080 = vmatmul.bf16.vlgmr.msrb.gmra.mxu1 %v10229_v10  ;;  %5115 = vmatpush.bf16.msrb.mxu0 %v7394_v42 }
 0x36c   : > { %v7999_v39 = vld [vmem:[%s13286_s5 + $0xdb0] sm:$0xf0]  ;;  %5124 = vmatpush.bf16.msra.mxu1 %v7778_v32  ;;  %5100 = vmatpush.bf16.msrb.mxu3 %v7202_v22  ;;  %v12126_v32 = vadd.f32 %v4847_v23, %v11954_v48  ;;  %v8759_v23 = vld [vmem:[%s13286_s5 + $0x3f4] sm:$0xf0] }
 0x36d   : > { %v8858_v40 = vld [vmem:[%s13286_s5 + $0x714] sm:$0xf]  ;;  %v8002_v43 = vor.u32 %v9066_v38, %v7999_v39  ;;  %5093 = vmatmul.bf16.vlgmr.msrb.gmra.mxu2 %v10237_v14 }
 0x36e   : > { %v7167_v41 = vld [vmem:[%s13286_s5 + $0x730] sm:$0xf0]  ;;  %5137 = vmatpush.bf16.msra.mxu2 %v8034_v33  ;;  %v8695_v33 = vld [vmem:[%s13286_s5 + $0x1f4] sm:$0xf0] }
 0x36f   : > { %v8906_v45 = vld [vmem:[%s13286_s5 + $0x894] sm:$0xf]  ;;  %v7170_v52 = vor.u32 %v8858_v40, %v7167_v41  ;;  %v6502_v39 = vor.u32 %v8695_v33, %v6501_v31 }
 0x370   : > { %v7359_v49 = vld [vmem:[%s13286_s5 + $0x8b0] sm:$0xf0]  ;;  %5125 = vmatpush.bf16.msra.mxu1 %v7746_v24  ;;  %v6469_v24 = vld [vmem:[%s13286_s5 + $0x198] sm:$0xf] }
 0x371   : > { %v8994_v51 = vld [vmem:[%s13286_s5 + $0xb54] sm:$0xf]  ;;  %v7362_v60 = vor.u32 %v8906_v45, %v7359_v49  ;;  %5101 = vmatpush.bf16.msrb.mxu3 %v7170_v52 }
 0x372   : > { %v7711_v30 = vld [vmem:[%s13286_s5 + $0xb70] sm:$0xf0]  ;;  %5138 = vmatpush.bf16.msra.mxu2 %v8002_v43  ;;  %v8687_v43 = vld [vmem:[%s13286_s5 + $0x1b4] sm:$0xf0] }
 0x373   : > { %v9058_v53 = vld [vmem:[%s13286_s5 + $0xd54] sm:$0xf]  ;;  %v7714_v62 = vor.u32 %v8994_v51, %v7711_v30  ;;  %5116 = vmatpush.bf16.msrb.mxu0 %v7362_v60  ;;  %v4886_v51 = vpop.f32.mrf.mxu2  ;;  %v4849_v60 = vpop.f32.mrf.mxu3  ;;  %v6470_v61 = vor.u32 %v8687_v43, %v6469_v24  ;;  %v8815_v24 = vld [vmem:[%s13286_s5 + $0x5b4] sm:$0xf0] }
 0x374   : > { %v7967_v54 = vld [vmem:[%s13286_s5 + $0xd70] sm:$0xf0]  ;;  %v6949_v60 = vld [vmem:[%s13286_s5 + $0x558] sm:$0xf] }
 0x375   : > { %v8850_v55 = vld [vmem:[%s13286_s5 + $0x6d4] sm:$0xf]  ;;  %v7970_v63 = vor.u32 %v9058_v53, %v7967_v54  ;;  %5126 = vmatpush.bf16.msra.mxu1 %v7714_v62  ;;  %v12167_v53 = vadd.f32 %v4886_v51, %v4874_v26  ;;  %v4875_v54 = vpop.f32.mrf.mxu1  ;;  %v7013_v26 = vld [vmem:[%s13286_s5 + $0x5d8] sm:$0xf] }
 0x376   : > { %v7135_v57 = vld [vmem:[%s13286_s5 + $0x6f0] sm:$0xf0] }
 0x377   : > { %v8898_v35 = vld [vmem:[%s13286_s5 + $0x854] sm:$0xf]  ;;  %v7138_v3 = vor.u32 %v8850_v55, %v7135_v57  ;;  %5139 = vmatpush.bf16.msra.mxu2 %v7970_v63 }
 0x378   : > { %v7327_v0 = vld [vmem:[%s13286_s5 + $0x870] sm:$0xf0] }
 0x379   : > { %v8986_v2 = vld [vmem:[%s13286_s5 + $0xb14] sm:$0xf]  ;;  %v7330_v12 = vor.u32 %v8898_v35, %v7327_v0  ;;  %5102 = vmatpush.bf16.msrb.mxu3 %v7138_v3  ;;  %v6437_v3 = vld [vmem:[%s13286_s5 + $0x158] sm:$0xf] }
 0x37a   : > { %v7679_v4 = vld [vmem:[%s13286_s5 + $0xb30] sm:$0xf0] }
 0x37b   : > { %v9050_v46 = vld [vmem:[%s13286_s5 + $0xd14] sm:$0xf]  ;;  %v7682_v16 = vor.u32 %v8986_v2, %v7679_v4  ;;  %5117 = vmatpush.bf16.msrb.mxu0 %v7330_v12  ;;  %v8679_v4 = vld [vmem:[%s13286_s5 + $0x174] sm:$0xf0] }
 0x37c   : > { %v7935_v6 = vld [vmem:[%s13286_s5 + $0xd30] sm:$0xf0]  ;;  %v6438_v15 = vor.u32 %v8679_v4, %v6437_v3  ;;  %v6309_v3 = vld [vmem:[%s13286_s5 + $0x58] sm:$0xf] }
 0x37d   : > { %v8842_v7 = vld [vmem:[%s13286_s5 + $0x694] sm:$0xf]  ;;  %v7938_v17 = vor.u32 %v9050_v46, %v7935_v6  ;;  %5127 = vmatpush.bf16.msra.mxu1 %v7682_v16  ;;  %v8647_v4 = vld [vmem:[%s13286_s5 + $0x74] sm:$0xf0] }
 0x37e   : > { %v7103_v8 = vld [vmem:[%s13286_s5 + $0x6b0] sm:$0xf0] }
 0x37f   : > { %v8890_v13 = vld [vmem:[%s13286_s5 + $0x814] sm:$0xf]  ;;  %v7106_v27 = vor.u32 %v8842_v7, %v7103_v8  ;;  %5140 = vmatpush.bf16.msra.mxu2 %v7938_v17  ;;  %v6405_v17 = vld [vmem:[%s13286_s5 + $0x118] sm:$0xf] }
 0x380   : > { %v7295_v18 = vld [vmem:[%s13286_s5 + $0x830] sm:$0xf0] }
 0x381   : > { %v8978_v20 = vld [vmem:[%s13286_s5 + $0xad4] sm:$0xf]  ;;  %v7298_v37 = vor.u32 %v8890_v13, %v7295_v18  ;;  %5103 = vmatpush.bf16.msrb.mxu3 %v7106_v27  ;;  %v8671_v18 = vld [vmem:[%s13286_s5 + $0x134] sm:$0xf0]  ;;  %v4888_v27 = vpop.f32.mrf.mxu2 }
 0x382   : > { %v7647_v21 = vld [vmem:[%s13286_s5 + $0xaf0] sm:$0xf0] }
 0x383   : > { %v9042_v29 = vld [vmem:[%s13286_s5 + $0xcd4] sm:$0xf]  ;;  %v7650_v22 = vor.u32 %v8978_v20, %v7647_v21  ;;  %5118 = vmatpush.bf16.msrb.mxu0 %v7298_v37  ;;  %v6757_v21 = vld [vmem:[%s13286_s5 + $0x3d8] sm:$0xf]  ;;  %v6406_v37 = vor.u32 %v8671_v18, %v6405_v17 }
 0x384   : > { %v7903_v50 = vld [vmem:[%s13286_s5 + $0xcf0] sm:$0xf0]  ;;  %v6277_v18 = vld [vmem:[%s13286_s5 + $0x18] sm:$0xf] }
 0x385   : > { %v8834_v34 = vld [vmem:[%s13286_s5 + $0x654] sm:$0xf]  ;;  %v7906_v28 = vor.u32 %v9042_v29, %v7903_v50  ;;  %5128 = vmatpush.bf16.msra.mxu1 %v7650_v22  ;;  %v8823_v29 = vld [vmem:[%s13286_s5 + $0x5f4] sm:$0xf0]  ;;  %v6758_v22 = vor.u32 %v8759_v23, %v6757_v21  ;;  %v4899_v21 = vpop.f32.mrf.mxu3  ;;  %v4925_v23 = vpop.f32.mrf.mxu1 }
 0x386   : > { %v7071_v47 = vld [vmem:[%s13286_s5 + $0x670] sm:$0xf0]  ;;  %5119 = vmatmul.bf16.vlgmr.msrb.gmra.mxu0 %v10319_v5 }
 0x387   : > { %v8970_v48 = vld [vmem:[%s13286_s5 + $0xa94] sm:$0xf]  ;;  %v7074_v40 = vor.u32 %v8834_v34, %v7071_v47  ;;  %5141 = vmatpush.bf16.msra.mxu2 %v7906_v28  ;;  %5163 = vmatpush.bf16.msra.mxu0 %v6502_v39  ;;  %v12231_v47 = vpop.f32.mrf.mxu0  ;;  %v6373_v28 = vld [vmem:[%s13286_s5 + $0xd8] sm:$0xf] }
 0x388   : > { %v7615_v38 = vld [vmem:[%s13286_s5 + $0xab0] sm:$0xf0] }
 0x389   : > { %v9034_v41 = vld [vmem:[%s13286_s5 + $0xc94] sm:$0xf]  ;;  %v7618_v55 = vor.u32 %v8970_v48, %v7615_v38  ;;  %5104 = vmatpush.bf16.msrb.mxu3 %v7074_v40  ;;  %v8663_v48 = vld [vmem:[%s13286_s5 + $0xf4] sm:$0xf0]  ;;  %v7014_v38 = vor.u32 %v8823_v29, %v7013_v26 }
 0x38a   : > { %v7871_v42 = vld [vmem:[%s13286_s5 + $0xcb0] sm:$0xf0]  ;;  %v6725_v40 = vld [vmem:[%s13286_s5 + $0x398] sm:$0xf] }
 0x38b   : > { %v8826_v45 = vld [vmem:[%s13286_s5 + $0x614] sm:$0xf]  ;;  %v7874_v57 = vor.u32 %v9034_v41, %v7871_v42  ;;  %5129 = vmatpush.bf16.msra.mxu1 %v7618_v55  ;;  %5164 = vmatpush.bf16.msra.mxu0 %v6470_v61  ;;  %v8751_v41 = vld [vmem:[%s13286_s5 + $0x3b4] sm:$0xf0] }
 0x38c   : > { %v7039_v49 = vld [vmem:[%s13286_s5 + $0x630] sm:$0xf0]  ;;  %v6981_v42 = vld [vmem:[%s13286_s5 + $0x598] sm:$0xf]  ;;  %v6726_v51 = vor.u32 %v8751_v41, %v6725_v40 }
 0x38d   : > { %v9138_v52 = vld [vmem:[%s13286_s5 + $0xfd4] sm:$0xf]  ;;  %v7042_v62 = vor.u32 %v8826_v45, %v7039_v49  ;;  %5142 = vmatpush.bf16.msra.mxu2 %v7874_v57  ;;  %v6374_v49 = vor.u32 %v8663_v48, %v6373_v28  ;;  %v6982_v54 = vor.u32 %v8815_v24, %v6981_v42  ;;  %v6693_v57 = vld [vmem:[%s13286_s5 + $0x358] sm:$0xf] }
 0x38e   : > { %v8287_v30 = vld [vmem:[%s13286_s5 + $0xff0] sm:$0xf0]  ;;  %v8807_v61 = vld [vmem:[%s13286_s5 + $0x574] sm:$0xf0] }
 0x38f   : > { %v8962_v59 = vld [vmem:[%s13286_s5 + $0xa54] sm:$0xf]  ;;  %v8290_v2 = vor.u32 %v9138_v52, %v8287_v30  ;;  %5105 = vmatpush.bf16.msrb.mxu3 %v7042_v62  ;;  %5165 = vmatpush.bf16.msra.mxu0 %v6438_v15  ;;  %v6341_v52 = vld [vmem:[%s13286_s5 + $0x98] sm:$0xf] }
 0x390   : > { %v7583_v63 = vld [vmem:[%s13286_s5 + $0xa70] sm:$0xf0]  ;;  %v8655_v30 = vld [vmem:[%s13286_s5 + $0xb4] sm:$0xf0] }
 0x391   : > { %v9026_v35 = vld [vmem:[%s13286_s5 + $0xc54] sm:$0xf]  ;;  %v7586_v7 = vor.u32 %v8962_v59, %v7583_v63  ;;  %v8743_v59 = vld [vmem:[%s13286_s5 + $0x374] sm:$0xf0] }
 0x392   : > { %v7839_v0 = vld [vmem:[%s13286_s5 + $0xc70] sm:$0xf0]  ;;  %5106 = vmatmul.bf16.vlgmr.msrb.gmra.mxu3 %v10286_v1  ;;  %v6629_v29 = vld [vmem:[%s13286_s5 + $0x2d8] sm:$0xf] }
 0x393   : > { %v9130_v46 = vld [vmem:[%s13286_s5 + $0xf94] sm:$0xf]  ;;  %v7842_v8 = vor.u32 %v9026_v35, %v7839_v0  ;;  %5150 = vmatpush.bf16.msra.mxu3 %v8290_v2  ;;  %5130 = vmatpush.bf16.msra.mxu1 %v7586_v7  ;;  %v4914_v35 = vpop.f32.mrf.mxu0  ;;  %v6342_v0 = vor.u32 %v8655_v30, %v6341_v52  ;;  %v6694_v2 = vor.u32 %v8743_v59, %v6693_v57  ;;  %v6661_v7 = vld [vmem:[%s13286_s5 + $0x318] sm:$0xf]  ;;  %v4938_v30 = vpop.f32.mrf.mxu2 }
 0x394   : > { %v8255_v6 = vld [vmem:[%s13286_s5 + $0xfb0] sm:$0xf0]  ;;  %5166 = vmatpush.bf16.msra.mxu0 %v6406_v37  ;;  %v7525_v37 = vld [vmem:[%s13286_s5 + $0x9d8] sm:$0xf] }
 0x395   : > { %v8954_v9 = vld [vmem:[%s13286_s5 + $0xa14] sm:$0xf]  ;;  %v8258_v20 = vor.u32 %v9130_v46, %v8255_v6  ;;  %5143 = vmatpush.bf16.msra.mxu2 %v7842_v8  ;;  %v6950_v46 = vor.u32 %v8807_v61, %v6949_v60  ;;  %v8735_v8 = vld [vmem:[%s13286_s5 + $0x334] sm:$0xf0] }
 0x396   : > { %v7551_v12 = vld [vmem:[%s13286_s5 + $0xa30] sm:$0xf0]  ;;  %v6662_v17 = vor.u32 %v8735_v8, %v6661_v7  ;;  %v6597_v42 = vld [vmem:[%s13286_s5 + $0x298] sm:$0xf] }
 0x397   : > { %v9018_v13 = vld [vmem:[%s13286_s5 + $0xc14] sm:$0xf]  ;;  %v7554_v33 = vor.u32 %v8954_v9, %v7551_v12  ;;  %5151 = vmatpush.bf16.msra.mxu3 %v8258_v20  ;;  %v6917_v9 = vld [vmem:[%s13286_s5 + $0x518] sm:$0xf] }
 0x398   : > { %v7807_v16 = vld [vmem:[%s13286_s5 + $0xc30] sm:$0xf0]  ;;  %5167 = vmatpush.bf16.msra.mxu0 %v6374_v49  ;;  %v8799_v12 = vld [vmem:[%s13286_s5 + $0x534] sm:$0xf0] }
 0x399   : > { %v9122_v50 = vld [vmem:[%s13286_s5 + $0xf54] sm:$0xf]  ;;  %v7810_v34 = vor.u32 %v9018_v13, %v7807_v16  ;;  %5131 = vmatpush.bf16.msra.mxu1 %v7554_v33  ;;  %v6310_v16 = vor.u32 %v8647_v4, %v6309_v3  ;;  %v8639_v20 = vld [vmem:[%s13286_s5 + $0x34] sm:$0xf0]  ;;  %v6918_v26 = vor.u32 %v8799_v12, %v6917_v9  ;;  %v4900_v33 = vadd.f32 %v4899_v21, %v12167_v53 }
 0x39a   : > { %v8223_v31 = vld [vmem:[%s13286_s5 + $0xf70] sm:$0xf0]  ;;  %v8719_v24 = vld [vmem:[%s13286_s5 + $0x2b4] sm:$0xf0] }
 0x39b   : > { %v8226_v39 = vor.u32 %v9122_v50, %v8223_v31  ;;  %v9114_v43 = vld [vmem:[%s13286_s5 + $0xf14] sm:$0xf]  ;;  %5144 = vmatpush.bf16.msra.mxu2 %v7810_v34  ;;  %v8727_v50 = vld [vmem:[%s13286_s5 + $0x2f4] sm:$0xf0]  ;;  %v4913_v48 = vadd.f32 %v12231_v47, %v4900_v33  ;;  %v6598_v59 = vor.u32 %v8719_v24, %v6597_v42 }
 0x39c   : > { %v8191_v45 = vld [vmem:[%s13286_s5 + $0xf30] sm:$0xf0]  ;;  %5132 = vmatmul.bf16.vlgmr.msra.gmra.mxu1 %v10330_v11  ;;  %5168 = vmatpush.bf16.msra.mxu0 %v6342_v0  ;;  %v6885_v31 = vld [vmem:[%s13286_s5 + $0x4d8] sm:$0xf] }
 0x39d   : > { %5176 = vmatpush.bf16.msrb.mxu1 %v6758_v22  ;;  %5152 = vmatpush.bf16.msra.mxu3 %v8226_v39  ;;  %v8194_v55 = vor.u32 %v9114_v43, %v8191_v45  ;;  %v9106_v62 = vld [vmem:[%s13286_s5 + $0xed4] sm:$0xf]  ;;  %v8791_v34 = vld [vmem:[%s13286_s5 + $0x4f4] sm:$0xf0]  ;;  %v6630_v39 = vor.u32 %v8727_v50, %v6629_v29  ;;  %v4926_v43 = vadd.f32 %v4925_v23, %v4913_v48  ;;  %v4940_v50 = vpop.f32.mrf.mxu2 }
 0x39e   : > { %5145 = vmatmul.bf16.vlgmr.msra.gmra.mxu2 %v10402_v36  ;;  %v8159_v63 = vld [vmem:[%s13286_s5 + $0xef0] sm:$0xf0]  ;;  %v8951_v22 = vld [vmem:[%s13286_s5 + $0x9f4] sm:$0xf0]  ;;  %v6886_v40 = vor.u32 %v8791_v34, %v6885_v31 }
 0x39f   : > { %5189 = vmatpush.bf16.msrb.mxu2 %v7014_v38  ;;  %v8162_v6 = vor.u32 %v9106_v62, %v8159_v63  ;;  %v9098_v13 = vld [vmem:[%s13286_s5 + $0xe94] sm:$0xf]  ;;  %v6278_v38 = vor.u32 %v8639_v20, %v6277_v18  ;;  %v7526_v41 = vor.u32 %v8951_v22, %v7525_v37  ;;  %v6853_v47 = vld [vmem:[%s13286_s5 + $0x498] sm:$0xf]  ;;  %v12363_v57 = vadd.f32 %v4938_v30, %v4926_v43  ;;  %v4901_v62 = vpop.f32.mrf.mxu3  ;;  %v4927_v63 = vpop.f32.mrf.mxu1 }
 0x3a0   : > { %v8127_v15 = vld [vmem:[%s13286_s5 + $0xeb0] sm:$0xf0]  ;;  %5169 = vmatpush.bf16.msra.mxu0 %v6310_v16  ;;  %v8783_v49 = vld [vmem:[%s13286_s5 + $0x4b4] sm:$0xf0] }
 0x3a1   : > { %5177 = vmatpush.bf16.msrb.mxu1 %v6726_v51  ;;  %5153 = vmatpush.bf16.msra.mxu3 %v8194_v55  ;;  %v8130_v27 = vor.u32 %v9098_v13, %v8127_v15  ;;  %v9090_v28 = vld [vmem:[%s13286_s5 + $0xe54] sm:$0xf]  ;;  %v7493_v51 = vld [vmem:[%s13286_s5 + $0x998] sm:$0xf]  ;;  %v6854_v35 = vor.u32 %v8783_v49, %v6853_v47 }
 0x3a2   : > { %v8095_v53 = vld [vmem:[%s13286_s5 + $0xe70] sm:$0xf0]  ;;  %v8943_v52 = vld [vmem:[%s13286_s5 + $0x9b4] sm:$0xf0] }
 0x3a3   : > { %5190 = vmatpush.bf16.msrb.mxu2 %v6982_v54  ;;  %v8098_v45 = vor.u32 %v9090_v28, %v8095_v53  ;;  %v9082_v54 = vld [vmem:[%s13286_s5 + $0xe14] sm:$0xf]  ;;  %v7269_v60 = vld [vmem:[%s13286_s5 + $0x7d8] sm:$0xf]  ;;  %v7494_v0 = vor.u32 %v8943_v52, %v7493_v51 }
 0x3a4   : > { %v8063_v55 = vld [vmem:[%s13286_s5 + $0xe30] sm:$0xf0]  ;;  %5170 = vmatpush.bf16.msra.mxu0 %v6278_v38  ;;  %v8887_v61 = vld [vmem:[%s13286_s5 + $0x7f4] sm:$0xf0] }
 0x3a5   : > { %5178 = vmatpush.bf16.msrb.mxu1 %v6694_v2  ;;  %5154 = vmatpush.bf16.msra.mxu3 %v8162_v6  ;;  %v6565_v2 = vld [vmem:[%s13286_s5 + $0x258] sm:$0xf]  ;;  %v7270_v9 = vor.u32 %v8887_v61, %v7269_v60 }
 0x3a6   : > { %v8711_v3 = vld [vmem:[%s13286_s5 + $0x274] sm:$0xf0] }
 0x3a7   : > { %5191 = vmatpush.bf16.msrb.mxu2 %v6950_v46  ;;  %v6821_v4 = vld [vmem:[%s13286_s5 + $0x458] sm:$0xf]  ;;  %v8066_v46 = vor.u32 %v9082_v54, %v8063_v55  ;;  %5171 = vmatmul.bf16.vlgmr.msra.gmra.mxu0 %v10202_v56  ;;  %v6566_v12 = vor.u32 %v8711_v3, %v6565_v2 }
 0x3a8   : > { %5215 = vmatpush.bf16.msrb.mxu0 %v7526_v41  ;;  %v8775_v6 = vld [vmem:[%s13286_s5 + $0x474] sm:$0xf0] }
 0x3a9   : > { %5179 = vmatpush.bf16.msrb.mxu1 %v6662_v17  ;;  %5155 = vmatpush.bf16.msra.mxu3 %v8130_v27  ;;  %v7461_v7 = vld [vmem:[%s13286_s5 + $0x958] sm:$0xf]  ;;  %v6822_v17 = vor.u32 %v8775_v6, %v6821_v4 }
 0x3aa   : > { %v8935_v8 = vld [vmem:[%s13286_s5 + $0x974] sm:$0xf0] }
 0x3ab   : > { %5192 = vmatpush.bf16.msrb.mxu2 %v6918_v26  ;;  %v7237_v13 = vld [vmem:[%s13286_s5 + $0x798] sm:$0xf]  ;;  %v7462_v18 = vor.u32 %v8935_v8, %v7461_v7 }
 0x3ac   : > { %v8879_v15 = vld [vmem:[%s13286_s5 + $0x7b4] sm:$0xf0]  ;;  %5216 = vmatpush.bf16.msrb.mxu0 %v7494_v0 }
 0x3ad   : > { %5180 = vmatpush.bf16.msrb.mxu1 %v6630_v39  ;;  %5156 = vmatpush.bf16.msra.mxu3 %v8098_v45  ;;  %v6533_v16 = vld [vmem:[%s13286_s5 + $0x218] sm:$0xf]  ;;  %v7238_v31 = vor.u32 %v8879_v15, %v7237_v13  ;;  %v4964_v39 = vpop.f32.mrf.mxu0 }
 0x3ae   : > { %v8703_v20 = vld [vmem:[%s13286_s5 + $0x234] sm:$0xf0] }
 0x3af   : > { %5193 = vmatpush.bf16.msrb.mxu2 %v6886_v40  ;;  %v6789_v21 = vld [vmem:[%s13286_s5 + $0x418] sm:$0xf]  ;;  %v6534_v22 = vor.u32 %v8703_v20, %v6533_v16 }
 0x3b0   : > { %v8767_v23 = vld [vmem:[%s13286_s5 + $0x434] sm:$0xf0]  ;;  %5217 = vmatpush.bf16.msrb.mxu0 %v7462_v18 }
 0x3b1   : > { %5181 = vmatpush.bf16.msrb.mxu1 %v6598_v59  ;;  %5157 = vmatpush.bf16.msra.mxu3 %v8066_v46  ;;  %v7429_v26 = vld [vmem:[%s13286_s5 + $0x918] sm:$0xf]  ;;  %v6790_v48 = vor.u32 %v8767_v23, %v6789_v21  ;;  %v4527_v46 = vperm.slane %v12077_v58, 4 }
 0x3b2   : > { %v8927_v27 = vld [vmem:[%s13286_s5 + $0x934] sm:$0xf0] }
 0x3b3   : > { %5194 = vmatpush.bf16.msrb.mxu2 %v6854_v35  ;;  %v7781_v29 = vld [vmem:[%s13286_s5 + $0xbd8] sm:$0xf]  ;;  %v7430_v38 = vor.u32 %v8927_v27, %v7429_v26  ;;  %v4965_v23 = vadd.f32 %v4964_v39, %v4527_v46  ;;  %v8691_v39 = vld [vmem:[%s13286_s5 + $0x1dc] sm:$0xf] }
 0x3b4   : > { %v9015_v33 = vld [vmem:[%s13286_s5 + $0xbf4] sm:$0xf0]  ;;  %5158 = vmatmul.bf16.vlgmr.msra.gmra.mxu3 %v10444_v19 }
 0x3b5   : > { %5202 = vmatpush.bf16.msrb.mxu3 %v7270_v9  ;;  %v8037_v34 = vld [vmem:[%s13286_s5 + $0xdd8] sm:$0xf]  ;;  %5182 = vmatpush.bf16.msrb.mxu1 %v6566_v12  ;;  %v7782_v40 = vor.u32 %v9015_v33, %v7781_v29  ;;  %v4966_v7 = vpop.f32.mrf.mxu0  ;;  %v4977_v29 = vpop.f32.mrf.mxu1 }
 0x3b6   : > { %v9079_v37 = vld [vmem:[%s13286_s5 + $0xdf4] sm:$0xf0]  ;;  %5218 = vmatpush.bf16.msrb.mxu0 %v7430_v38 }
 0x3b7   : > { %v7205_v28 = vld [vmem:[%s13286_s5 + $0x758] sm:$0xf]  ;;  %5195 = vmatpush.bf16.msrb.mxu2 %v6822_v17  ;;  %v8038_v41 = vor.u32 %v9079_v37, %v8037_v34 }
 0x3b8   : > { %v8871_v53 = vld [vmem:[%s13286_s5 + $0x774] sm:$0xf0] }
 0x3b9   : > { %v7397_v42 = vld [vmem:[%s13286_s5 + $0x8d8] sm:$0xf]  ;;  %5203 = vmatpush.bf16.msrb.mxu3 %v7238_v31  ;;  %v7206_v43 = vor.u32 %v8871_v53, %v7205_v28  ;;  %5183 = vmatpush.bf16.msrb.mxu1 %v6534_v22  ;;  %v4951_v22 = vpop.f32.mrf.mxu3  ;;  %v4978_v28 = vadd.f32 %v4977_v29, %v4965_v23 }
 0x3ba   : > { %v8919_v24 = vld [vmem:[%s13286_s5 + $0x8f4] sm:$0xf0] }
 0x3bb   : > { %v7749_v47 = vld [vmem:[%s13286_s5 + $0xb98] sm:$0xf]  ;;  %5196 = vmatpush.bf16.msrb.mxu2 %v6790_v48  ;;  %v7398_v54 = vor.u32 %v8919_v24, %v7397_v42 }
 0x3bc   : > { %v9007_v45 = vld [vmem:[%s13286_s5 + $0xbb4] sm:$0xf0]  ;;  %5184 = vmatmul.bf16.vlgmr.msrb.gmra.mxu1 %v10229_v10 }
 0x3bd   : > { %v8005_v49 = vld [vmem:[%s13286_s5 + $0xd98] sm:$0xf]  ;;  %5228 = vmatpush.bf16.msra.mxu1 %v7782_v40  ;;  %v7750_v55 = vor.u32 %v9007_v45, %v7749_v47  ;;  %5204 = vmatpush.bf16.msrb.mxu3 %v7206_v43  ;;  %v12530_v40 = vadd.f32 %v4951_v22, %v12363_v57  ;;  %v6759_v22 = vld [vmem:[%s13286_s5 + $0x3f8] sm:$0xf0] }
 0x3be   : > { %v9071_v51 = vld [vmem:[%s13286_s5 + $0xdb4] sm:$0xf0]  ;;  %5197 = vmatmul.bf16.vlgmr.msrb.gmra.mxu2 %v10237_v14  ;;  %5219 = vmatpush.bf16.msrb.mxu0 %v7398_v54 }
 0x3bf   : > { %v7173_v52 = vld [vmem:[%s13286_s5 + $0x718] sm:$0xf]  ;;  %5241 = vmatpush.bf16.msra.mxu2 %v8038_v41  ;;  %v8006_v59 = vor.u32 %v9071_v51, %v8005_v49  ;;  %v6503_v41 = vld [vmem:[%s13286_s5 + $0x1f8] sm:$0xf0] }
 0x3c0   : > { %v8863_v30 = vld [vmem:[%s13286_s5 + $0x734] sm:$0xf0]  ;;  %v6506_v51 = vor.u32 %v8691_v39, %v6503_v41 }
 0x3c1   : > { %v7365_v60 = vld [vmem:[%s13286_s5 + $0x898] sm:$0xf]  ;;  %v7174_v63 = vor.u32 %v8863_v30, %v7173_v52  ;;  %5229 = vmatpush.bf16.msra.mxu1 %v7750_v55  ;;  %v8683_v55 = vld [vmem:[%s13286_s5 + $0x19c] sm:$0xf] }
 0x3c2   : > { %v8911_v61 = vld [vmem:[%s13286_s5 + $0x8b4] sm:$0xf0] }
 0x3c3   : > { %v7717_v62 = vld [vmem:[%s13286_s5 + $0xb58] sm:$0xf]  ;;  %v7366_v6 = vor.u32 %v8911_v61, %v7365_v60  ;;  %5242 = vmatpush.bf16.msra.mxu2 %v8006_v59  ;;  %5205 = vmatpush.bf16.msrb.mxu3 %v7174_v63  ;;  %v6471_v59 = vld [vmem:[%s13286_s5 + $0x1b8] sm:$0xf0] }
 0x3c4   : > { %v8999_v35 = vld [vmem:[%s13286_s5 + $0xb74] sm:$0xf0]  ;;  %v6474_v7 = vor.u32 %v8683_v55, %v6471_v59  ;;  %v6983_v55 = vld [vmem:[%s13286_s5 + $0x5b8] sm:$0xf0] }
 0x3c5   : > { %v7973_v0 = vld [vmem:[%s13286_s5 + $0xd58] sm:$0xf]  ;;  %v7718_v8 = vor.u32 %v8999_v35, %v7717_v62  ;;  %5220 = vmatpush.bf16.msrb.mxu0 %v7366_v6  ;;  %v4990_v62 = vpop.f32.mrf.mxu2  ;;  %v4953_v6 = vpop.f32.mrf.mxu3 }
 0x3c6   : > { %v9063_v2 = vld [vmem:[%s13286_s5 + $0xd74] sm:$0xf0]  ;;  %v8803_v6 = vld [vmem:[%s13286_s5 + $0x55c] sm:$0xf] }
 0x3c7   : > { %v7141_v3 = vld [vmem:[%s13286_s5 + $0x6d8] sm:$0xf]  ;;  %v7974_v9 = vor.u32 %v9063_v2, %v7973_v0  ;;  %5230 = vmatpush.bf16.msra.mxu1 %v7718_v8  ;;  %v12571_v0 = vadd.f32 %v4990_v62, %v4978_v28  ;;  %v4979_v2 = vpop.f32.mrf.mxu1  ;;  %v8819_v28 = vld [vmem:[%s13286_s5 + $0x5dc] sm:$0xf] }
 0x3c8   : > { %v8855_v4 = vld [vmem:[%s13286_s5 + $0x6f4] sm:$0xf0] }
 0x3c9   : > { %v7333_v12 = vld [vmem:[%s13286_s5 + $0x858] sm:$0xf]  ;;  %v7142_v58 = vor.u32 %v8855_v4, %v7141_v3  ;;  %5243 = vmatpush.bf16.msra.mxu2 %v7974_v9 }
 0x3ca   : > { %v8903_v13 = vld [vmem:[%s13286_s5 + $0x874] sm:$0xf0] }
 0x3cb   : > { %v7685_v15 = vld [vmem:[%s13286_s5 + $0xb18] sm:$0xf]  ;;  %v7334_v26 = vor.u32 %v8903_v13, %v7333_v12  ;;  %5206 = vmatpush.bf16.msrb.mxu3 %v7142_v58  ;;  %v8675_v58 = vld [vmem:[%s13286_s5 + $0x15c] sm:$0xf] }
 0x3cc   : > { %v8991_v16 = vld [vmem:[%s13286_s5 + $0xb34] sm:$0xf0] }
 0x3cd   : > { %v7941_v17 = vld [vmem:[%s13286_s5 + $0xd18] sm:$0xf]  ;;  %v7686_v50 = vor.u32 %v8991_v16, %v7685_v15  ;;  %5221 = vmatpush.bf16.msrb.mxu0 %v7334_v26  ;;  %v6439_v16 = vld [vmem:[%s13286_s5 + $0x178] sm:$0xf0] }
 0x3ce   : > { %v9055_v18 = vld [vmem:[%s13286_s5 + $0xd34] sm:$0xf0]  ;;  %v6442_v29 = vor.u32 %v8675_v58, %v6439_v16  ;;  %v8643_v58 = vld [vmem:[%s13286_s5 + $0x5c] sm:$0xf] }
 0x3cf   : > { %v7109_v20 = vld [vmem:[%s13286_s5 + $0x698] sm:$0xf]  ;;  %v7942_v31 = vor.u32 %v9055_v18, %v7941_v17  ;;  %5231 = vmatpush.bf16.msra.mxu1 %v7686_v50  ;;  %v6311_v16 = vld [vmem:[%s13286_s5 + $0x78] sm:$0xf0] }
 0x3d0   : > { %v8847_v21 = vld [vmem:[%s13286_s5 + $0x6b4] sm:$0xf0] }
 0x3d1   : > { %v7301_v27 = vld [vmem:[%s13286_s5 + $0x818] sm:$0xf]  ;;  %v7110_v53 = vor.u32 %v8847_v21, %v7109_v20  ;;  %5244 = vmatpush.bf16.msra.mxu2 %v7942_v31  ;;  %v8667_v31 = vld [vmem:[%s13286_s5 + $0x11c] sm:$0xf] }
 0x3d2   : > { %v8895_v33 = vld [vmem:[%s13286_s5 + $0x834] sm:$0xf0] }
 0x3d3   : > { %v7653_v34 = vld [vmem:[%s13286_s5 + $0xad8] sm:$0xf]  ;;  %v7302_v47 = vor.u32 %v8895_v33, %v7301_v27  ;;  %5207 = vmatpush.bf16.msrb.mxu3 %v7110_v53  ;;  %v6407_v33 = vld [vmem:[%s13286_s5 + $0x138] sm:$0xf0]  ;;  %v4992_v53 = vpop.f32.mrf.mxu2 }
 0x3d4   : > { %v8983_v37 = vld [vmem:[%s13286_s5 + $0xaf4] sm:$0xf0] }
 0x3d5   : > { %v7909_v48 = vld [vmem:[%s13286_s5 + $0xcd8] sm:$0xf]  ;;  %v7654_v43 = vor.u32 %v8983_v37, %v7653_v34  ;;  %5222 = vmatpush.bf16.msrb.mxu0 %v7302_v47  ;;  %v8755_v37 = vld [vmem:[%s13286_s5 + $0x3dc] sm:$0xf]  ;;  %v6410_v47 = vor.u32 %v8667_v31, %v6407_v33 }
 0x3d6   : > { %v9047_v38 = vld [vmem:[%s13286_s5 + $0xcf4] sm:$0xf0]  ;;  %v8635_v33 = vld [vmem:[%s13286_s5 + $0x1c] sm:$0xf] }
 0x3d7   : > { %v7077_v42 = vld [vmem:[%s13286_s5 + $0x658] sm:$0xf]  ;;  %v7910_v45 = vor.u32 %v9047_v38, %v7909_v48  ;;  %5232 = vmatpush.bf16.msra.mxu1 %v7654_v43  ;;  %v7015_v48 = vld [vmem:[%s13286_s5 + $0x5f8] sm:$0xf0]  ;;  %v6762_v43 = vor.u32 %v8755_v37, %v6759_v22  ;;  %v5003_v37 = vpop.f32.mrf.mxu3  ;;  %v5029_v22 = vpop.f32.mrf.mxu1 }
 0x3d8   : > { %v8839_v24 = vld [vmem:[%s13286_s5 + $0x674] sm:$0xf0]  ;;  %5223 = vmatmul.bf16.vlgmr.msrb.gmra.mxu0 %v10319_v5 }
 0x3d9   : > { %v7621_v57 = vld [vmem:[%s13286_s5 + $0xa98] sm:$0xf]  ;;  %v7078_v52 = vor.u32 %v8839_v24, %v7077_v42  ;;  %5245 = vmatpush.bf16.msra.mxu2 %v7910_v45  ;;  %5267 = vmatpush.bf16.msra.mxu0 %v6506_v51  ;;  %v12635_v24 = vpop.f32.mrf.mxu0  ;;  %v8659_v45 = vld [vmem:[%s13286_s5 + $0xdc] sm:$0xf] }
 0x3da   : > { %v8975_v49 = vld [vmem:[%s13286_s5 + $0xab4] sm:$0xf0] }
 0x3db   : > { %v7877_v30 = vld [vmem:[%s13286_s5 + $0xc98] sm:$0xf]  ;;  %v7622_v3 = vor.u32 %v8975_v49, %v7621_v57  ;;  %5208 = vmatpush.bf16.msrb.mxu3 %v7078_v52  ;;  %v6375_v57 = vld [vmem:[%s13286_s5 + $0xf8] sm:$0xf0]  ;;  %v7018_v49 = vor.u32 %v8819_v28, %v7015_v48 }
 0x3dc   : > { %v9039_v54 = vld [vmem:[%s13286_s5 + $0xcb4] sm:$0xf0]  ;;  %v8747_v52 = vld [vmem:[%s13286_s5 + $0x39c] sm:$0xf] }
 0x3dd   : > { %v7045_v60 = vld [vmem:[%s13286_s5 + $0x618] sm:$0xf]  ;;  %v7878_v4 = vor.u32 %v9039_v54, %v7877_v30  ;;  %5233 = vmatpush.bf16.msra.mxu1 %v7622_v3  ;;  %5268 = vmatpush.bf16.msra.mxu0 %v6474_v7  ;;  %v6727_v30 = vld [vmem:[%s13286_s5 + $0x3b8] sm:$0xf0] }
 0x3de   : > { %v8831_v61 = vld [vmem:[%s13286_s5 + $0x634] sm:$0xf0]  ;;  %v8811_v54 = vld [vmem:[%s13286_s5 + $0x59c] sm:$0xf]  ;;  %v6730_v62 = vor.u32 %v8747_v52, %v6727_v30 }
 0x3df   : > { %v8293_v63 = vld [vmem:[%s13286_s5 + $0xfd8] sm:$0xf]  ;;  %v7046_v8 = vor.u32 %v8831_v61, %v7045_v60  ;;  %5246 = vmatpush.bf16.msra.mxu2 %v7878_v4  ;;  %v6378_v61 = vor.u32 %v8659_v45, %v6375_v57  ;;  %v6986_v2 = vor.u32 %v8811_v54, %v6983_v55  ;;  %v8739_v4 = vld [vmem:[%s13286_s5 + $0x35c] sm:$0xf] }
 0x3e0   : > { %v9143_v35 = vld [vmem:[%s13286_s5 + $0xff4] sm:$0xf0]  ;;  %v6951_v7 = vld [vmem:[%s13286_s5 + $0x578] sm:$0xf0] }
 0x3e1   : > { %v7589_v46 = vld [vmem:[%s13286_s5 + $0xa58] sm:$0xf]  ;;  %v8294_v15 = vor.u32 %v9143_v35, %v8293_v63  ;;  %5209 = vmatpush.bf16.msrb.mxu3 %v7046_v8  ;;  %5269 = vmatpush.bf16.msra.mxu0 %v6442_v29  ;;  %v8651_v63 = vld [vmem:[%s13286_s5 + $0x9c] sm:$0xf] }
 0x3e2   : > { %v8967_v9 = vld [vmem:[%s13286_s5 + $0xa74] sm:$0xf0]  ;;  %v6343_v35 = vld [vmem:[%s13286_s5 + $0xb8] sm:$0xf0] }
 0x3e3   : > { %v7845_v12 = vld [vmem:[%s13286_s5 + $0xc58] sm:$0xf]  ;;  %v7590_v20 = vor.u32 %v8967_v9, %v7589_v46  ;;  %v6695_v46 = vld [vmem:[%s13286_s5 + $0x378] sm:$0xf0] }
 0x3e4   : > { %v9031_v13 = vld [vmem:[%s13286_s5 + $0xc74] sm:$0xf0]  ;;  %5210 = vmatmul.bf16.vlgmr.msrb.gmra.mxu3 %v10286_v1  ;;  %v8723_v48 = vld [vmem:[%s13286_s5 + $0x2dc] sm:$0xf] }
 0x3e5   : > { %v8261_v17 = vld [vmem:[%s13286_s5 + $0xf98] sm:$0xf]  ;;  %v7846_v21 = vor.u32 %v9031_v13, %v7845_v12  ;;  %5254 = vmatpush.bf16.msra.mxu3 %v8294_v15  ;;  %5234 = vmatpush.bf16.msra.mxu1 %v7590_v20  ;;  %v5018_v12 = vpop.f32.mrf.mxu0  ;;  %v6346_v13 = vor.u32 %v8651_v63, %v6343_v35  ;;  %v6698_v15 = vor.u32 %v8739_v4, %v6695_v46  ;;  %v8731_v20 = vld [vmem:[%s13286_s5 + $0x31c] sm:$0xf]  ;;  %v5042_v35 = vpop.f32.mrf.mxu2 }
 0x3e6   : > { %v9135_v18 = vld [vmem:[%s13286_s5 + $0xfb4] sm:$0xf0]  ;;  %5270 = vmatpush.bf16.msra.mxu0 %v6410_v47  ;;  %v8947_v47 = vld [vmem:[%s13286_s5 + $0x9dc] sm:$0xf] }
 0x3e7   : > { %v7557_v23 = vld [vmem:[%s13286_s5 + $0xa18] sm:$0xf]  ;;  %v8262_v34 = vor.u32 %v9135_v18, %v8261_v17  ;;  %5247 = vmatpush.bf16.msra.mxu2 %v7846_v21  ;;  %v6954_v17 = vor.u32 %v8803_v6, %v6951_v7  ;;  %v6663_v21 = vld [vmem:[%s13286_s5 + $0x338] sm:$0xf0] }
 0x3e8   : > { %v8959_v26 = vld [vmem:[%s13286_s5 + $0xa34] sm:$0xf0]  ;;  %v6666_v31 = vor.u32 %v8731_v20, %v6663_v21  ;;  %v8715_v54 = vld [vmem:[%s13286_s5 + $0x29c] sm:$0xf] }
 0x3e9   : > { %v7813_v27 = vld [vmem:[%s13286_s5 + $0xc18] sm:$0xf]  ;;  %v7558_v41 = vor.u32 %v8959_v26, %v7557_v23  ;;  %5255 = vmatpush.bf16.msra.mxu3 %v8262_v34  ;;  %v8795_v23 = vld [vmem:[%s13286_s5 + $0x51c] sm:$0xf] }
 0x3ea   : > { %v9023_v50 = vld [vmem:[%s13286_s5 + $0xc34] sm:$0xf0]  ;;  %5271 = vmatpush.bf16.msra.mxu0 %v6378_v61  ;;  %v6919_v26 = vld [vmem:[%s13286_s5 + $0x538] sm:$0xf0] }
 0x3eb   : > { %v8229_v38 = vld [vmem:[%s13286_s5 + $0xf58] sm:$0xf]  ;;  %v7814_v42 = vor.u32 %v9023_v50, %v7813_v27  ;;  %5235 = vmatpush.bf16.msra.mxu1 %v7558_v41  ;;  %v6314_v50 = vor.u32 %v8643_v58, %v6311_v16  ;;  %v6279_v34 = vld [vmem:[%s13286_s5 + $0x38] sm:$0xf0]  ;;  %v6922_v28 = vor.u32 %v8795_v23, %v6919_v26  ;;  %v5004_v41 = vadd.f32 %v5003_v37, %v12571_v0 }
 0x3ec   : > { %v9127_v39 = vld [vmem:[%s13286_s5 + $0xf74] sm:$0xf0]  ;;  %v6599_v55 = vld [vmem:[%s13286_s5 + $0x2b8] sm:$0xf0] }
 0x3ed   : > { %v8230_v51 = vor.u32 %v9127_v39, %v8229_v38  ;;  %v8197_v59 = vld [vmem:[%s13286_s5 + $0xf18] sm:$0xf]  ;;  %5248 = vmatpush.bf16.msra.mxu2 %v7814_v42  ;;  %v6631_v38 = vld [vmem:[%s13286_s5 + $0x2f8] sm:$0xf0]  ;;  %v5017_v57 = vadd.f32 %v12635_v24, %v5004_v41  ;;  %v6602_v46 = vor.u32 %v8715_v54, %v6599_v55 }
 0x3ee   : > { %v9119_v60 = vld [vmem:[%s13286_s5 + $0xf34] sm:$0xf0]  ;;  %5236 = vmatmul.bf16.vlgmr.msra.gmra.mxu1 %v10330_v11  ;;  %5272 = vmatpush.bf16.msra.mxu0 %v6346_v13  ;;  %v8787_v39 = vld [vmem:[%s13286_s5 + $0x4dc] sm:$0xf] }
 0x3ef   : > { %5280 = vmatpush.bf16.msrb.mxu1 %v6762_v43  ;;  %5256 = vmatpush.bf16.msra.mxu3 %v8230_v51  ;;  %v8198_v3 = vor.u32 %v9119_v60, %v8197_v59  ;;  %v8165_v8 = vld [vmem:[%s13286_s5 + $0xed8] sm:$0xf]  ;;  %v6887_v42 = vld [vmem:[%s13286_s5 + $0x4f8] sm:$0xf0]  ;;  %v6634_v51 = vor.u32 %v8723_v48, %v6631_v38  ;;  %v5030_v59 = vadd.f32 %v5029_v22, %v5017_v57  ;;  %v5044_v48 = vpop.f32.mrf.mxu2 }
 0x3f0   : > { %5249 = vmatmul.bf16.vlgmr.msra.gmra.mxu2 %v10402_v36  ;;  %v9111_v9 = vld [vmem:[%s13286_s5 + $0xef4] sm:$0xf0]  ;;  %v7527_v43 = vld [vmem:[%s13286_s5 + $0x9f8] sm:$0xf0]  ;;  %v6890_v52 = vor.u32 %v8787_v39, %v6887_v42 }
 0x3f1   : > { %5293 = vmatpush.bf16.msrb.mxu2 %v7018_v49  ;;  %v8166_v18 = vor.u32 %v9111_v9, %v8165_v8  ;;  %v8133_v27 = vld [vmem:[%s13286_s5 + $0xe98] sm:$0xf]  ;;  %v6282_v49 = vor.u32 %v8635_v33, %v6279_v34  ;;  %v7530_v30 = vor.u32 %v8947_v47, %v7527_v43  ;;  %v8779_v24 = vld [vmem:[%s13286_s5 + $0x49c] sm:$0xf]  ;;  %v12767_v4 = vadd.f32 %v5042_v35, %v5030_v59  ;;  %v5005_v8 = vpop.f32.mrf.mxu3  ;;  %v5031_v9 = vpop.f32.mrf.mxu1 }
 0x3f2   : > { %v9103_v29 = vld [vmem:[%s13286_s5 + $0xeb4] sm:$0xf0]  ;;  %5273 = vmatpush.bf16.msra.mxu0 %v6314_v50  ;;  %v6855_v61 = vld [vmem:[%s13286_s5 + $0x4b8] sm:$0xf0] }
 0x3f3   : > { %5281 = vmatpush.bf16.msrb.mxu1 %v6730_v62  ;;  %5257 = vmatpush.bf16.msra.mxu3 %v8198_v3  ;;  %v8134_v53 = vor.u32 %v9103_v29, %v8133_v27  ;;  %v8101_v45 = vld [vmem:[%s13286_s5 + $0xe58] sm:$0xf]  ;;  %v8939_v62 = vld [vmem:[%s13286_s5 + $0x99c] sm:$0xf]  ;;  %v6858_v12 = vor.u32 %v8779_v24, %v6855_v61 }
 0x3f4   : > { %v9095_v0 = vld [vmem:[%s13286_s5 + $0xe74] sm:$0xf0]  ;;  %v7495_v63 = vld [vmem:[%s13286_s5 + $0x9b8] sm:$0xf0] }
 0x3f5   : > { %5294 = vmatpush.bf16.msrb.mxu2 %v6986_v2  ;;  %v8102_v60 = vor.u32 %v9095_v0, %v8101_v45  ;;  %v8069_v2 = vld [vmem:[%s13286_s5 + $0xe18] sm:$0xf]  ;;  %v8883_v6 = vld [vmem:[%s13286_s5 + $0x7dc] sm:$0xf]  ;;  %v7498_v13 = vor.u32 %v8939_v62, %v7495_v63 }
 0x3f6   : > { %v9087_v3 = vld [vmem:[%s13286_s5 + $0xe34] sm:$0xf0]  ;;  %5274 = vmatpush.bf16.msra.mxu0 %v6282_v49  ;;  %v7271_v7 = vld [vmem:[%s13286_s5 + $0x7f8] sm:$0xf0]  ;;  %v12837_v49 = vpop.f32.mrf.mxu0 }
 0x3f7   : > { %5282 = vmatpush.bf16.msrb.mxu1 %v6698_v15  ;;  %5258 = vmatpush.bf16.msra.mxu3 %v8166_v18  ;;  %v8707_v15 = vld [vmem:[%s13286_s5 + $0x25c] sm:$0xf]  ;;  %v7274_v23 = vor.u32 %v8883_v6, %v7271_v7 }
 0x3f8   : > { %v6567_v58 = vld [vmem:[%s13286_s5 + $0x278] sm:$0xf0] }
 0x3f9   : > { %5295 = vmatpush.bf16.msrb.mxu2 %v6954_v17  ;;  %v8771_v16 = vld [vmem:[%s13286_s5 + $0x45c] sm:$0xf]  ;;  %v8070_v17 = vor.u32 %v9087_v3, %v8069_v2  ;;  %5275 = vmatmul.bf16.vlgmr.msra.gmra.mxu0 %v10202_v56  ;;  %v6570_v26 = vor.u32 %v8707_v15, %v6567_v58  ;;  %v12924_v48 = vpop.f32.mrf.mxu3 }
 0x3fa   : > { %5319 = vmatpush.bf16.msrb.mxu0 %v7530_v30  ;;  %v6823_v18 = vld [vmem:[%s13286_s5 + $0x478] sm:$0xf0] }
 0x3fb   : > { %5283 = vmatpush.bf16.msrb.mxu1 %v6666_v31  ;;  %5259 = vmatpush.bf16.msra.mxu3 %v8134_v53  ;;  %v8931_v20 = vld [vmem:[%s13286_s5 + $0x95c] sm:$0xf]  ;;  %v6826_v31 = vor.u32 %v8771_v16, %v6823_v18 }
 0x3fc   : > { %v7463_v21 = vld [vmem:[%s13286_s5 + $0x978] sm:$0xf0] }
 0x3fd   : > { %5296 = vmatpush.bf16.msrb.mxu2 %v6922_v28  ;;  %v8875_v27 = vld [vmem:[%s13286_s5 + $0x79c] sm:$0xf]  ;;  %v7466_v33 = vor.u32 %v8931_v20, %v7463_v21 }
 0x3fe   : > { %v7239_v29 = vld [vmem:[%s13286_s5 + $0x7b8] sm:$0xf0]  ;;  %5320 = vmatpush.bf16.msrb.mxu0 %v7498_v13  ;;  %v5070_v16 = vpop.f32.mrf.mxu0 }
 0x3ff   : > { %5284 = vmatpush.bf16.msrb.mxu1 %v6634_v51  ;;  %5260 = vmatpush.bf16.msra.mxu3 %v8102_v60  ;;  %v8699_v50 = vld [vmem:[%s13286_s5 + $0x21c] sm:$0xf]  ;;  %v7242_v38 = vor.u32 %v8875_v27, %v7239_v29 }
 0x400   : > { %v6535_v56 = vld [vmem:[%s13286_s5 + $0x238] sm:$0xf0] }
 0x401   : > { %5297 = vmatpush.bf16.msrb.mxu2 %v6890_v52  ;;  %v8763_v34 = vld [vmem:[%s13286_s5 + $0x41c] sm:$0xf]  ;;  %v6538_v47 = vor.u32 %v8699_v50, %v6535_v56  ;;  %v12913_v56 = vpop.f32.mrf.mxu1 }
 0x402   : > { %v6791_v37 = vld [vmem:[%s13286_s5 + $0x438] sm:$0xf0]  ;;  %5321 = vmatpush.bf16.msrb.mxu0 %v7466_v33 }
 0x403   : > { %5285 = vmatpush.bf16.msrb.mxu1 %v6602_v46  ;;  %5261 = vmatpush.bf16.msra.mxu3 %v8070_v17  ;;  %v8923_v22 = vld [vmem:[%s13286_s5 + $0x91c] sm:$0xf]  ;;  %v6794_v0 = vor.u32 %v8763_v34, %v6791_v37 }
 0x404   : > { %v7431_v28 = vld [vmem:[%s13286_s5 + $0x938] sm:$0xf0] }
 0x405   : > { %5298 = vmatpush.bf16.msrb.mxu2 %v6858_v12  ;;  %v9011_v53 = vld [vmem:[%s13286_s5 + $0xbdc] sm:$0xf]  ;;  %v7434_v57 = vor.u32 %v8923_v22, %v7431_v28 }
 0x406   : > { %v7783_v39 = vld [vmem:[%s13286_s5 + $0xbf8] sm:$0xf0]  ;;  %5262 = vmatmul.bf16.vlgmr.msra.gmra.mxu3 %v10444_v19 }
 0x407   : > { %5306 = vmatpush.bf16.msrb.mxu3 %v7274_v23  ;;  %v9075_v41 = vld [vmem:[%s13286_s5 + $0xddc] sm:$0xf]  ;;  %5286 = vmatpush.bf16.msrb.mxu1 %v6570_v26  ;;  %v7786_v51 = vor.u32 %v9011_v53, %v7783_v39 }
 0x408   : > { %v8039_v42 = vld [vmem:[%s13286_s5 + $0xdf8] sm:$0xf0]  ;;  %5322 = vmatpush.bf16.msrb.mxu0 %v7434_v57 }
 0x409   : > { %v8867_v43 = vld [vmem:[%s13286_s5 + $0x75c] sm:$0xf]  ;;  %5299 = vmatpush.bf16.msrb.mxu2 %v6826_v31  ;;  %v8042_v52 = vor.u32 %v9075_v41, %v8039_v42 }
 0x40a   : > { %v7207_v45 = vld [vmem:[%s13286_s5 + $0x778] sm:$0xf0] }
 0x40b   : > { %v8915_v30 = vld [vmem:[%s13286_s5 + $0x8dc] sm:$0xf]  ;;  %5307 = vmatpush.bf16.msrb.mxu3 %v7242_v38  ;;  %v7210_v24 = vor.u32 %v8867_v43, %v7207_v45  ;;  %5287 = vmatpush.bf16.msrb.mxu1 %v6538_v47 }
 0x40c   : > { %v7399_v54 = vld [vmem:[%s13286_s5 + $0x8f8] sm:$0xf0] }
 0x40d   : > { %v9003_v55 = vld [vmem:[%s13286_s5 + $0xb9c] sm:$0xf]  ;;  %5300 = vmatpush.bf16.msrb.mxu2 %v6794_v0  ;;  %v7402_v35 = vor.u32 %v8915_v30, %v7399_v54 }
 0x40e   : > { %v7751_v59 = vld [vmem:[%s13286_s5 + $0xbb8] sm:$0xf0]  ;;  %5288 = vmatmul.bf16.vlgmr.msrb.gmra.mxu1 %v10229_v10 }
 0x40f   : > { %v9067_v60 = vld [vmem:[%s13286_s5 + $0xd9c] sm:$0xf]  ;;  %5332 = vmatpush.bf16.msra.mxu1 %v7786_v51  ;;  %v7754_v2 = vor.u32 %v9003_v55, %v7751_v59  ;;  %5308 = vmatpush.bf16.msrb.mxu3 %v7210_v24 }
 0x410   : > { %v8007_v61 = vld [vmem:[%s13286_s5 + $0xdb8] sm:$0xf0]  ;;  %5301 = vmatmul.bf16.vlgmr.msrb.gmra.mxu2 %v10237_v14  ;;  %5323 = vmatpush.bf16.msrb.mxu0 %v7402_v35  ;;  %v5083_v35 = vpop.f32.mrf.mxu1 }
 0x411   : > { %v8859_v62 = vld [vmem:[%s13286_s5 + $0x71c] sm:$0xf]  ;;  %5345 = vmatpush.bf16.msra.mxu2 %v8042_v52  ;;  %v8010_v3 = vor.u32 %v9067_v60, %v8007_v61  ;;  %v12962_v61 = vpop.f32.mrf.mxu2  ;;  %v9144_v35 = vld [vmem:[%s13288_s7] sm:$0xff] }
 0x412   : > { %v7175_v63 = vld [vmem:[%s13286_s5 + $0x738] sm:$0xf0] }
 0x413   : > { %v8907_v46 = vld [vmem:[%s13286_s5 + $0x89c] sm:$0xf]  ;;  %v7178_v8 = vor.u32 %v8859_v62, %v7175_v63  ;;  %5333 = vmatpush.bf16.msra.mxu1 %v7754_v2 }
 0x414   : > { %v7367_v6 = vld [vmem:[%s13286_s5 + $0x8b8] sm:$0xf0] }
 0x415   : > { %v8995_v7 = vld [vmem:[%s13286_s5 + $0xb5c] sm:$0xf]  ;;  %v7370_v58 = vor.u32 %v8907_v46, %v7367_v6  ;;  %5346 = vmatpush.bf16.msra.mxu2 %v8010_v3  ;;  %5309 = vmatpush.bf16.msrb.mxu3 %v7178_v8  ;;  %v9150_v46 = vld [vmem:[%s13288_s7 + $0x30] sm:$0xff] }
 0x416   : > { %v7719_v9 = vld [vmem:[%s13286_s5 + $0xb78] sm:$0xf0] }
 0x417   : > { %v9059_v12 = vld [vmem:[%s13286_s5 + $0xd5c] sm:$0xf]  ;;  %v7722_v17 = vor.u32 %v8995_v7, %v7719_v9  ;;  %5324 = vmatpush.bf16.msrb.mxu0 %v7370_v58  ;;  %v5057_v7 = vpop.f32.mrf.mxu3 }
 0x418   : > { %v7975_v13 = vld [vmem:[%s13286_s5 + $0xd78] sm:$0xf0] }
 0x419   : > { %v8851_v10 = vld [vmem:[%s13286_s5 + $0x6dc] sm:$0xf]  ;;  %v7978_v18 = vor.u32 %v9059_v12, %v7975_v13  ;;  %5334 = vmatpush.bf16.msra.mxu1 %v7722_v17 }
 0x41a   : > { %v7143_v15 = vld [vmem:[%s13286_s5 + $0x6f8] sm:$0xf0] }
 0x41b   : > { %v8899_v20 = vld [vmem:[%s13286_s5 + $0x85c] sm:$0xf]  ;;  %v7146_v23 = vor.u32 %v8851_v10, %v7143_v15  ;;  %5347 = vmatpush.bf16.msra.mxu2 %v7978_v18  ;;  %v9149_v18 = vld [vmem:[%s13288_s7 + $0x28] sm:$0xff] }
 0x41c   : > { %v7335_v14 = vld [vmem:[%s13286_s5 + $0x878] sm:$0xf0] }
 0x41d   : > { %v8987_v21 = vld [vmem:[%s13286_s5 + $0xb1c] sm:$0xf]  ;;  %v7338_v33 = vor.u32 %v8899_v20, %v7335_v14  ;;  %5310 = vmatpush.bf16.msrb.mxu3 %v7146_v23 }
 0x41e   : > { %v7687_v26 = vld [vmem:[%s13286_s5 + $0xb38] sm:$0xf0] }
 0x41f   : > { %v9051_v27 = vld [vmem:[%s13286_s5 + $0xd1c] sm:$0xf]  ;;  %v7690_v34 = vor.u32 %v8987_v21, %v7687_v26  ;;  %5325 = vmatpush.bf16.msrb.mxu0 %v7338_v33  ;;  %v5096_v26 = vpop.f32.mrf.mxu2  ;;  %v13014_v33 = vpop.f32.mrf.mxu0 }
 0x420   : > { %v7943_v29 = vld [vmem:[%s13286_s5 + $0xd38] sm:$0xf0]  ;;  %v9152_v26 = vld [vmem:[%s13288_s7 + $0x40] sm:$0xff] }
 0x421   : > { %v8843_v50 = vld [vmem:[%s13286_s5 + $0x69c] sm:$0xf]  ;;  %v7946_v37 = vor.u32 %v9051_v27, %v7943_v29  ;;  %5335 = vmatpush.bf16.msra.mxu1 %v7690_v34  ;;  %v9148_v34 = vld [vmem:[%s13288_s7 + $0x20] sm:$0xff] }
 0x422   : > { %v7111_v31 = vld [vmem:[%s13286_s5 + $0x6b8] sm:$0xf0] }
 0x423   : > { %v8891_v22 = vld [vmem:[%s13286_s5 + $0x81c] sm:$0xf]  ;;  %v7114_v38 = vor.u32 %v8843_v50, %v7111_v31  ;;  %5348 = vmatpush.bf16.msra.mxu2 %v7946_v37 }
 0x424   : > { %v7303_v28 = vld [vmem:[%s13286_s5 + $0x838] sm:$0xf0] }
 0x425   : > { %v8979_v53 = vld [vmem:[%s13286_s5 + $0xadc] sm:$0xf]  ;;  %v7306_v45 = vor.u32 %v8891_v22, %v7303_v28  ;;  %5311 = vmatpush.bf16.msrb.mxu3 %v7114_v38 }
 0x426   : > { %v7655_v39 = vld [vmem:[%s13286_s5 + $0xaf8] sm:$0xf0] }
 0x427   : > { %v9043_v41 = vld [vmem:[%s13286_s5 + $0xcdc] sm:$0xf]  ;;  %v7658_v0 = vor.u32 %v8979_v53, %v7655_v39  ;;  %5326 = vmatpush.bf16.msrb.mxu0 %v7306_v45  ;;  %v9158_v39 = vld [vmem:[%s13288_s7 + $0x70] sm:$0xff]  ;;  %v5122_v45 = vpop.f32.mrf.mxu0 }
 0x428   : > { %v7911_v42 = vld [vmem:[%s13286_s5 + $0xcf8] sm:$0xf0] }
 0x429   : > { %v8835_v47 = vld [vmem:[%s13286_s5 + $0x65c] sm:$0xf]  ;;  %v7914_v57 = vor.u32 %v9043_v41, %v7911_v42  ;;  %5336 = vmatpush.bf16.msra.mxu1 %v7658_v0  ;;  %v9166_v41 = vld [vmem:[%s13288_s7 + $0xb0] sm:$0xff] }
 0x42a   : > { %v7079_v43 = vld [vmem:[%s13286_s5 + $0x678] sm:$0xf0]  ;;  %5327 = vmatmul.bf16.vlgmr.msrb.gmra.mxu0 %v10319_v5  ;;  %v9146_v0 = vld [vmem:[%s13288_s7 + $0x10] sm:$0xff] }
 0x42b   : > { %v9151_v51 = vld [vmem:[%s13288_s7 + $0x38] sm:$0xff]  ;;  %v7082_v30 = vor.u32 %v8835_v47, %v7079_v43  ;;  %5349 = vmatpush.bf16.msra.mxu2 %v7914_v57 }
 0x42c   : > { %v8971_v52 = vld [vmem:[%s13286_s5 + $0xa9c] sm:$0xf]  ;;  %5771 = vmatpush.bf16.msra.mxu0 %v9151_v51 }
 0x42d   : > { %v7623_v54 = vld [vmem:[%s13286_s5 + $0xab8] sm:$0xf0]  ;;  %5312 = vmatpush.bf16.msrb.mxu3 %v7082_v30  ;;  %v9145_v30 = vld [vmem:[%s13288_s7 + $0x8] sm:$0xff] }
 0x42e   : > { %v9035_v55 = vld [vmem:[%s13286_s5 + $0xc9c] sm:$0xf]  ;;  %v7626_v2 = vor.u32 %v8971_v52, %v7623_v54  ;;  %v9156_v54 = vld [vmem:[%s13288_s7 + $0x60] sm:$0xff] }
 0x42f   : > { %v7879_v24 = vld [vmem:[%s13286_s5 + $0xcb8] sm:$0xf0] }
 0x430   : > { %v8827_v59 = vld [vmem:[%s13286_s5 + $0x61c] sm:$0xf]  ;;  %v7882_v3 = vor.u32 %v9035_v55, %v7879_v24  ;;  %5337 = vmatpush.bf16.msra.mxu1 %v7626_v2  ;;  %5772 = vmatpush.bf16.msra.mxu0 %v9150_v46  ;;  %v13069_v55 = vpop.f32.mrf.mxu3  ;;  %v13071_v24 = vpop.f32.mrf.mxu1 }
 0x431   : > { %v7047_v60 = vld [vmem:[%s13286_s5 + $0x638] sm:$0xf0] }
 0x432   : > { %v9139_v62 = vld [vmem:[%s13286_s5 + $0xfdc] sm:$0xf]  ;;  %v7050_v8 = vor.u32 %v8827_v59, %v7047_v60  ;;  %5350 = vmatpush.bf16.msra.mxu2 %v7882_v3  ;;  %v9164_v59 = vld [vmem:[%s13288_s7 + $0xa0] sm:$0xff]  ;;  %v5371_v3 = vmax.f32 %v11354_v44, 0.0 }
 0x433   : > { %v8295_v63 = vld [vmem:[%s13286_s5 + $0xff8] sm:$0xf0] }
 0x434   : > { %v8963_v6 = vld [vmem:[%s13286_s5 + $0xa5c] sm:$0xf]  ;;  %v8298_v10 = vor.u32 %v9139_v62, %v8295_v63  ;;  %5313 = vmatpush.bf16.msrb.mxu3 %v7050_v8  ;;  %5773 = vmatpush.bf16.msra.mxu0 %v9149_v18  ;;  %v13095_v8 = vpop.f32.mrf.mxu2 }
 0x435   : > { %v7591_v9 = vld [vmem:[%s13286_s5 + $0xa78] sm:$0xf0] }
 0x436   : > { %v9027_v12 = vld [vmem:[%s13286_s5 + $0xc5c] sm:$0xf]  ;;  %v7594_v16 = vor.u32 %v8963_v6, %v7591_v9 }
 0x437   : > { %v7847_v13 = vld [vmem:[%s13286_s5 + $0xc78] sm:$0xf0]  ;;  %5314 = vmatmul.bf16.vlgmr.msrb.gmra.mxu3 %v10286_v1 }
 0x438   : > { %v9131_v15 = vld [vmem:[%s13286_s5 + $0xf9c] sm:$0xf]  ;;  %v7850_v17 = vor.u32 %v9027_v12, %v7847_v13  ;;  %5358 = vmatpush.bf16.msra.mxu3 %v8298_v10  ;;  %5338 = vmatpush.bf16.msra.mxu1 %v7594_v16  ;;  %v9154_v12 = vld [vmem:[%s13288_s7 + $0x50] sm:$0xff]  ;;  %v5379_v13 = vpack.c.bf16 %v5371_v3, %v5371_v3  ;;  %v5109_v10 = vpop.f32.mrf.mxu3  ;;  %v9168_v3 = vld [vmem:[%s13288_s7 + $0xc0] sm:$0xff] }
 0x439   : > { %v8263_v58 = vld [vmem:[%s13286_s5 + $0xfb8] sm:$0xf0]  ;;  %5774 = vmatpush.bf16.msra.mxu0 %v9148_v34  ;;  %v9182_v16 = vld [vmem:[%s13288_s7 + $0x130] sm:$0xff]  ;;  %v13139_v34 = vpop.f32.mrf.mxu0 }
 0x43a   : > { %v8955_v5 = vld [vmem:[%s13286_s5 + $0xa1c] sm:$0xf]  ;;  %v8266_v23 = vor.u32 %v9131_v15, %v8263_v58  ;;  %5351 = vmatpush.bf16.msra.mxu2 %v7850_v17  ;;  %v5135_v15 = vpop.f32.mrf.mxu1  ;;  %v9162_v58 = vld [vmem:[%s13288_s7 + $0x90] sm:$0xff] }
 0x43b   : > { %v7559_v20 = vld [vmem:[%s13286_s5 + $0xa38] sm:$0xf0] }
 0x43c   : > { %v9019_v14 = vld [vmem:[%s13286_s5 + $0xc1c] sm:$0xf]  ;;  %v7562_v50 = vor.u32 %v8955_v5, %v7559_v20  ;;  %5359 = vmatpush.bf16.msra.mxu3 %v8266_v23  ;;  %v9153_v5 = vld [vmem:[%s13288_s7 + $0x48] sm:$0xff]  ;;  %v9174_v23 = vld [vmem:[%s13288_s7 + $0xf0] sm:$0xff] }
 0x43d   : > { %v7815_v21 = vld [vmem:[%s13286_s5 + $0xc38] sm:$0xf0]  ;;  %v9161_v20 = vld [vmem:[%s13288_s7 + $0x88] sm:$0xff] }
 0x43e   : > { %v9123_v27 = vld [vmem:[%s13286_s5 + $0xf5c] sm:$0xf]  ;;  %v7818_v31 = vor.u32 %v9019_v14, %v7815_v21  ;;  %5339 = vmatpush.bf16.msra.mxu1 %v7562_v50  ;;  %v9181_v14 = vld [vmem:[%s13288_s7 + $0x128] sm:$0xff]  ;;  %v5148_v21 = vpop.f32.mrf.mxu2  ;;  %v9180_v50 = vld [vmem:[%s13288_s7 + $0x120] sm:$0xff] }
 0x43f   : > { %v8231_v29 = vld [vmem:[%s13286_s5 + $0xf78] sm:$0xf0] }
 0x440   : > { %v9159_v37 = vld [vmem:[%s13288_s7 + $0x78] sm:$0xff]  ;;  %v8234_v28 = vor.u32 %v9123_v27, %v8231_v29  ;;  %5352 = vmatpush.bf16.msra.mxu2 %v7818_v31  ;;  %v5372_v27 = vmax.f32 %v11717_v25, 0.0  ;;  %v9160_v29 = vld [vmem:[%s13288_s7 + $0x80] sm:$0xff]  ;;  %v5373_v31 = vmax.f32 %v12126_v32, 0.0  ;;  %v9173_v32 = vld [vmem:[%s13288_s7 + $0xe8] sm:$0xff] }
 0x441   : > { %v9167_v22 = vld [vmem:[%s13288_s7 + $0xb8] sm:$0xff]  ;;  %5340 = vmatmul.bf16.vlgmr.msra.gmra.mxu1 %v10330_v11  ;;  %v9157_v11 = vld [vmem:[%s13288_s7 + $0x68] sm:$0xff] }
 0x442   : > { %v9115_v1 = vld [vmem:[%s13286_s5 + $0xf1c] sm:$0xf]  ;;  %5784 = vmatpush.bf16.msrb.mxu1 %v9159_v37  ;;  %5360 = vmatpush.bf16.msra.mxu3 %v8234_v28  ;;  %v13147_v37 = vld [vmem:[%s13287_s6] sm:$0xff] }
 0x443   : > { %v8199_v53 = vld [vmem:[%s13286_s5 + $0xf38] sm:$0xf0]  ;;  %5353 = vmatmul.bf16.vlgmr.msra.gmra.mxu2 %v10402_v36  ;;  %v9165_v36 = vld [vmem:[%s13288_s7 + $0xa8] sm:$0xff] }
 0x444   : > { %v9147_v38 = vld [vmem:[%s13288_s7 + $0x18] sm:$0xff]  ;;  %5797 = vmatpush.bf16.msrb.mxu2 %v9167_v22  ;;  %v8202_v42 = vor.u32 %v9115_v1, %v8199_v53  ;;  %v4528_v22 = vperm.slane %v13147_v37, 5  ;;  %v5381_v1 = vpack.c.bf16 %v5373_v31, %v5373_v31  ;;  %v9190_v53 = vld [vmem:[%s13288_s7 + $0x170] sm:$0xff] }
 0x445   : > { %v9107_v47 = vld [vmem:[%s13286_s5 + $0xedc] sm:$0xf]  ;;  %5775 = vmatpush.bf16.msra.mxu0 %v9147_v38 }
 0x446   : > { %v8167_v43 = vld [vmem:[%s13286_s5 + $0xef8] sm:$0xf0]  ;;  %5785 = vmatpush.bf16.msrb.mxu1 %v9158_v39  ;;  %5361 = vmatpush.bf16.msra.mxu3 %v8202_v42  ;;  %v5069_v38 = vadd.f32 %v12837_v49, %v4528_v22  ;;  %v9172_v39 = vld [vmem:[%s13288_s7 + $0xe0] sm:$0xff]  ;;  %v9178_v42 = vld [vmem:[%s13288_s7 + $0x110] sm:$0xff] }
 0x447   : > { %v8170_v57 = vor.u32 %v9107_v47, %v8167_v43  ;;  %v9099_v51 = vld [vmem:[%s13286_s5 + $0xe9c] sm:$0xf]  ;;  %v5174_v47 = vpop.f32.mrf.mxu0  ;;  %v9189_v49 = vld [vmem:[%s13288_s7 + $0x168] sm:$0xff] }
 0x448   : > { %5798 = vmatpush.bf16.msrb.mxu2 %v9166_v41  ;;  %v8135_v52 = vld [vmem:[%s13286_s5 + $0xeb8] sm:$0xf0]  ;;  %v5082_v41 = vadd.f32 %v12913_v56, %v5069_v38 }
 0x449   : > { %5776 = vmatpush.bf16.msra.mxu0 %v9146_v0  ;;  %v8138_v60 = vor.u32 %v9099_v51, %v8135_v52  ;;  %v9091_v62 = vld [vmem:[%s13286_s5 + $0xe5c] sm:$0xf]  ;;  %v9177_v0 = vld [vmem:[%s13288_s7 + $0x108] sm:$0xff]  ;;  %v9170_v51 = vld [vmem:[%s13288_s7 + $0xd0] sm:$0xff] }
 0x44a   : > { %5786 = vmatpush.bf16.msrb.mxu1 %v9157_v11  ;;  %5362 = vmatpush.bf16.msra.mxu3 %v8170_v57  ;;  %v8103_v63 = vld [vmem:[%s13286_s5 + $0xe78] sm:$0xf0]  ;;  %v5095_v43 = vadd.f32 %v12962_v61, %v5082_v41  ;;  %v5056_v11 = vadd.f32 %v12924_v48, %v12767_v4  ;;  %v9188_v61 = vld [vmem:[%s13288_s7 + $0x160] sm:$0xff]  ;;  %v5159_v57 = vpop.f32.mrf.mxu3 }
 0x44b   : > { %v9155_v2 = vld [vmem:[%s13288_s7 + $0x58] sm:$0xff]  ;;  %v8106_v7 = vor.u32 %v9091_v62, %v8103_v63  ;;  %v9176_v4 = vld [vmem:[%s13288_s7 + $0x100] sm:$0xff] }
 0x44c   : > { %5799 = vmatpush.bf16.msrb.mxu2 %v9165_v36  ;;  %v9163_v46 = vld [vmem:[%s13288_s7 + $0x98] sm:$0xff]  ;;  %v5108_v56 = vadd.f32 %v13069_v55, %v5095_v43  ;;  %v13180_v36 = vpop.f32.mrf.mxu1  ;;  %v9198_v55 = vld [vmem:[%s13288_s7 + $0x1b0] sm:$0xff] }
 0x44d   : > { %5777 = vmatpush.bf16.msra.mxu0 %v9145_v30  ;;  %v9183_v6 = vld [vmem:[%s13288_s7 + $0x138] sm:$0xff]  ;;  %v5375_v30 = vmax.f32 %v5056_v11, 0.0  ;;  %v9204_v11 = vld [vmem:[%s13288_s7 + $0x1e0] sm:$0xff] }
 0x44e   : > { %5787 = vmatpush.bf16.msrb.mxu1 %v9156_v54  ;;  %5363 = vmatpush.bf16.msra.mxu3 %v8138_v60  ;;  %v9083_v9 = vld [vmem:[%s13286_s5 + $0xe1c] sm:$0xf]  ;;  %v5121_v52 = vadd.f32 %v13014_v33, %v5108_v56  ;;  %v9169_v33 = vld [vmem:[%s13288_s7 + $0xc8] sm:$0xff]  ;;  %v5198_v60 = vpop.f32.mrf.mxu2 }
 0x44f   : > { %v8071_v44 = vld [vmem:[%s13286_s5 + $0xe38] sm:$0xf0]  ;;  %v5383_v62 = vpack.c.bf16 %v5375_v30, %v5375_v30  ;;  %v9205_v56 = vld [vmem:[%s13288_s7 + $0x1e8] sm:$0xff] }
 0x450   : > { %5800 = vmatpush.bf16.msrb.mxu2 %v9164_v59  ;;  %v8074_v17 = vor.u32 %v9083_v9, %v8071_v44  ;;  %v9175_v18 = vld [vmem:[%s13288_s7 + $0xf8] sm:$0xff]  ;;  %v5134_v59 = vadd.f32 %v13071_v24, %v5121_v52  ;;  %v9197_v24 = vld [vmem:[%s13288_s7 + $0x1a8] sm:$0xff] }
 0x451   : > { %5778 = vmatpush.bf16.msra.mxu0 %v9144_v35  ;;  %v9191_v25 = vld [vmem:[%s13288_s7 + $0x178] sm:$0xff]  ;;  %v9186_v35 = vld [vmem:[%s13288_s7 + $0x150] sm:$0xff] }
 0x452   : > { %5788 = vmatpush.bf16.msrb.mxu1 %v9155_v2  ;;  %5364 = vmatpush.bf16.msra.mxu3 %v8106_v7  ;;  %v9179_v28 = vld [vmem:[%s13288_s7 + $0x118] sm:$0xff]  ;;  %v5161_v2 = vpop.f32.mrf.mxu3  ;;  %v9185_v7 = vld [vmem:[%s13288_s7 + $0x148] sm:$0xff] }
 0x453   : > { %v9171_v45 = vld [vmem:[%s13288_s7 + $0xd8] sm:$0xff] }
 0x454   : > { %5801 = vmatpush.bf16.msrb.mxu2 %v9163_v46  ;;  %5779 = vmatmul.bf16.vlgmr.msra.gmra.mxu0 %v5379_v13  ;;  %v9199_v48 = vld [vmem:[%s13288_s7 + $0x1b8] sm:$0xff]  ;;  %v5187_v63 = vpop.f32.mrf.mxu1  ;;  %v5374_v46 = vmax.f32 %v12530_v40, 0.0  ;;  %v9196_v13 = vld [vmem:[%s13288_s7 + $0x1a0] sm:$0xff] }
 0x455   : > { %5823 = vmatpush.bf16.msrb.mxu0 %v9183_v6  ;;  %v9187_v54 = vld [vmem:[%s13288_s7 + $0x158] sm:$0xff]  ;;  %v5147_v6 = vadd.f32 %v13095_v8, %v5134_v59  ;;  %v9184_v40 = vld [vmem:[%s13288_s7 + $0x140] sm:$0xff]  ;;  %v5224_v10 = vpop.f32.mrf.mxu0 }
 0x456   : > { %5789 = vmatpush.bf16.msrb.mxu1 %v9154_v12  ;;  %5365 = vmatpush.bf16.msra.mxu3 %v8074_v17  ;;  %v5382_v44 = vpack.c.bf16 %v5374_v46, %v5374_v46  ;;  %v5200_v12 = vpop.f32.mrf.mxu2  ;;  %v9195_v15 = vld [vmem:[%s13288_s7 + $0x198] sm:$0xff] }
 0x457   : > { %v5160_v9 = vadd.f32 %v5159_v57, %v5147_v6 }
 0x458   : > { %5802 = vmatpush.bf16.msrb.mxu2 %v9162_v58 }
 0x459   : > { %5824 = vmatpush.bf16.msrb.mxu0 %v9182_v16  ;;  %5366 = vmatmul.bf16.vlgmr.msra.gmra.mxu3 %v10444_v19  ;;  %v5380_v19 = vpack.c.bf16 %v5372_v27, %v5372_v27  ;;  %v5376_v8 = vmax.f32 %v5160_v9, 0.0  ;;  %v9194_v16 = vld [vmem:[%s13288_s7 + $0x190] sm:$0xff] }
 0x45a   : > { %5810 = vmatpush.bf16.msrb.mxu3 %v9175_v18  ;;  %5790 = vmatpush.bf16.msrb.mxu1 %v9153_v5  ;;  %v9193_v18 = vld [vmem:[%s13288_s7 + $0x188] sm:$0xff] }
 0x45b   : > { %v5384_v58 = vpack.c.bf16 %v5376_v8, %v5376_v8 }
 0x45c   : > { %5803 = vmatpush.bf16.msrb.mxu2 %v9161_v20 }
 0x45d   : > { %5825 = vmatpush.bf16.msrb.mxu0 %v9181_v14  ;;  %v5226_v17 = vpop.f32.mrf.mxu0  ;;  %v9192_v14 = vld [vmem:[%s13288_s7 + $0x180] sm:$0xff] }
 0x45e   : > { %5811 = vmatpush.bf16.msrb.mxu3 %v9174_v23  ;;  %5791 = vmatpush.bf16.msrb.mxu1 %v9152_v26  ;;  %v4529_v23 = vperm.slane %v13147_v37, 6 }
 0x460   : > { %5804 = vmatpush.bf16.msrb.mxu2 %v9160_v29  ;;  %v5173_v29 = vadd.f32 %v13139_v34, %v4529_v23 }
 0x461   : > { %5826 = vmatpush.bf16.msrb.mxu0 %v9180_v50  ;;  %5792 = vmatmul.bf16.vlgmr.msrb.gmra.mxu1 %v5380_v19 }
 0x462   : > { %5836 = vmatpush.bf16.msra.mxu1 %v9191_v25  ;;  %5812 = vmatpush.bf16.msrb.mxu3 %v9173_v32  ;;  %v5186_v50 = vadd.f32 %v13180_v36, %v5173_v29 }
 0x463   : > { %5805 = vmatmul.bf16.vlgmr.msrb.gmra.mxu2 %v5381_v1 }
 0x464   : > { %5849 = vmatpush.bf16.msra.mxu2 %v9199_v48  ;;  %v5199_v25 = vadd.f32 %v5198_v60, %v5186_v50 }
 0x465   : > { %5827 = vmatpush.bf16.msrb.mxu0 %v9179_v28 }
 0x466   : > { %5837 = vmatpush.bf16.msra.mxu1 %v9190_v53  ;;  %5813 = vmatpush.bf16.msrb.mxu3 %v9172_v39 }
 0x467   : > { %v5211_v5 = vpop.f32.mrf.mxu3 }
 0x468   : > { %5850 = vmatpush.bf16.msra.mxu2 %v9198_v55  ;;  %v5212_v22 = vadd.f32 %v5211_v5, %v5199_v25  ;;  %v4530_v55 = vperm.slane %v13147_v37, 7 }
 0x469   : > { %5828 = vmatpush.bf16.msrb.mxu0 %v9178_v42  ;;  %v9207_v42 = vld [vmem:[%s13288_s7 + $0x1f8] sm:$0xff] }
 0x46a   : > { %5838 = vmatpush.bf16.msra.mxu1 %v9189_v49  ;;  %5814 = vmatpush.bf16.msrb.mxu3 %v9171_v45  ;;  %v5225_v19 = vadd.f32 %v5224_v10, %v5212_v22  ;;  %v9206_v49 = vld [vmem:[%s13288_s7 + $0x1f0] sm:$0xff] }
 0x46b   : > { %v5237_v20 = vpop.f32.mrf.mxu1 }
 0x46c   : > { %5851 = vmatpush.bf16.msra.mxu2 %v9197_v24  ;;  %v5238_v28 = vadd.f32 %v5237_v20, %v5225_v19 }
 0x46d   : > { %5829 = vmatpush.bf16.msrb.mxu0 %v9177_v0 }
 0x46e   : > { %5839 = vmatpush.bf16.msra.mxu1 %v9188_v61  ;;  %5815 = vmatpush.bf16.msrb.mxu3 %v9170_v51  ;;  %v9203_v61 = vld [vmem:[%s13288_s7 + $0x1d8] sm:$0xff]  ;;  %v9202_v51 = vld [vmem:[%s13288_s7 + $0x1d0] sm:$0xff] }
 0x46f   : > { %v5213_v26 = vpop.f32.mrf.mxu3 }
 0x470   : > { %5852 = vmatpush.bf16.msra.mxu2 %v9196_v13 }
 0x471   : > { %5830 = vmatpush.bf16.msrb.mxu0 %v9176_v4  ;;  %v9201_v4 = vld [vmem:[%s13288_s7 + $0x1c8] sm:$0xff] }
 0x472   : > { %5840 = vmatpush.bf16.msra.mxu1 %v9187_v54  ;;  %5816 = vmatpush.bf16.msrb.mxu3 %v9169_v33  ;;  %v9200_v54 = vld [vmem:[%s13288_s7 + $0x1c0] sm:$0xff] }
 0x473   : > { %v5250_v21 = vpop.f32.mrf.mxu2  ;;  %v5239_v27 = vpop.f32.mrf.mxu1 }
 0x474   : > { %5831 = vmatmul.bf16.vlgmr.msrb.gmra.mxu0 %v5383_v62  ;;  %5853 = vmatpush.bf16.msra.mxu2 %v9195_v15  ;;  %v5251_v53 = vadd.f32 %v5250_v21, %v5238_v28 }
 0x476   : > { %5841 = vmatpush.bf16.msra.mxu1 %v9186_v35  ;;  %5817 = vmatpush.bf16.msrb.mxu3 %v9168_v3  ;;  %v5276_v32 = vpop.f32.mrf.mxu0 }
 0x477   : > { %v5277_v62 = vadd.f32 %v5276_v32, %v4530_v55 }
 0x478   : > { %5854 = vmatpush.bf16.msra.mxu2 %v9194_v16 }
 0x479   : > { %5818 = vmatmul.bf16.vlgmr.msrb.gmra.mxu3 %v5382_v44 }
 0x47a   : > { %5842 = vmatpush.bf16.msra.mxu1 %v9185_v7  ;;  %5862 = vmatpush.bf16.msra.mxu3 %v9207_v42  ;;  %v1504_v7 = vld [vmem:[%s13289_s8] sm:$0x1] }
 0x47b   : > { %v5252_v31 = vpop.f32.mrf.mxu2 }
 0x47c   : > { %5855 = vmatpush.bf16.msra.mxu2 %v9193_v18 }
 0x47e   : > { %5843 = vmatpush.bf16.msra.mxu1 %v9184_v40  ;;  %v5278_v1 = vpop.f32.mrf.mxu0  ;;  %5863 = vmatpush.bf16.msra.mxu3 %v9206_v49 }
 0x480   : > { %5856 = vmatpush.bf16.msra.mxu2 %v9192_v14 }
 0x481   : > { %5844 = vmatmul.bf16.vlgmr.msra.gmra.mxu1 %v5384_v58 }
 0x482   : > { %5864 = vmatpush.bf16.msra.mxu3 %v9205_v56 }
 0x486   : > { %5865 = vmatpush.bf16.msra.mxu3 %v9204_v11 }
 0x489   : > { %v5263_v39 = vpop.f32.mrf.mxu3 }
 0x48a   : > { %v5264_v41 = vadd.f32 %v5263_v39, %v5251_v53  ;;  %5866 = vmatpush.bf16.msra.mxu3 %v9203_v61 }
 0x48b   : > { %v5289_v38 = vpop.f32.mrf.mxu1 }
 0x48c   : > { %v5377_v47 = vmax.f32 %v5264_v41, 0.0  ;;  %v5290_v63 = vadd.f32 %v5289_v38, %v5277_v62 }
 0x48e   : > { %v5385_v34 = vpack.c.bf16 %v5377_v47, %v5377_v47  ;;  %5867 = vmatpush.bf16.msra.mxu3 %v9202_v51 }
 0x490   : > { %5857 = vmatmul.bf16.vlgmr.msra.gmra.mxu2 %v5385_v34 }
 0x491   : > { %v5265_v0 = vpop.f32.mrf.mxu3 }
 0x492   : > { %5868 = vmatpush.bf16.msra.mxu3 %v9201_v4 }
 0x493   : > { %v5302_v43 = vpop.f32.mrf.mxu2  ;;  %v5291_v45 = vpop.f32.mrf.mxu1 }
 0x494   : > { %v5303_v2 = vadd.f32 %v5302_v43, %v5290_v63 }
 0x496   : > { %5869 = vmatpush.bf16.msra.mxu3 %v9200_v54 }
 0x49b   : > { %v5304_v36 = vpop.f32.mrf.mxu2 }
 0x4a7   : > { %v5328_v57 = vpop.f32.mrf.mxu0 }
 0x4af   : > { %v5330_v52 = vpop.f32.mrf.mxu0 }
 0x4ba   : > { %v5315_v48 = vpop.f32.mrf.mxu3 }
 0x4bb   : > { %v5316_v3 = vadd.f32 %v5315_v48, %v5303_v2 }
 0x4bd   : > { %v5329_v46 = vadd.f32 %v5328_v57, %v5316_v3 }
 0x4be   : > { %v5341_v30 = vpop.f32.mrf.mxu1 }
 0x4bf   : > { %v5342_v6 = vadd.f32 %v5341_v30, %v5329_v46 }
 0x4c2   : > { %v5317_v59 = vpop.f32.mrf.mxu3 }
 0x4c6   : > { %v5354_v33 = vpop.f32.mrf.mxu2  ;;  %v5343_v60 = vpop.f32.mrf.mxu1 }
 0x4c7   : > { %v5355_v12 = vadd.f32 %v5354_v33, %v5342_v6 }
 0x4ce   : > { %v5356_v35 = vpop.f32.mrf.mxu2 }
 0x4d1   : > { %v5780_v24 = vpop.f32.mrf.mxu0 }
 0x4d2   : > { %v5781_v44 = vadd.f32 %v5780_v24, %v1504_v7 }
 0x4d9   : > { %v5782_v9 = vpop.f32.mrf.mxu0 }
 0x4dc   : > { %v5367_v40 = vpop.f32.mrf.mxu3 }
 0x4dd   : > { %v5368_v8 = vadd.f32 %v5367_v40, %v5355_v12 }
 0x4de   : > { %v5793_v13 = vpop.f32.mrf.mxu1 }
 0x4df   : > { %v5794_v37 = vadd.f32 %v5793_v13, %v5781_v44  ;;  %v5378_v10 = vmax.f32 %v5368_v8, 0.0 }
 0x4e1   : > { %v5386_v15 = vpack.c.bf16 %v5378_v10, %v5378_v10 }
 0x4e3   : > { %5870 = vmatmul.bf16.vlgmr.msra.gmra.mxu3 %v5386_v15 }
 0x4e4   : > { %v5369_v18 = vpop.f32.mrf.mxu3 }
 0x4e6   : > { %v5806_v58 = vpop.f32.mrf.mxu2  ;;  %v5795_v17 = vpop.f32.mrf.mxu1 }
 0x4e7   : > { %v5807_v16 = vadd.f32 %v5806_v58, %v5794_v37 }
 0x4ee   : > { %v5808_v5 = vpop.f32.mrf.mxu2 }
 0x4f1   : > { %v5832_v20 = vpop.f32.mrf.mxu0 }
 0x4f9   : > { %v5834_v14 = vpop.f32.mrf.mxu0 }
 0x4fc   : > { %v5819_v21 = vpop.f32.mrf.mxu3 }
 0x4fd   : > { %v5820_v23 = vadd.f32 %v5819_v21, %v5807_v16 }
 0x4fe   : > { %v5845_v26 = vpop.f32.mrf.mxu1 }
 0x4ff   : > { %v5833_v27 = vadd.f32 %v5832_v20, %v5820_v23 }
 0x501   : > { %v5846_v29 = vadd.f32 %v5845_v26, %v5833_v27 }
 0x504   : > { %v5821_v50 = vpop.f32.mrf.mxu3 }
 0x506   : > { %v5847_v31 = vpop.f32.mrf.mxu1 }
 0x513   : > { %v5858_v25 = vpop.f32.mrf.mxu2 }
 0x514   : > { %v5859_v32 = vadd.f32 %v5858_v25, %v5846_v29 }
 0x51b   : > { %v5860_v22 = vpop.f32.mrf.mxu2 }
 0x566   : > { %v5871_v19 = vpop.f32.mrf.mxu3 }
 0x567   : > { %v5872_v28 = vadd.f32 %v5871_v19, %v5859_v32 }
 0x569   : > { %5875 = vst [vmem:[%s366_s20] sm:$0x1] %v5872_v28 }
 0x56e   : > { %v5873_v1 = vpop.f32.mrf.mxu3 }
 0x56f PF: > { %s19_s11 = sadd.s32 1, %s9260_s11   ;;  %s13291_s30 = smov %s9256_s10 }
 0x570   : > { %p16_p5 = scmp.ge.s32.totalorder %s19_s11, 4   ;;  %s13292_s10 = smov %s13294_s12 }
 0x572   :  { %18 = sbr.rel (!%p16_p5) target bundleno = 2 (0x2), region = 98 }

</bundles_post_ra>
